<compile_context>
chip_gen: v7x
topology: tpu7x:2x2x1
jax: 0.10.0
libtpu: 0.0.40
codegen_flags: <defaults>
</compile_context>

<pallas_src>
import numpy as np
import jax
import jax.numpy as jnp
from jax.experimental import pallas as pl
from jax.experimental.pallas import tpu as pltpu


def _round_up(x, m):
    return (x + m - 1) // m * m


def _deepfm_kernel(xt_ref, tblT_ref, g_ref, t1_ref, w2T_ref, t2_ref, w3_ref, c0_ref, o_ref):
    F, TB = xt_ref.shape
    NCOL, Vp = tblT_ref.shape
    h1 = t1_ref.shape[0]
    D = NCOL - h1

    x = xt_ref[...]                                                  # (F, TB) int32, batch on lanes
    vocab_iota = jax.lax.broadcasted_iota(jnp.int32, (Vp, TB), 0)    # vocab index along sublanes

    # Multi-hot over the offset vocabulary. Field index ranges are disjoint, so OR == sum
    # and the result is exactly F ones per column.
    hit = vocab_iota == x[0:1, :]
    for f in range(1, F):                                            # F is small -> static unroll
        hit = hit | (vocab_iota == x[f:f + 1, :])
    mh_bf = hit.astype(jnp.bfloat16)                                 # exact 0/1 MXU operand
    mh_f32 = hit.astype(jnp.float32)

    # ONE fused gather-matmul against the de-duplicated table
    #   rows = [ (emb @ (W1 * bn1_scale)).T | emb.T ]  ->  (NCOL, TB), f32 accumulation.
    acc = jnp.dot(tblT_ref[...], mh_bf, preferred_element_type=jnp.float32)

    a1 = acc[:h1, :]               # ((x_embed.view(B,-1) @ W1) * s1).T       (h1, TB)
    sum_e = acc[h1:h1 + D, :]      # (sum_f e_f).T                            (D, TB)

    # Linear term and -0.5 * sum(e^2) in a single f32 side path: g = fc - 0.5*row_sq.
    side = jnp.sum(mh_f32 * g_ref[...], axis=0, keepdims=True)       # (1, TB)
    # FM positive half: 0.5 * sum_d (sum_f e_fd)^2
    fm_pos = 0.5 * jnp.sum(sum_e * sum_e, axis=0, keepdims=True)     # (1, TB)

    # Deep part: BN scales pre-folded into weights, biases folded into t1/t2; eval dropout = identity.
    h = jnp.maximum(a1 + t1_ref[...], 0.0)
    h = jnp.dot(w2T_ref[...], h.astype(jnp.bfloat16), preferred_element_type=jnp.float32)
    h = jnp.maximum(h + t2_ref[...], 0.0)
    mlp = jnp.sum(h * w3_ref[...], axis=0, keepdims=True)            # (1, TB): N=1 layer on VPU/XLU

    o_ref[...] = side + fm_pos + mlp + c0_ref[...]                   # lane-dense (1, TB) store


def deepfm_forward(x, params, field_dims, *, tile_b=512):
    B, F = x.shape
    V, D = params["emb"].shape
    h1 = params["w1"].shape[1]
    h2 = params["w2"].shape[1]

    field_dims = np.asarray(field_dims)
    offsets = jnp.asarray(np.concatenate([[0], np.cumsum(field_dims)[:-1]]), jnp.int32)
    x_off = x.astype(jnp.int32) + offsets[None, :]                   # (B, F) global vocab ids

    # Fold eval-mode BatchNorm1d (running stats + affine) and the preceding Linear bias into
    # a per-feature scale (baked into weights) and shift (added in-kernel).
    def bn_fold(g, b, m, v, lin_bias, eps=1e-5):
        scale = g / jnp.sqrt(v + eps)
        shift = (lin_bias - m) * scale + b
        return scale.astype(jnp.float32), shift.astype(jnp.float32)

    s1, t1 = bn_fold(params["bn1_g"], params["bn1_b"], params["bn1_m"], params["bn1_v"], params["b1"])
    s2, t2 = bn_fold(params["bn2_g"], params["bn2_b"], params["bn2_m"], params["bn2_v"], params["b2"])

    # De-duplicated fused table (transposed): rows = [ (emb @ (W1*s1)).T | emb.T ]  -> (NCOL, Vp) bf16.
    emb = params["emb"].astype(jnp.float32)                          # (V, D)
    w1s = params["w1"].astype(jnp.float32) * s1[None, :]             # BN1 scale folded into W1
    w1s_3 = w1s.reshape(F, D, h1)
    field_of_v = np.repeat(np.arange(F), field_dims)                 # field owning each vocab row
    emb_w1 = jnp.einsum("vd,vdh->vh", emb, w1s_3[field_of_v])        # (V, h1), f32

    Vp = _round_up(V, 8)
    NCOL = h1 + D
    tblT = jnp.concatenate([emb_w1.T, emb.T], axis=0)                # (NCOL, V)
    if Vp != V:
        tblT = jnp.pad(tblT, ((0, 0), (0, Vp - V)))
    tblT = tblT.astype(jnp.bfloat16)

    # f32 side-path column: fc[v] - 0.5 * sum_d emb[v,d]^2   (keeps FM cancellation in f32).
    g = params["fcw"][:, 0].astype(jnp.float32) - 0.5 * jnp.sum(emb * emb, axis=1)
    if Vp != V:
        g = jnp.pad(g, (0, Vp - V))
    g_col = g[:, None]                                               # (Vp, 1)

    w2sT = (params["w2"].astype(jnp.float32) * s2[None, :]).T.astype(jnp.bfloat16)   # (h2, h1)
    t1_col = t1[:, None]                                             # (h1, 1)
    t2_col = t2[:, None]                                             # (h2, 1)
    w3_col = params["w3"].astype(jnp.float32).reshape(h2, 1)         # (h2, 1)
    c0 = (params["fcb"].reshape(1, 1) + params["b3"].reshape(1, 1)).astype(jnp.float32)

    # Batch tiling: batch lives on the lane axis. Keep tiles 128-aligned when multiple grid steps.
    if B <= tile_b:
        tb = _round_up(B, 8)
    else:
        tb = _round_up(tile_b, 128)
    Bp = _round_up(B, tb)
    if Bp != B:
        x_off = jnp.pad(x_off, ((0, Bp - B), (0, 0)))                # pad rows hit vocab 0; sliced off below
    xt = x_off.T                                                     # (F, Bp), batch on lanes

    def const_spec(shape):
        n = len(shape)
        return pl.BlockSpec(shape, lambda i, n=n: (0,) * n)          # VMEM-resident across grid steps

    flops = 2 * Bp * (Vp * NCOL + h1 * h2) + 8 * Bp * (Vp + D + h2)
    bytes_accessed = (xt.size * 4 + tblT.size * 2 + w2sT.size * 2
                      + (g_col.size + t1_col.size + t2_col.size + w3_col.size + 1) * 4 + Bp * 4)
    ce = pl.CostEstimate(flops=flops, transcendentals=0, bytes_accessed=bytes_accessed)

    out = pl.pallas_call(
        _deepfm_kernel,
        out_shape=jax.ShapeDtypeStruct((1, Bp), jnp.float32),
        grid=(Bp // tb,),
        in_specs=[
            pl.BlockSpec((F, tb), lambda i: (0, i)),  # x tile (batch on lanes)
            const_spec((NCOL, Vp)),                   # fused bf16 table
            const_spec((Vp, 1)),                      # f32 fc - 0.5*row_sq column
            const_spec((h1, 1)),                      # t1 (bias+BN shift)
            const_spec((h2, h1)),                     # (W2 * s2).T
            const_spec((h2, 1)),                      # t2
            const_spec((h2, 1)),                      # w3
            const_spec((1, 1)),                       # c0 = fc bias + final MLP bias
        ],
        out_specs=pl.BlockSpec((1, tb), lambda i: (0, i)),           # lane-dense output row
        compiler_params=pltpu.CompilerParams(dimension_semantics=("parallel",)),
        cost_estimate=ce,
    )(xt, tblT, g_col, t1_col, w2sT, t2_col, w3_col, c0)

    return out[0, :B][:, None]


def init_params(key, field_dims, embed_dim, mlp_layers, field_len):
    vocab = int(np.sum(field_dims))
    in_dim = field_len * embed_dim
    h1, h2 = mlp_layers
    ks = jax.random.split(key, 16)
    p = {}
    p["emb"] = 0.1 * jax.random.normal(ks[0], (vocab, embed_dim), jnp.float32)
    p["fcw"] = 0.1 * jax.random.normal(ks[1], (vocab, 1), jnp.float32)
    p["fcb"] = 0.01 * jax.random.normal(ks[2], (1, 1), jnp.float32)
    p["w1"] = 0.1 * jax.random.normal(ks[3], (in_dim, h1), jnp.float32)
    p["b1"] = 0.01 * jax.random.normal(ks[4], (h1,), jnp.float32)
    p["bn1_g"] = 1.0 + 0.1 * jax.random.normal(ks[5], (h1,), jnp.float32)
    p["bn1_b"] = 0.1 * jax.random.normal(ks[6], (h1,), jnp.float32)
    p["bn1_m"] = 0.1 * jax.random.normal(ks[7], (h1,), jnp.float32)
    p["bn1_v"] = 1.0 + 0.5 * jax.random.uniform(ks[8], (h1,), jnp.float32)
    p["w2"] = 0.1 * jax.random.normal(ks[9], (h1, h2), jnp.float32)
    p["b2"] = 0.01 * jax.random.normal(ks[10], (h2,), jnp.float32)
    p["bn2_g"] = 1.0 + 0.1 * jax.random.normal(ks[11], (h2,), jnp.float32)
    p["bn2_b"] = 0.1 * jax.random.normal(ks[12], (h2,), jnp.float32)
    p["bn2_m"] = 0.1 * jax.random.normal(ks[13], (h2,), jnp.float32)
    p["bn2_v"] = 1.0 + 0.5 * jax.random.uniform(ks[14], (h2,), jnp.float32)
    p["w3"] = 0.1 * jax.random.normal(ks[15], (h2, 1), jnp.float32)
    p["b3"] = jnp.zeros((1,), jnp.float32)
    return p


def deepfm_reference(x, params, field_dims):
    """Pure-JAX f32 reference mirroring the PyTorch forward (eval mode)."""
    B = x.shape[0]
    offsets = jnp.asarray(np.concatenate([[0], np.cumsum(field_dims)[:-1]]), jnp.int32)
    xi = x.astype(jnp.int32) + offsets[None, :]
    emb = params["emb"][xi]                                          # (B, F, D)
    lin = jnp.sum(params["fcw"][xi][..., 0], axis=1, keepdims=True) + params["fcb"]
    sum_e = jnp.sum(emb, axis=1)
    fm = 0.5 * jnp.sum(sum_e ** 2 - jnp.sum(emb ** 2, axis=1), axis=1, keepdims=True)

    def bn(h, g, b, m, v, eps=1e-5):
        return (h - m) / jnp.sqrt(v + eps) * g + b

    h = emb.reshape(B, -1) @ params["w1"] + params["b1"]
    h = jnp.maximum(bn(h, params["bn1_g"], params["bn1_b"], params["bn1_m"], params["bn1_v"]), 0.0)
    h = h @ params["w2"] + params["b2"]
    h = jnp.maximum(bn(h, params["bn2_g"], params["bn2_b"], params["bn2_m"], params["bn2_v"]), 0.0)
    mlp = h @ params["w3"] + params["b3"]
    return lin + fm + mlp


if __name__ == "__main__":
    field_len = 10
    field_dims = [20] * field_len          # 10 fields, 20 categories each -> vocab = 200
    embed_dim = 16
    mlp_layers = (128, 64)
    B = 1024                               # two batch-grid steps at tile_b = 512

    key = jax.random.PRNGKey(0)
    kp, kx = jax.random.split(key)
    params = init_params(kp, field_dims, embed_dim, mlp_layers, field_len)
    x = jax.random.randint(kx, (B, field_len), 0, field_dims[0], dtype=jnp.int32)

    out = deepfm_forward(x, params, field_dims)
    out = jax.block_until_ready(out)

    ref = deepfm_reference(x, params, field_dims)
    assert out.shape == (B, 1)
    np.testing.assert_allclose(np.asarray(out), np.asarray(ref), rtol=5e-2, atol=5e-2)

    print("KERNEL_OK")
</pallas_src>

<mosaic_0001>
module attributes {stable_mosaic.version = 11 : i64} {
  func.func @_deepfm_kernel(%arg0: i32, %arg1: memref<10x512xi32, #tpu.memory_space<vmem>>, %arg2: memref<144x200xbf16, #tpu.memory_space<vmem>>, %arg3: memref<200x1xf32, #tpu.memory_space<vmem>>, %arg4: memref<128x1xf32, #tpu.memory_space<vmem>>, %arg5: memref<64x128xbf16, #tpu.memory_space<vmem>>, %arg6: memref<64x1xf32, #tpu.memory_space<vmem>>, %arg7: memref<64x1xf32, #tpu.memory_space<vmem>>, %arg8: memref<1x1xf32, #tpu.memory_space<vmem>>, %arg9: memref<1x512xf32, #tpu.memory_space<vmem>>) attributes {dimension_semantics = [#tpu.dimension_semantics<parallel>], iteration_bounds = array<i64: 2>, scalar_prefetch = 0 : i64, scratch_operands = 0 : i64, tpu.core_type = #tpu.core_type<tc>, window_params = [{transform_indices = @transform_0, window_bounds = array<i64: 10, 512>}, {pipeline_mode = #tpu.pipeline_mode<synchronous>, transform_indices = @transform_1, window_bounds = array<i64: 144, 200>}, {pipeline_mode = #tpu.pipeline_mode<synchronous>, transform_indices = @transform_2, window_bounds = array<i64: 200, 1>}, {pipeline_mode = #tpu.pipeline_mode<synchronous>, transform_indices = @transform_3, window_bounds = array<i64: 128, 1>}, {pipeline_mode = #tpu.pipeline_mode<synchronous>, transform_indices = @transform_4, window_bounds = array<i64: 64, 128>}, {pipeline_mode = #tpu.pipeline_mode<synchronous>, transform_indices = @transform_5, window_bounds = array<i64: 64, 1>}, {pipeline_mode = #tpu.pipeline_mode<synchronous>, transform_indices = @transform_6, window_bounds = array<i64: 64, 1>}, {pipeline_mode = #tpu.pipeline_mode<synchronous>, transform_indices = @transform_7, window_bounds = array<i64: 1, 1>}, {transform_indices = @transform_8, window_bounds = array<i64: 1, 512>}]} {
    %c0 = arith.constant 0 : index
    %c0_0 = arith.constant 0 : index
    %0 = vector.load %arg1[%c0, %c0_0] : memref<10x512xi32, #tpu.memory_space<vmem>>, vector<10x512xi32>
    %1 = tpu.iota {dimensions = array<i32: 0>} : vector<200x512xi32>
    %2 = vector.extract_strided_slice %0 {offsets = [0, 0], sizes = [1, 512], strides = [1, 1]} : vector<10x512xi32> to vector<1x512xi32>
    %3 = vector.broadcast %2 : vector<1x512xi32> to vector<200x512xi32>
    %4 = arith.cmpi eq, %1, %3 : vector<200x512xi32>
    %5 = vector.extract_strided_slice %0 {offsets = [1, 0], sizes = [1, 512], strides = [1, 1]} : vector<10x512xi32> to vector<1x512xi32>
    %6 = vector.broadcast %5 : vector<1x512xi32> to vector<200x512xi32>
    %7 = arith.cmpi eq, %1, %6 : vector<200x512xi32>
    %8 = arith.ori %4, %7 : vector<200x512xi1>
    %9 = vector.extract_strided_slice %0 {offsets = [2, 0], sizes = [1, 512], strides = [1, 1]} : vector<10x512xi32> to vector<1x512xi32>
    %10 = vector.broadcast %9 : vector<1x512xi32> to vector<200x512xi32>
    %11 = arith.cmpi eq, %1, %10 : vector<200x512xi32>
    %12 = arith.ori %8, %11 : vector<200x512xi1>
    %13 = vector.extract_strided_slice %0 {offsets = [3, 0], sizes = [1, 512], strides = [1, 1]} : vector<10x512xi32> to vector<1x512xi32>
    %14 = vector.broadcast %13 : vector<1x512xi32> to vector<200x512xi32>
    %15 = arith.cmpi eq, %1, %14 : vector<200x512xi32>
    %16 = arith.ori %12, %15 : vector<200x512xi1>
    %17 = vector.extract_strided_slice %0 {offsets = [4, 0], sizes = [1, 512], strides = [1, 1]} : vector<10x512xi32> to vector<1x512xi32>
    %18 = vector.broadcast %17 : vector<1x512xi32> to vector<200x512xi32>
    %19 = arith.cmpi eq, %1, %18 : vector<200x512xi32>
    %20 = arith.ori %16, %19 : vector<200x512xi1>
    %21 = vector.extract_strided_slice %0 {offsets = [5, 0], sizes = [1, 512], strides = [1, 1]} : vector<10x512xi32> to vector<1x512xi32>
    %22 = vector.broadcast %21 : vector<1x512xi32> to vector<200x512xi32>
    %23 = arith.cmpi eq, %1, %22 : vector<200x512xi32>
    %24 = arith.ori %20, %23 : vector<200x512xi1>
    %25 = vector.extract_strided_slice %0 {offsets = [6, 0], sizes = [1, 512], strides = [1, 1]} : vector<10x512xi32> to vector<1x512xi32>
    %26 = vector.broadcast %25 : vector<1x512xi32> to vector<200x512xi32>
    %27 = arith.cmpi eq, %1, %26 : vector<200x512xi32>
    %28 = arith.ori %24, %27 : vector<200x512xi1>
    %29 = vector.extract_strided_slice %0 {offsets = [7, 0], sizes = [1, 512], strides = [1, 1]} : vector<10x512xi32> to vector<1x512xi32>
    %30 = vector.broadcast %29 : vector<1x512xi32> to vector<200x512xi32>
    %31 = arith.cmpi eq, %1, %30 : vector<200x512xi32>
    %32 = arith.ori %28, %31 : vector<200x512xi1>
    %33 = vector.extract_strided_slice %0 {offsets = [8, 0], sizes = [1, 512], strides = [1, 1]} : vector<10x512xi32> to vector<1x512xi32>
    %34 = vector.broadcast %33 : vector<1x512xi32> to vector<200x512xi32>
    %35 = arith.cmpi eq, %1, %34 : vector<200x512xi32>
    %36 = arith.ori %32, %35 : vector<200x512xi1>
    %37 = vector.extract_strided_slice %0 {offsets = [9, 0], sizes = [1, 512], strides = [1, 1]} : vector<10x512xi32> to vector<1x512xi32>
    %38 = vector.broadcast %37 : vector<1x512xi32> to vector<200x512xi32>
    %39 = arith.cmpi eq, %1, %38 : vector<200x512xi32>
    %40 = arith.ori %36, %39 : vector<200x512xi1>
    %41 = arith.extui %40 : vector<200x512xi1> to vector<200x512xi32>
    %42 = arith.sitofp %41 : vector<200x512xi32> to vector<200x512xf32>
    %43 = arith.truncf %42 : vector<200x512xf32> to vector<200x512xbf16>
    %44 = arith.extui %40 : vector<200x512xi1> to vector<200x512xi32>
    %45 = arith.sitofp %44 : vector<200x512xi32> to vector<200x512xf32>
    %c0_1 = arith.constant 0 : index
    %c0_2 = arith.constant 0 : index
    %46 = vector.load %arg2[%c0_1, %c0_2] : memref<144x200xbf16, #tpu.memory_space<vmem>>, vector<144x200xbf16>
    %cst = arith.constant dense<0.000000e+00> : vector<144x512xf32>
    %47 = tpu.matmul %46, %43, %cst {dimension_numbers = #tpu.dot_dimension_numbers<[1], [0], [0], [1], [0, 0, 1, 1], [], []>} : vector<144x200xbf16>, vector<200x512xbf16>, vector<144x512xf32> -> vector<144x512xf32>
    %48 = vector.extract_strided_slice %47 {offsets = [0, 0], sizes = [128, 512], strides = [1, 1]} : vector<144x512xf32> to vector<128x512xf32>
    %49 = vector.extract_strided_slice %47 {offsets = [128, 0], sizes = [16, 512], strides = [1, 1]} : vector<144x512xf32> to vector<16x512xf32>
    %c0_3 = arith.constant 0 : index
    %c0_4 = arith.constant 0 : index
    %50 = vector.load %arg3[%c0_3, %c0_4] : memref<200x1xf32, #tpu.memory_space<vmem>>, vector<200x1xf32>
    %51 = vector.broadcast %50 : vector<200x1xf32> to vector<200x512xf32>
    %52 = arith.mulf %45, %51 : vector<200x512xf32>
    %cst_5 = arith.constant dense<0.000000e+00> : vector<512xf32>
    %53 = vector.multi_reduction <add>, %52, %cst_5 [0] : vector<200x512xf32> to vector<512xf32>
    %54 = vector.shape_cast %53 : vector<512xf32> to vector<1x512xf32>
    %55 = arith.mulf %49, %49 : vector<16x512xf32>
    %cst_6 = arith.constant dense<0.000000e+00> : vector<512xf32>
    %56 = vector.multi_reduction <add>, %55, %cst_6 [0] : vector<16x512xf32> to vector<512xf32>
    %57 = vector.shape_cast %56 : vector<512xf32> to vector<1x512xf32>
    %cst_7 = arith.constant 5.000000e-01 : f32
    %58 = vector.broadcast %cst_7 : f32 to vector<1x512xf32>
    %59 = arith.mulf %58, %57 : vector<1x512xf32>
    %c0_8 = arith.constant 0 : index
    %c0_9 = arith.constant 0 : index
    %60 = vector.load %arg4[%c0_8, %c0_9] : memref<128x1xf32, #tpu.memory_space<vmem>>, vector<128x1xf32>
    %61 = vector.broadcast %60 : vector<128x1xf32> to vector<128x512xf32>
    %62 = arith.addf %48, %61 : vector<128x512xf32>
    %cst_10 = arith.constant 0.000000e+00 : f32
    %63 = vector.broadcast %cst_10 : f32 to vector<128x512xf32>
    %64 = arith.maximumf %62, %63 : vector<128x512xf32>
    %c0_11 = arith.constant 0 : index
    %c0_12 = arith.constant 0 : index
    %65 = vector.load %arg5[%c0_11, %c0_12] : memref<64x128xbf16, #tpu.memory_space<vmem>>, vector<64x128xbf16>
    %66 = arith.truncf %64 : vector<128x512xf32> to vector<128x512xbf16>
    %cst_13 = arith.constant dense<0.000000e+00> : vector<64x512xf32>
    %67 = tpu.matmul %65, %66, %cst_13 {dimension_numbers = #tpu.dot_dimension_numbers<[1], [0], [0], [1], [0, 0, 1, 1], [], []>} : vector<64x128xbf16>, vector<128x512xbf16>, vector<64x512xf32> -> vector<64x512xf32>
    %c0_14 = arith.constant 0 : index
    %c0_15 = arith.constant 0 : index
    %68 = vector.load %arg6[%c0_14, %c0_15] : memref<64x1xf32, #tpu.memory_space<vmem>>, vector<64x1xf32>
    %69 = vector.broadcast %68 : vector<64x1xf32> to vector<64x512xf32>
    %70 = arith.addf %67, %69 : vector<64x512xf32>
    %cst_16 = arith.constant 0.000000e+00 : f32
    %71 = vector.broadcast %cst_16 : f32 to vector<64x512xf32>
    %72 = arith.maximumf %70, %71 : vector<64x512xf32>
    %c0_17 = arith.constant 0 : index
    %c0_18 = arith.constant 0 : index
    %73 = vector.load %arg7[%c0_17, %c0_18] : memref<64x1xf32, #tpu.memory_space<vmem>>, vector<64x1xf32>
    %74 = vector.broadcast %73 : vector<64x1xf32> to vector<64x512xf32>
    %75 = arith.mulf %72, %74 : vector<64x512xf32>
    %cst_19 = arith.constant dense<0.000000e+00> : vector<512xf32>
    %76 = vector.multi_reduction <add>, %75, %cst_19 [0] : vector<64x512xf32> to vector<512xf32>
    %77 = vector.shape_cast %76 : vector<512xf32> to vector<1x512xf32>
    %78 = arith.addf %54, %59 : vector<1x512xf32>
    %79 = arith.addf %78, %77 : vector<1x512xf32>
    %c0_20 = arith.constant 0 : index
    %c0_21 = arith.constant 0 : index
    %80 = vector.load %arg8[%c0_20, %c0_21] : memref<1x1xf32, #tpu.memory_space<vmem>>, vector<1x1xf32>
    %81 = vector.broadcast %80 : vector<1x1xf32> to vector<1x512xf32>
    %82 = arith.addf %79, %81 : vector<1x512xf32>
    %c0_22 = arith.constant 0 : index
    %c0_23 = arith.constant 0 : index
    %83 = vector.load %arg9[%c0_22, %c0_23] : memref<1x512xf32, #tpu.memory_space<vmem>>, vector<1x512xf32>
    tpu.vector_store %arg9[%c0_22, %c0_23], %82 {strides = array<i32>} : memref<1x512xf32, #tpu.memory_space<vmem>>, vector<1x512xf32>,
    return
  }
  func.func @transform_0(%arg0: i32) -> (i32, i32) {
    %c0_i32 = arith.constant 0 : i32
    %c0_i32_0 = arith.constant 0 : i32
    return %c0_i32, %arg0 : i32, i32
  }
  func.func @transform_1(%arg0: i32) -> (i32, i32) {
    %c0_i32 = arith.constant 0 : i32
    %c0_i32_0 = arith.constant 0 : i32
    %c0_i32_1 = arith.constant 0 : i32
    return %c0_i32, %c0_i32_0 : i32, i32
  }
  func.func @transform_2(%arg0: i32) -> (i32, i32) {
    %c0_i32 = arith.constant 0 : i32
    %c0_i32_0 = arith.constant 0 : i32
    %c0_i32_1 = arith.constant 0 : i32
    return %c0_i32, %c0_i32_0 : i32, i32
  }
  func.func @transform_3(%arg0: i32) -> (i32, i32) {
    %c0_i32 = arith.constant 0 : i32
    %c0_i32_0 = arith.constant 0 : i32
    %c0_i32_1 = arith.constant 0 : i32
    return %c0_i32, %c0_i32_0 : i32, i32
  }
  func.func @transform_4(%arg0: i32) -> (i32, i32) {
    %c0_i32 = arith.constant 0 : i32
    %c0_i32_0 = arith.constant 0 : i32
    %c0_i32_1 = arith.constant 0 : i32
    return %c0_i32, %c0_i32_0 : i32, i32
  }
  func.func @transform_5(%arg0: i32) -> (i32, i32) {
    %c0_i32 = arith.constant 0 : i32
    %c0_i32_0 = arith.constant 0 : i32
    %c0_i32_1 = arith.constant 0 : i32
    return %c0_i32, %c0_i32_0 : i32, i32
  }
  func.func @transform_6(%arg0: i32) -> (i32, i32) {
    %c0_i32 = arith.constant 0 : i32
    %c0_i32_0 = arith.constant 0 : i32
    %c0_i32_1 = arith.constant 0 : i32
    return %c0_i32, %c0_i32_0 : i32, i32
  }
  func.func @transform_7(%arg0: i32) -> (i32, i32) {
    %c0_i32 = arith.constant 0 : i32
    %c0_i32_0 = arith.constant 0 : i32
    %c0_i32_1 = arith.constant 0 : i32
    return %c0_i32, %c0_i32_0 : i32, i32
  }
  func.func @transform_8(%arg0: i32) -> (i32, i32) {
    %c0_i32 = arith.constant 0 : i32
    %c0_i32_0 = arith.constant 0 : i32
    return %c0_i32, %arg0 : i32, i32
  }
}

</mosaic_0001>

<bundles_post_ra>
// kernel: tpu_custom_call.1
= control target key start
LH: loop header
LB: loop body
LE: loop exit
PB: predicated region body
PF: predicated region fallthrough
CT: control target
= control target key end

     0   :  { %s7951_s0 = inlined_call_operand.vmem [shape: s32[10,1024], index: 0, kind: input, shape index: {}]   ;;  %s7952_s1 = inlined_call_operand.vmem [shape: bf16[144,200], index: 1, kind: input, shape index: {}]   ;;  %s7953_s2 = inlined_call_operand.vmem [shape: f32[200,1], index: 2, kind: input, shape index: {}]   ;;  %s7954_s3 = inlined_call_operand.vmem [shape: f32[128,1], index: 3, kind: input, shape index: {}]   ;;  %s7955_s4 = inlined_call_operand.vmem [shape: bf16[64,128], index: 4, kind: input, shape index: {}]   ;;  %s7956_s5 = inlined_call_operand.vmem [shape: f32[64,1], index: 5, kind: input, shape index: {}]   ;;  %s7957_s6 = inlined_call_operand.vmem [shape: f32[64,1], index: 6, kind: input, shape index: {}]   ;;  %s7958_s7 = inlined_call_operand.<no memory space> [shape: f32[1,1], index: 7, kind: input, shape index: {}]   ;;  %s7959_s8 = inlined_call_operand.hbm [shape: f32[1,1024], index: 8, kind: output, shape index: {}]  }
   0x1   :  { %v13_v0 = vstv %s7958_s7 }
   0x2   :  { %14 = vst [vmem:[#allocation2] sm:$0x1] %v13_v0 }
   0x3   :  { %15 = vsyncpa [#allocation5], 0 }
   0x4   :  { %17 = vsyncpa [#allocation5 + $0x1], 0  ;;  %s4616_s29 = smov 0   ;;  %s4618_s30 = smov 0  }
   0x5   :  { %s4620_s9 = smov 0   ;;  %s4622_s10 = smov 0  }
   0x6 LB: > { %s4266_s7 = sadd.s32 4294967295, %s4562_s10   ;;  %s4267_s11 = sadd.s32 4294967294, %s4562_s10   ;;  %s4562_s10 = sphi %s4622_s10, %s8213_s10   ;;  %s4558_s9 = sphi %s4620_s9, %s8212_s9   ;;  %s4554_s30 = sphi %s4618_s30, %s8211_s30   ;;  %s4550_s29 = sphi %s4616_s29, %s8210_s29  }
   0x7   : > { %s4639_s12 = sadd.s32 1, %s4562_s10   ;;  %s30_s13 = sadd.s32 1, %s4558_s9 }
   0x8   : > { %s27_s14 = ssub.s32 %s4562_s10, %s4639_s12  ;;  %p37_p0 = scmp.ne.s32.totalorder %s4558_s9, %s4554_s30 }
   0x9   : > { %p28_p1 = scmp.eq.s32.totalorder %s27_s14, 0  ;;  %p38_p2 = scmp.eq.s32.totalorder %s4562_s10, 0 }
   0xa   : > { %p214_p3 = scmp.eq.s32.totalorder %s4266_s7, 1  ;;  %p219_p4 = scmp.ne.s32.totalorder %s4554_s30, %s4550_s29 }
   0xb   : > { %s4652_s15 = scalar_select %p28_p1, %s4558_s9, %s30_s13  }
   0xc   : > { %p39_p5 = por %p38_p2, %p37_p0  ;;  %p4654_p6 = por %p214_p3, %p37_p0 }
   0xd   : > { %p220_p7 = scmp.eq.s32.totalorder %s4267_s11, 1  ;;  %p4269_p9 = scmp.ge.s32.totalorder %s4562_s10, 2 }
   0xf   : > { %p4658_p8 = por %p220_p7, %p219_p4  ;;  %257 = sbr.rel (%p4269_p9) target bundleno = 30 (0x1e), region = 44 }
  0x16   : > { %260 = sbr.rel (!%p39_p5) target bundleno = 30 (0x1e), region = 48  ;;  %s262_s18 = sand.u32 (%p39_p5), 1, %s4558_s9  }
  0x17   : > { %s4423_s19 = sshll.u32 (%p39_p5), %s4562_s10, 5  ;;  %s4270_s20 = sshll.u32 (%p39_p5), %s262_s18, 6 }
  0x18   : > { %s267_s23 = scalar_lea.vmem (%p39_p5), %s7951_s0, %s4423_s19  ;;  %s264_s24 = scalar_lea.vmem (%p39_p5), [#allocation3], %s4270_s20 }
  0x19   : > { %v280_v1 = vld [vmem:[%s267_s23] sm:$0xff] (%p39_p5)  ;;  %v282_v2 = vld [vmem:[%s267_s23 + $0x8] sm:$0xff] (%p39_p5)  ;;  %v284_v3 = vld [vmem:[%s267_s23 + $0x10] sm:$0xff] (%p39_p5) }
  0x1a   : > { %281 = vst [vmem:[%s264_s24] sm:$0xff] (%p39_p5), %v280_v1  ;;  %283 = vst [vmem:[%s264_s24 + $0x8] sm:$0xff] (%p39_p5), %v282_v2  ;;  %v286_v4 = vld [vmem:[%s267_s23 + $0x18] sm:$0xff] (%p39_p5)  ;;  %v288_v5 = vld [vmem:[%s267_s23 + $0x40] sm:$0xff] (%p39_p5) }
  0x1b   : > { %285 = vst [vmem:[%s264_s24 + $0x10] sm:$0xff] (%p39_p5), %v284_v3  ;;  %v290_v6 = vld [vmem:[%s267_s23 + $0x48] sm:$0xff] (%p39_p5)  ;;  %287 = vst [vmem:[%s264_s24 + $0x18] sm:$0xff] (%p39_p5), %v286_v4  ;;  %v292_v7 = vld [vmem:[%s267_s23 + $0x50] sm:$0xff] (%p39_p5) }
  0x1c   : > { %289 = vst [vmem:[%s264_s24 + $0x20] sm:$0xff] (%p39_p5), %v288_v5  ;;  %291 = vst [vmem:[%s264_s24 + $0x28] sm:$0xff] (%p39_p5), %v290_v6  ;;  %v294_v8 = vld [vmem:[%s267_s23 + $0x58] sm:$0xff] (%p39_p5) }
  0x1d   : > { %293 = vst [vmem:[%s264_s24 + $0x30] sm:$0xff] %v292_v7  ;;  %295 = vst [vmem:[%s264_s24 + $0x38] sm:$0xff] %v294_v8 }
  0x1e PF: > { %p4273_p10 = scmp.ge.s32.totalorder %s4562_s10, 1  ;;  %p300_p11 = scmp.lt.s32.totalorder %s4562_s10, 3 }
  0x20   : > { %p301_p12 = pnand %p4273_p10, %p300_p11 }
  0x22   : > { %304 = sbr.rel (%p301_p12) target bundleno = 1523 (0x5f3), region = 71 }
  0x29   : > { %s4673_s25 = sand.u32 1, %s4554_s30   ;;  %v7960_v9 = vlaneseq  ;;  %v7965_v37 = vmov 0.0   ;;  %s4424_s14 = sshll.u32 %s4266_s7, 6 }
  0x2a   : > { %s4274_s26 = sshll.u32 %s4673_s25, 6  ;;  %s4275_s13 = sshll.u32 %s4673_s25, 2 }
  0x2b   : > { %v4677_v10 = vshrl.u32 %v7960_v9, 7  ;;  %s4679_s27 = scalar_lea.vmem [#allocation3], %s4274_s26  ;;  %s339_s18 = scalar_lea.vmem [#allocation4], %s4275_s13 }
  0x2c   : > { %v344_v11 = vld [vmem:[%s4679_s27 + $0x8] sm:$0xff]  ;;  %v346_v31 = vld [vmem:[%s4679_s27 + $0x18] sm:$0xff]  ;;  %v343_v47 = vld [vmem:[%s4679_s27] sm:$0xff]  ;;  %s4202_s19 = sshll.u32 %s339_s18, 4  ;;  %s7907_s22 = scalar_lea.hbm %s7959_s8, %s4424_s14  ;;  %s7909_s19 = int_to_ptr.vmem [resolvable:$true] %s4202_s19 }
  0x2d   : > { %v4683_v12 = vadd.s32 8, %v4677_v10  ;;  %v4686_v13 = vsub.s32 0, %v4677_v10  ;;  %v4689_v14 = vsub.s32 1, %v4677_v10  ;;  %v4692_v15 = vsub.s32 2, %v4677_v10  ;;  %v348_v27 = vld [vmem:[%s4679_s27 + $0x28] sm:$0x3] }
  0x2e   : > { %v4695_v16 = vsub.s32 3, %v4677_v10  ;;  %v4698_v17 = vsub.s32 4, %v4677_v10  ;;  %v4710_v21 = vsub.s32 5, %v4677_v10  ;;  %v4719_v24 = vsub.s32 6, %v4677_v10  ;;  %v350_v44 = vld [vmem:[%s4679_s27 + $0x38] sm:$0x3] }
  0x2f   : > { %8047 = vst [vmem:[#allocation7_spill] sm:$0xff] %v4686_v13  ;;  %v4701_v18 = vrot.slane %v344_v11, %v4686_v13  ;;  %v4704_v19 = vrot.slane %v344_v11, %v4689_v14  ;;  %v4707_v20 = vrot.slane %v344_v11, %v4692_v15  ;;  %v4739_v26 = vsub.s32 7, %v4677_v10  ;;  %v347_v59 = vld [vmem:[%s4679_s27 + $0x20] sm:$0x3]  ;;  %v345_v62 = vld [vmem:[%s4679_s27 + $0x10] sm:$0xff]  ;;  %s4188_s23 = scalar_lea.sflag [#allocation5], %s4673_s25 }
  0x30   : > { %v4713_v22 = vrot.slane %v344_v11, %v4695_v16  ;;  %v4716_v23 = vrot.slane %v344_v11, %v4698_v17  ;;  %v4736_v25 = vrot.slane %v344_v11, %v4710_v21  ;;  %v4747_v28 = vrot.slane %v344_v11, %v4719_v24  ;;  %s4500_s24 = scalar_lea.vmem %s7909_s19, 64  ;;  %s4567_s7 = smov [#allocation4]  }
  0x31   : > { %vm394_vm0 = vcmp.eq.s32.totalorder %v4677_v10, %v4701_v18  ;;  %vm398_vm1 = vcmp.eq.s32.totalorder %v4683_v12, %v4701_v18  ;;  %vm510_vm2 = vcmp.eq.s32.totalorder %v4677_v10, %v4704_v19  ;;  %vm514_vm3 = vcmp.eq.s32.totalorder %v4683_v12, %v4704_v19  ;;  %p4501_p13 = scmp.ne.s32.totalorder %s7909_s19, %s4500_s24  ;;  %s4504_s26 = sshll.u32 %s4567_s7, 4  ;;  %s4505_s26 = int_to_ptr.vmem [resolvable:$false] %s4504_s26 }
  0x32   : > { %vm610_vm4 = vmor %vm394_vm0, %vm510_vm2  ;;  %vm726_vm5 = vcmp.eq.s32.totalorder %v4677_v10, %v4707_v20  ;;  %vm730_vm6 = vcmp.eq.s32.totalorder %v4683_v12, %v4707_v20  ;;  %vm942_vm8 = vcmp.eq.s32.totalorder %v4677_v10, %v4713_v22  ;;  %vm946_vm10 = vcmp.eq.s32.totalorder %v4683_v12, %v4713_v22  ;;  %p4507_p2 = scmp.lt.s32.totalorder %s7909_s19, %s4505_s26 }
  0x33   : > { %vm614_vm7 = vmor %vm398_vm1, %vm514_vm3  ;;  %vm1158_vm12 = vcmp.eq.s32.totalorder %v4677_v10, %v4716_v23  ;;  %vm1162_vm14 = vcmp.eq.s32.totalorder %v4683_v12, %v4716_v23  ;;  %vm1374_vm0 = vcmp.eq.s32.totalorder %v4677_v10, %v4736_v25  ;;  %v4754_v29 = vrot.slane %v344_v11, %v4739_v26  ;;  %p4502_p0 = pnand %p4501_p13, %p4654_p6 }
  0x34   : > { %vm826_vm9 = vmor %vm610_vm4, %vm726_vm5  ;;  %vm1378_vm2 = vcmp.eq.s32.totalorder %v4683_v12, %v4736_v25  ;;  %vm1590_vm4 = vcmp.eq.s32.totalorder %v4677_v10, %v4747_v28  ;;  %v4761_v30 = vrot.slane %v348_v27, %v4686_v13  ;;  %v4769_v32 = vrot.slane %v348_v27, %v4689_v14 }
  0x35   : > { %vm830_vm11 = vmor %vm614_vm7, %vm730_vm6  ;;  %vm1594_vm6 = vcmp.eq.s32.totalorder %v4683_v12, %v4747_v28  ;;  %v4776_v33 = vrot.slane %v346_v31, %v4686_v13  ;;  %v4779_v34 = vrot.slane %v346_v31, %v4689_v14  ;;  %v4786_v35 = vrot.slane %v346_v31, %v4692_v15  ;;  %p4503_p1 = pneg %p4502_p0 }
  0x36   : > { %vm1042_vm13 = vmor %vm826_vm9, %vm942_vm8  ;;  %vm1806_vm8 = vcmp.eq.s32.totalorder %v4677_v10, %v4754_v29  ;;  %v4795_v36 = vrot.slane %v346_v31, %v4695_v16  ;;  %v4807_v39 = vrot.slane %v346_v31, %v4698_v17  ;;  %v4819_v42 = vrot.slane %v346_v31, %v4710_v21 }
  0x37   : > { %vm1046_vm15 = vmor %vm830_vm11, %vm946_vm10  ;;  %vm1810_vm10 = vcmp.eq.s32.totalorder %v4683_v12, %v4754_v29  ;;  %v4826_v43 = vrot.slane %v346_v31, %v4719_v24  ;;  %v4834_v45 = vrot.slane %v346_v31, %v4739_v26  ;;  %v4841_v46 = vrot.slane %v350_v44, %v4686_v13 }
  0x38   : > { %vm1258_vm1 = vmor %vm1042_vm13, %vm1158_vm12  ;;  %vm2022_vm12 = vcmp.eq.s32.totalorder %v4677_v10, %v4761_v30  ;;  %v4849_v48 = vrot.slane %v350_v44, %v4689_v14  ;;  %v4856_v49 = vrot.slane %v343_v47, %v4686_v13  ;;  %v4859_v50 = vrot.slane %v343_v47, %v4689_v14 }
  0x39   : > { %vm1262_vm3 = vmor %vm1046_vm15, %vm1162_vm14  ;;  %vm2026_vm14 = vcmp.eq.s32.totalorder %v4683_v12, %v4761_v30  ;;  %v4866_v51 = vrot.slane %v343_v47, %v4692_v15  ;;  %v4875_v52 = vrot.slane %v343_v47, %v4695_v16  ;;  %v4887_v54 = vrot.slane %v343_v47, %v4698_v17 }
  0x3a   : > { %vm1474_vm5 = vmor %vm1258_vm1, %vm1374_vm0  ;;  %vm2238_vm0 = vcmp.eq.s32.totalorder %v4677_v10, %v4769_v32  ;;  %v4899_v57 = vrot.slane %v343_v47, %v4710_v21  ;;  %v4906_v58 = vrot.slane %v343_v47, %v4719_v24  ;;  %v4914_v60 = vrot.slane %v343_v47, %v4739_v26 }
  0x3b   : > { %vm1478_vm7 = vmor %vm1262_vm3, %vm1378_vm2  ;;  %vm2242_vm2 = vcmp.eq.s32.totalorder %v4683_v12, %v4769_v32  ;;  %v4921_v61 = vrot.slane %v347_v59, %v4686_v13  ;;  %v4929_v63 = vrot.slane %v347_v59, %v4689_v14  ;;  %v4936_v0 = vrot.slane %v345_v62, %v4686_v13 }
  0x3c   : > { %vm1690_vm9 = vmor %vm1474_vm5, %vm1590_vm4  ;;  %vm396_vm4 = vcmp.eq.s32.totalorder %v4677_v10, %v4776_v33  ;;  %vm512_vm5 = vcmp.eq.s32.totalorder %v4677_v10, %v4779_v34  ;;  %v4939_v1 = vrot.slane %v345_v62, %v4689_v14  ;;  %v4946_v2 = vrot.slane %v345_v62, %v4692_v15  ;;  %v349_v15 = vld [vmem:[%s4679_s27 + $0x30] sm:$0x3]  ;;  %s4506_s27 = scalar_lea.vmem %s4505_s26, 128 }
  0x3d   : > { %vm1694_vm11 = vmor %vm1478_vm7, %vm1594_vm6  ;;  %vm400_vm7 = vcmp.eq.s32.totalorder %v4683_v12, %v4776_v33  ;;  %v4955_v3 = vrot.slane %v345_v62, %v4695_v16  ;;  %v4967_v5 = vrot.slane %v345_v62, %v4698_v17  ;;  %v4979_v8 = vrot.slane %v345_v62, %v4710_v21  ;;  %p4508_p3 = scmp.lt.s32.totalorder %s4506_s27, %s4500_s24 }
  0x3e   : > { %vm1906_vm13 = vmor %vm1690_vm9, %vm1806_vm8  ;;  %vm516_vm8 = vcmp.eq.s32.totalorder %v4683_v12, %v4779_v34  ;;  %v4986_v11 = vrot.slane %v345_v62, %v4719_v24  ;;  %v4994_v16 = vrot.slane %v345_v62, %v4739_v26  ;;  %v5001_v17 = vrot.slane %v349_v15, %v4686_v13 }
  0x3f   : > { %vm1910_vm15 = vmor %vm1694_vm11, %vm1810_vm10  ;;  %vm728_vm10 = vcmp.eq.s32.totalorder %v4677_v10, %v4786_v35  ;;  %v5008_v21 = vrot.slane %v349_v15, %v4689_v14  ;;  %v5015_v24 = vadd.s32 16, %v4677_v10  ;;  %v5020_v26 = vadd.s32 24, %v4677_v10  ;;  %p4509_p4 = por %p4508_p3, %p4507_p2 }
  0x40   : > { %vm2122_vm1 = vmor %vm1906_vm13, %vm2022_vm12  ;;  %vm732_vm12 = vcmp.eq.s32.totalorder %v4683_v12, %v4786_v35 }
  0x41   : > { %vm2126_vm3 = vmor %vm1910_vm15, %vm2026_vm14  ;;  %vm944_vm14 = vcmp.eq.s32.totalorder %v4677_v10, %v4795_v36  ;;  %p4510_p5 = pnand %p4509_p4, %p4503_p1 }
  0x42   : > { %vm2338_vm6 = vmor %vm2122_vm1, %vm2238_vm0  ;;  %vm948_vm0 = vcmp.eq.s32.totalorder %v4683_v12, %v4795_v36 }
  0x43   : > { %vm2342_vm9 = vmor %vm2126_vm3, %vm2242_vm2  ;;  %v4802_v38 = vsel %vm2338_vm6, 1.0, %v7965_v37  ;;  %vm1160_vm2 = vcmp.eq.s32.totalorder %v4677_v10, %v4807_v39  ;;  %vm1376_vm6 = vcmp.eq.s32.totalorder %v4677_v10, %v4819_v42 }
  0x44   : > { %v4810_v40 = vsel %vm2342_vm9, 1.0, %v7965_v37  ;;  %vm612_vm11 = vmor %vm396_vm4, %vm512_vm5  ;;  %vm1164_vm4 = vcmp.eq.s32.totalorder %v4683_v12, %v4807_v39 }
  0x45   : > { %v2638_v41 = vpack.c.bf16 %v4810_v40, %v4802_v38  ;;  %vm616_vm13 = vmor %vm400_vm7, %vm516_vm8  ;;  %vm1380_vm8 = vcmp.eq.s32.totalorder %v4683_v12, %v4819_v42 }
  0x46   : > { %vm828_vm15 = vmor %vm612_vm11, %vm728_vm10  ;;  %vm1592_vm10 = vcmp.eq.s32.totalorder %v4677_v10, %v4826_v43 }
  0x47   : > { %2829 = vmatprep.subr.bf16.mxu0 %v2638_v41  ;;  %vm832_vm1 = vmor %vm616_vm13, %vm732_vm12  ;;  %vm1596_vm12 = vcmp.eq.s32.totalorder %v4683_v12, %v4826_v43 }
  0x48   : > { %vm1044_vm3 = vmor %vm828_vm15, %vm944_vm14  ;;  %vm1808_vm14 = vcmp.eq.s32.totalorder %v4677_v10, %v4834_v45 }
  0x49   : > { %vm1048_vm5 = vmor %vm832_vm1, %vm948_vm0  ;;  %vm1812_vm0 = vcmp.eq.s32.totalorder %v4683_v12, %v4834_v45 }
  0x4a   : > { %vm1260_vm7 = vmor %vm1044_vm3, %vm1160_vm2  ;;  %vm2024_vm2 = vcmp.eq.s32.totalorder %v4677_v10, %v4841_v46 }
  0x4b   : > { %vm1264_vm9 = vmor %vm1048_vm5, %vm1164_vm4  ;;  %vm2028_vm4 = vcmp.eq.s32.totalorder %v4683_v12, %v4841_v46 }
  0x4c   : > { %vm1476_vm11 = vmor %vm1260_vm7, %vm1376_vm6  ;;  %vm2240_vm6 = vcmp.eq.s32.totalorder %v4677_v10, %v4849_v48 }
  0x4d   : > { %vm1480_vm13 = vmor %vm1264_vm9, %vm1380_vm8  ;;  %vm2244_vm8 = vcmp.eq.s32.totalorder %v4683_v12, %v4849_v48 }
  0x4e   : > { %vm1692_vm15 = vmor %vm1476_vm11, %vm1592_vm10  ;;  %vm393_vm10 = vcmp.eq.s32.totalorder %v4677_v10, %v4856_v49  ;;  %vm509_vm11 = vcmp.eq.s32.totalorder %v4677_v10, %v4859_v50 }
  0x4f   : > { %vm1696_vm1 = vmor %vm1480_vm13, %vm1596_vm12  ;;  %vm397_vm13 = vcmp.eq.s32.totalorder %v4683_v12, %v4856_v49 }
  0x50   : > { %vm1908_vm3 = vmor %vm1692_vm15, %vm1808_vm14  ;;  %vm513_vm14 = vcmp.eq.s32.totalorder %v4683_v12, %v4859_v50 }
  0x51   : > { %vm1912_vm5 = vmor %vm1696_vm1, %vm1812_vm0  ;;  %vm725_vm0 = vcmp.eq.s32.totalorder %v4677_v10, %v4866_v51 }
  0x52   : > { %vm2124_vm7 = vmor %vm1908_vm3, %vm2024_vm2  ;;  %vm729_vm2 = vcmp.eq.s32.totalorder %v4683_v12, %v4866_v51 }
  0x53   : > { %vm2128_vm9 = vmor %vm1912_vm5, %vm2028_vm4  ;;  %vm941_vm4 = vcmp.eq.s32.totalorder %v4677_v10, %v4875_v52 }
  0x54   : > { %vm2340_vm12 = vmor %vm2124_vm7, %vm2240_vm6  ;;  %vm945_vm6 = vcmp.eq.s32.totalorder %v4683_v12, %v4875_v52 }
  0x55   : > { %vm2344_vm15 = vmor %vm2128_vm9, %vm2244_vm8  ;;  %v4882_v53 = vsel %vm2340_vm12, 1.0, %v7965_v37  ;;  %vm1157_vm8 = vcmp.eq.s32.totalorder %v4677_v10, %v4887_v54  ;;  %vm1373_vm12 = vcmp.eq.s32.totalorder %v4677_v10, %v4899_v57 }
  0x56   : > { %v4890_v55 = vsel %vm2344_vm15, 1.0, %v7965_v37  ;;  %vm609_vm1 = vmor %vm393_vm10, %vm509_vm11  ;;  %vm1161_vm10 = vcmp.eq.s32.totalorder %v4683_v12, %v4887_v54 }
  0x57   : > { %v2640_v56 = vpack.c.bf16 %v4890_v55, %v4882_v53  ;;  %vm613_vm3 = vmor %vm397_vm13, %vm513_vm14  ;;  %vm1377_vm14 = vcmp.eq.s32.totalorder %v4683_v12, %v4899_v57 }
  0x58   : > { %vm825_vm5 = vmor %vm609_vm1, %vm725_vm0  ;;  %vm1589_vm0 = vcmp.eq.s32.totalorder %v4677_v10, %v4906_v58 }
  0x59   : > { %2952 = vmatprep.subr.bf16.mxu1 %v2640_v56  ;;  %vm829_vm7 = vmor %vm613_vm3, %vm729_vm2  ;;  %vm1593_vm2 = vcmp.eq.s32.totalorder %v4683_v12, %v4906_v58 }
  0x5a   : > { %vm1041_vm9 = vmor %vm825_vm5, %vm941_vm4  ;;  %vm1805_vm4 = vcmp.eq.s32.totalorder %v4677_v10, %v4914_v60 }
  0x5b   : > { %vm1045_vm11 = vmor %vm829_vm7, %vm945_vm6  ;;  %vm1809_vm6 = vcmp.eq.s32.totalorder %v4683_v12, %v4914_v60 }
  0x5c   : > { %vm1257_vm13 = vmor %vm1041_vm9, %vm1157_vm8  ;;  %vm2021_vm8 = vcmp.eq.s32.totalorder %v4677_v10, %v4921_v61 }
  0x5d   : > { %vm1261_vm15 = vmor %vm1045_vm11, %vm1161_vm10  ;;  %vm2025_vm10 = vcmp.eq.s32.totalorder %v4683_v12, %v4921_v61 }
  0x5e   : > { %vm1473_vm1 = vmor %vm1257_vm13, %vm1373_vm12  ;;  %vm2237_vm12 = vcmp.eq.s32.totalorder %v4677_v10, %v4929_v63 }
  0x5f   : > { %vm1477_vm3 = vmor %vm1261_vm15, %vm1377_vm14  ;;  %vm2241_vm14 = vcmp.eq.s32.totalorder %v4683_v12, %v4929_v63 }
  0x60   : > { %vm1689_vm5 = vmor %vm1473_vm1, %vm1589_vm0  ;;  %vm395_vm0 = vcmp.eq.s32.totalorder %v4677_v10, %v4936_v0  ;;  %vm511_vm1 = vcmp.eq.s32.totalorder %v4677_v10, %v4939_v1 }
  0x61   : > { %vm1693_vm7 = vmor %vm1477_vm3, %vm1593_vm2  ;;  %vm399_vm3 = vcmp.eq.s32.totalorder %v4683_v12, %v4936_v0 }
  0x62   : > { %vm1905_vm9 = vmor %vm1689_vm5, %vm1805_vm4  ;;  %vm515_vm4 = vcmp.eq.s32.totalorder %v4683_v12, %v4939_v1 }
  0x63   : > { %vm1909_vm11 = vmor %vm1693_vm7, %vm1809_vm6  ;;  %vm727_vm6 = vcmp.eq.s32.totalorder %v4677_v10, %v4946_v2 }
  0x64   : > { %vm2121_vm13 = vmor %vm1905_vm9, %vm2021_vm8  ;;  %vm731_vm8 = vcmp.eq.s32.totalorder %v4683_v12, %v4946_v2 }
  0x65   : > { %vm2125_vm15 = vmor %vm1909_vm11, %vm2025_vm10  ;;  %vm943_vm10 = vcmp.eq.s32.totalorder %v4677_v10, %v4955_v3 }
  0x66   : > { %vm2337_vm2 = vmor %vm2121_vm13, %vm2237_vm12  ;;  %vm947_vm12 = vcmp.eq.s32.totalorder %v4683_v12, %v4955_v3 }
  0x67   : > { %vm2341_vm5 = vmor %vm2125_vm15, %vm2241_vm14  ;;  %v4962_v4 = vsel %vm2337_vm2, 1.0, %v7965_v37  ;;  %vm1159_vm14 = vcmp.eq.s32.totalorder %v4677_v10, %v4967_v5  ;;  %vm1375_vm2 = vcmp.eq.s32.totalorder %v4677_v10, %v4979_v8 }
  0x68   : > { %v4970_v6 = vsel %vm2341_vm5, 1.0, %v7965_v37  ;;  %vm611_vm7 = vmor %vm395_vm0, %vm511_vm1  ;;  %vm1163_vm0 = vcmp.eq.s32.totalorder %v4683_v12, %v4967_v5 }
  0x69   : > { %v2637_v7 = vpack.c.bf16 %v4970_v6, %v4962_v4  ;;  %vm615_vm9 = vmor %vm399_vm3, %vm515_vm4  ;;  %vm1379_vm4 = vcmp.eq.s32.totalorder %v4683_v12, %v4979_v8 }
  0x6a   : > { %vm827_vm11 = vmor %vm611_vm7, %vm727_vm6  ;;  %vm1591_vm6 = vcmp.eq.s32.totalorder %v4677_v10, %v4986_v11 }
  0x6b   : > { %2830 = vmatpush1.bf16.msra.mxu0 %v2637_v7  ;;  %vm831_vm13 = vmor %vm615_vm9, %vm731_vm8  ;;  %vm1595_vm8 = vcmp.eq.s32.totalorder %v4683_v12, %v4986_v11 }
  0x6c   : > { %vm1043_vm15 = vmor %vm827_vm11, %vm943_vm10  ;;  %vm1807_vm10 = vcmp.eq.s32.totalorder %v4677_v10, %v4994_v16 }
  0x6d   : > { %vm1047_vm1 = vmor %vm831_vm13, %vm947_vm12  ;;  %vm1811_vm12 = vcmp.eq.s32.totalorder %v4683_v12, %v4994_v16 }
  0x6e   : > { %vm1259_vm3 = vmor %vm1043_vm15, %vm1159_vm14  ;;  %vm2023_vm14 = vcmp.eq.s32.totalorder %v4677_v10, %v5001_v17 }
  0x6f   : > { %vm1263_vm5 = vmor %vm1047_vm1, %vm1163_vm0  ;;  %vm2027_vm0 = vcmp.eq.s32.totalorder %v4683_v12, %v5001_v17 }
  0x70   : > { %vm1475_vm7 = vmor %vm1259_vm3, %vm1375_vm2  ;;  %vm2239_vm2 = vcmp.eq.s32.totalorder %v4677_v10, %v5008_v21 }
  0x71   : > { %vm1479_vm9 = vmor %vm1263_vm5, %vm1379_vm4  ;;  %vm2243_vm4 = vcmp.eq.s32.totalorder %v4683_v12, %v5008_v21 }
  0x72   : > { %vm1691_vm11 = vmor %vm1475_vm7, %vm1591_vm6  ;;  %vm402_vm6 = vcmp.eq.s32.totalorder %v5015_v24, %v4701_v18  ;;  %vm518_vm7 = vcmp.eq.s32.totalorder %v5015_v24, %v4704_v19 }
  0x73   : > { %vm1695_vm13 = vmor %vm1479_vm9, %vm1595_vm8  ;;  %vm406_vm9 = vcmp.eq.s32.totalorder %v5020_v26, %v4701_v18 }
  0x74   : > { %vm1907_vm15 = vmor %vm1691_vm11, %vm1807_vm10  ;;  %vm522_vm10 = vcmp.eq.s32.totalorder %v5020_v26, %v4704_v19 }
  0x75   : > { %vm1911_vm1 = vmor %vm1695_vm13, %vm1811_vm12  ;;  %vm734_vm12 = vcmp.eq.s32.totalorder %v5015_v24, %v4707_v20 }
  0x76   : > { %vm2123_vm3 = vmor %vm1907_vm15, %vm2023_vm14  ;;  %vm738_vm14 = vcmp.eq.s32.totalorder %v5020_v26, %v4707_v20 }
  0x77   : > { %vm2127_vm5 = vmor %vm1911_vm1, %vm2027_vm0  ;;  %vm950_vm0 = vcmp.eq.s32.totalorder %v5015_v24, %v4713_v22 }
  0x78   : > { %vm2339_vm8 = vmor %vm2123_vm3, %vm2239_vm2  ;;  %vm954_vm2 = vcmp.eq.s32.totalorder %v5020_v26, %v4713_v22 }
  0x79   : > { %vm2343_vm11 = vmor %vm2127_vm5, %vm2243_vm4  ;;  %v5035_v14 = vsel %vm2339_vm8, 1.0, %v7965_v37  ;;  %vm1166_vm4 = vcmp.eq.s32.totalorder %v5015_v24, %v4716_v23  ;;  %vm1382_vm8 = vcmp.eq.s32.totalorder %v5015_v24, %v4736_v25 }
  0x7a   : > { %v5040_v12 = vsel %vm2343_vm11, 1.0, %v7965_v37  ;;  %vm618_vm13 = vmor %vm402_vm6, %vm518_vm7  ;;  %vm1170_vm6 = vcmp.eq.s32.totalorder %v5020_v26, %v4716_v23 }
  0x7b   : > { %v2639_v27 = vpack.c.bf16 %v5040_v12, %v5035_v14  ;;  %vm622_vm15 = vmor %vm406_vm9, %vm522_vm10  ;;  %vm1386_vm10 = vcmp.eq.s32.totalorder %v5020_v26, %v4736_v25 }
  0x7c   : > { %vm834_vm1 = vmor %vm618_vm13, %vm734_vm12  ;;  %vm1598_vm12 = vcmp.eq.s32.totalorder %v5015_v24, %v4747_v28 }
  0x7d   : > { %2953 = vmatpush1.bf16.msra.mxu1 %v2639_v27  ;;  %vm838_vm3 = vmor %vm622_vm15, %vm738_vm14  ;;  %vm1602_vm14 = vcmp.eq.s32.totalorder %v5020_v26, %v4747_v28  ;;  %v5213_v27 = vadd.s32 32, %v4677_v10 }
  0x7e   : > { %vm1050_vm5 = vmor %vm834_vm1, %vm950_vm0  ;;  %vm1814_vm0 = vcmp.eq.s32.totalorder %v5015_v24, %v4754_v29 }
  0x7f   : > { %vm1054_vm7 = vmor %vm838_vm3, %vm954_vm2  ;;  %vm1818_vm2 = vcmp.eq.s32.totalorder %v5020_v26, %v4754_v29 }
  0x80   : > { %vm1266_vm9 = vmor %vm1050_vm5, %vm1166_vm4  ;;  %vm2030_vm4 = vcmp.eq.s32.totalorder %v5015_v24, %v4761_v30 }
  0x81   : > { %vm1270_vm11 = vmor %vm1054_vm7, %vm1170_vm6  ;;  %vm2034_vm6 = vcmp.eq.s32.totalorder %v5020_v26, %v4761_v30 }
  0x82   : > { %vm1482_vm13 = vmor %vm1266_vm9, %vm1382_vm8  ;;  %vm2246_vm8 = vcmp.eq.s32.totalorder %v5015_v24, %v4769_v32 }
  0x83   : > { %vm1486_vm15 = vmor %vm1270_vm11, %vm1386_vm10  ;;  %vm2250_vm10 = vcmp.eq.s32.totalorder %v5020_v26, %v4769_v32 }
  0x84   : > { %vm1698_vm1 = vmor %vm1482_vm13, %vm1598_vm12  ;;  %vm404_vm12 = vcmp.eq.s32.totalorder %v5015_v24, %v4776_v33  ;;  %vm520_vm13 = vcmp.eq.s32.totalorder %v5015_v24, %v4779_v34 }
  0x85   : > { %vm1702_vm3 = vmor %vm1486_vm15, %vm1602_vm14  ;;  %vm408_vm15 = vcmp.eq.s32.totalorder %v5020_v26, %v4776_v33 }
  0x86   : > { %vm1914_vm5 = vmor %vm1698_vm1, %vm1814_vm0  ;;  %vm524_vm0 = vcmp.eq.s32.totalorder %v5020_v26, %v4779_v34 }
  0x87   : > { %vm1918_vm7 = vmor %vm1702_vm3, %vm1818_vm2  ;;  %vm736_vm2 = vcmp.eq.s32.totalorder %v5015_v24, %v4786_v35 }
  0x88   : > { %vm2130_vm9 = vmor %vm1914_vm5, %vm2030_vm4  ;;  %vm740_vm4 = vcmp.eq.s32.totalorder %v5020_v26, %v4786_v35 }
  0x89   : > { %vm2134_vm11 = vmor %vm1918_vm7, %vm2034_vm6  ;;  %vm952_vm6 = vcmp.eq.s32.totalorder %v5015_v24, %v4795_v36 }
  0x8a   : > { %vm2346_vm14 = vmor %vm2130_vm9, %vm2246_vm8  ;;  %vm956_vm8 = vcmp.eq.s32.totalorder %v5020_v26, %v4795_v36 }
  0x8b   : > { %vm2350_vm1 = vmor %vm2134_vm11, %vm2250_vm10  ;;  %v5083_v31 = vsel %vm2346_vm14, 1.0, %v7965_v37  ;;  %vm1168_vm10 = vcmp.eq.s32.totalorder %v5015_v24, %v4807_v39  ;;  %vm1384_vm14 = vcmp.eq.s32.totalorder %v5015_v24, %v4819_v42 }
  0x8c   : > { %v5088_v41 = vsel %vm2350_vm1, 1.0, %v7965_v37  ;;  %vm620_vm3 = vmor %vm404_vm12, %vm520_vm13  ;;  %vm1172_vm12 = vcmp.eq.s32.totalorder %v5020_v26, %v4807_v39 }
  0x8d   : > { %v2642_v44 = vpack.c.bf16 %v5088_v41, %v5083_v31  ;;  %vm624_vm5 = vmor %vm408_vm15, %vm524_vm0  ;;  %vm1388_vm0 = vcmp.eq.s32.totalorder %v5020_v26, %v4819_v42 }
  0x8e   : > { %vm836_vm7 = vmor %vm620_vm3, %vm736_vm2  ;;  %vm1600_vm2 = vcmp.eq.s32.totalorder %v5015_v24, %v4826_v43 }
  0x8f   : > { %2831 = vmatprep.subr.bf16.mxu0 %v2642_v44  ;;  %vm840_vm9 = vmor %vm624_vm5, %vm740_vm4  ;;  %vm1604_vm4 = vcmp.eq.s32.totalorder %v5020_v26, %v4826_v43  ;;  %v5218_v44 = vadd.s32 40, %v4677_v10 }
  0x90   : > { %vm1052_vm11 = vmor %vm836_vm7, %vm952_vm6  ;;  %vm1816_vm6 = vcmp.eq.s32.totalorder %v5015_v24, %v4834_v45 }
  0x91   : > { %vm1056_vm13 = vmor %vm840_vm9, %vm956_vm8  ;;  %vm1820_vm8 = vcmp.eq.s32.totalorder %v5020_v26, %v4834_v45 }
  0x92   : > { %vm1268_vm15 = vmor %vm1052_vm11, %vm1168_vm10  ;;  %vm2032_vm10 = vcmp.eq.s32.totalorder %v5015_v24, %v4841_v46 }
  0x93   : > { %vm1272_vm1 = vmor %vm1056_vm13, %vm1172_vm12  ;;  %vm2036_vm12 = vcmp.eq.s32.totalorder %v5020_v26, %v4841_v46 }
  0x94   : > { %vm1484_vm3 = vmor %vm1268_vm15, %vm1384_vm14  ;;  %vm2248_vm14 = vcmp.eq.s32.totalorder %v5015_v24, %v4849_v48 }
  0x95   : > { %vm1488_vm5 = vmor %vm1272_vm1, %vm1388_vm0  ;;  %vm2252_vm0 = vcmp.eq.s32.totalorder %v5020_v26, %v4849_v48 }
  0x96   : > { %vm1700_vm7 = vmor %vm1484_vm3, %vm1600_vm2  ;;  %vm401_vm2 = vcmp.eq.s32.totalorder %v5015_v24, %v4856_v49  ;;  %vm517_vm3 = vcmp.eq.s32.totalorder %v5015_v24, %v4859_v50 }
  0x97   : > { %vm1704_vm9 = vmor %vm1488_vm5, %vm1604_vm4  ;;  %vm405_vm5 = vcmp.eq.s32.totalorder %v5020_v26, %v4856_v49 }
  0x98   : > { %vm1916_vm11 = vmor %vm1700_vm7, %vm1816_vm6  ;;  %vm521_vm6 = vcmp.eq.s32.totalorder %v5020_v26, %v4859_v50 }
  0x99   : > { %vm1920_vm13 = vmor %vm1704_vm9, %vm1820_vm8  ;;  %vm733_vm8 = vcmp.eq.s32.totalorder %v5015_v24, %v4866_v51 }
  0x9a   : > { %vm2132_vm15 = vmor %vm1916_vm11, %vm2032_vm10  ;;  %vm737_vm10 = vcmp.eq.s32.totalorder %v5020_v26, %v4866_v51 }
  0x9b   : > { %vm2136_vm1 = vmor %vm1920_vm13, %vm2036_vm12  ;;  %vm949_vm12 = vcmp.eq.s32.totalorder %v5015_v24, %v4875_v52 }
  0x9c   : > { %vm2348_vm4 = vmor %vm2132_vm15, %vm2248_vm14  ;;  %vm953_vm14 = vcmp.eq.s32.totalorder %v5020_v26, %v4875_v52 }
  0x9d   : > { %vm2352_vm7 = vmor %vm2136_vm1, %vm2252_vm0  ;;  %v5131_v47 = vsel %vm2348_vm4, 1.0, %v7965_v37  ;;  %vm1165_vm0 = vcmp.eq.s32.totalorder %v5015_v24, %v4887_v54  ;;  %vm1381_vm4 = vcmp.eq.s32.totalorder %v5015_v24, %v4899_v57 }
  0x9e   : > { %v5136_v56 = vsel %vm2352_vm7, 1.0, %v7965_v37  ;;  %vm617_vm9 = vmor %vm401_vm2, %vm517_vm3  ;;  %vm1169_vm2 = vcmp.eq.s32.totalorder %v5020_v26, %v4887_v54 }
  0x9f   : > { %8048 = vst [vmem:[#allocation8_spill] sm:$0xff] %v5136_v56  ;;  %v2644_v59 = vpack.c.bf16 %v5136_v56, %v5131_v47  ;;  %vm621_vm11 = vmor %vm405_vm5, %vm521_vm6  ;;  %vm1385_vm6 = vcmp.eq.s32.totalorder %v5020_v26, %v4899_v57 }
  0xa0   : > { %vm833_vm13 = vmor %vm617_vm9, %vm733_vm8  ;;  %vm1597_vm8 = vcmp.eq.s32.totalorder %v5015_v24, %v4906_v58 }
  0xa1   : > { %2954 = vmatprep.subr.bf16.mxu1 %v2644_v59  ;;  %vm837_vm15 = vmor %vm621_vm11, %vm737_vm10  ;;  %vm1601_vm10 = vcmp.eq.s32.totalorder %v5020_v26, %v4906_v58 }
  0xa2   : > { %vm1049_vm1 = vmor %vm833_vm13, %vm949_vm12  ;;  %vm1813_vm12 = vcmp.eq.s32.totalorder %v5015_v24, %v4914_v60 }
  0xa3   : > { %vm1053_vm3 = vmor %vm837_vm15, %vm953_vm14  ;;  %vm1817_vm14 = vcmp.eq.s32.totalorder %v5020_v26, %v4914_v60 }
  0xa4   : > { %vm1265_vm5 = vmor %vm1049_vm1, %vm1165_vm0  ;;  %vm2029_vm0 = vcmp.eq.s32.totalorder %v5015_v24, %v4921_v61 }
  0xa5   : > { %vm1269_vm7 = vmor %vm1053_vm3, %vm1169_vm2  ;;  %vm2033_vm2 = vcmp.eq.s32.totalorder %v5020_v26, %v4921_v61 }
  0xa6   : > { %vm1481_vm9 = vmor %vm1265_vm5, %vm1381_vm4  ;;  %vm2245_vm4 = vcmp.eq.s32.totalorder %v5015_v24, %v4929_v63 }
  0xa7   : > { %vm1485_vm11 = vmor %vm1269_vm7, %vm1385_vm6  ;;  %vm2249_vm6 = vcmp.eq.s32.totalorder %v5020_v26, %v4929_v63 }
  0xa8   : > { %vm1697_vm13 = vmor %vm1481_vm9, %vm1597_vm8  ;;  %vm403_vm8 = vcmp.eq.s32.totalorder %v5015_v24, %v4936_v0  ;;  %vm519_vm9 = vcmp.eq.s32.totalorder %v5015_v24, %v4939_v1 }
  0xa9   : > { %vm1701_vm15 = vmor %vm1485_vm11, %vm1601_vm10  ;;  %vm407_vm11 = vcmp.eq.s32.totalorder %v5020_v26, %v4936_v0 }
  0xaa   : > { %vm1913_vm1 = vmor %vm1697_vm13, %vm1813_vm12  ;;  %vm523_vm12 = vcmp.eq.s32.totalorder %v5020_v26, %v4939_v1 }
  0xab   : > { %vm1917_vm3 = vmor %vm1701_vm15, %vm1817_vm14  ;;  %vm735_vm14 = vcmp.eq.s32.totalorder %v5015_v24, %v4946_v2 }
  0xac   : > { %vm2129_vm5 = vmor %vm1913_vm1, %vm2029_vm0  ;;  %vm739_vm0 = vcmp.eq.s32.totalorder %v5020_v26, %v4946_v2 }
  0xad   : > { %vm2133_vm7 = vmor %vm1917_vm3, %vm2033_vm2  ;;  %vm951_vm2 = vcmp.eq.s32.totalorder %v5015_v24, %v4955_v3 }
  0xae   : > { %vm2345_vm10 = vmor %vm2129_vm5, %vm2245_vm4  ;;  %vm955_vm4 = vcmp.eq.s32.totalorder %v5020_v26, %v4955_v3 }
  0xaf   : > { %vm2349_vm13 = vmor %vm2133_vm7, %vm2249_vm6  ;;  %v5179_v62 = vsel %vm2345_vm10, 1.0, %v7965_v37  ;;  %vm1167_vm6 = vcmp.eq.s32.totalorder %v5015_v24, %v4967_v5  ;;  %vm1383_vm10 = vcmp.eq.s32.totalorder %v5015_v24, %v4979_v8 }
  0xb0   : > { %v5184_v7 = vsel %vm2349_vm13, 1.0, %v7965_v37  ;;  %vm619_vm15 = vmor %vm403_vm8, %vm519_vm9  ;;  %vm1171_vm8 = vcmp.eq.s32.totalorder %v5020_v26, %v4967_v5 }
  0xb1   : > { %v2641_v15 = vpack.c.bf16 %v5184_v7, %v5179_v62  ;;  %vm623_vm1 = vmor %vm407_vm11, %vm523_vm12  ;;  %vm1387_vm12 = vcmp.eq.s32.totalorder %v5020_v26, %v4979_v8 }
  0xb2   : > { %vm835_vm3 = vmor %vm619_vm15, %vm735_vm14  ;;  %vm1599_vm14 = vcmp.eq.s32.totalorder %v5015_v24, %v4986_v11 }
  0xb3   : > { %2832 = vmatpush1.bf16.msra.mxu0 %v2641_v15  ;;  %vm839_vm5 = vmor %vm623_vm1, %vm739_vm0  ;;  %vm1603_vm0 = vcmp.eq.s32.totalorder %v5020_v26, %v4986_v11 }
  0xb4   : > { %vm1051_vm7 = vmor %vm835_vm3, %vm951_vm2  ;;  %vm1815_vm2 = vcmp.eq.s32.totalorder %v5015_v24, %v4994_v16 }
  0xb5   : > { %vm1055_vm9 = vmor %vm839_vm5, %vm955_vm4  ;;  %vm1819_vm4 = vcmp.eq.s32.totalorder %v5020_v26, %v4994_v16 }
  0xb6   : > { %vm1267_vm11 = vmor %vm1051_vm7, %vm1167_vm6  ;;  %vm2031_vm6 = vcmp.eq.s32.totalorder %v5015_v24, %v5001_v17 }
  0xb7   : > { %vm1271_vm13 = vmor %vm1055_vm9, %vm1171_vm8  ;;  %vm2035_vm8 = vcmp.eq.s32.totalorder %v5020_v26, %v5001_v17 }
  0xb8   : > { %vm1483_vm15 = vmor %vm1267_vm11, %vm1383_vm10  ;;  %vm2247_vm10 = vcmp.eq.s32.totalorder %v5015_v24, %v5008_v21 }
  0xb9   : > { %vm1487_vm1 = vmor %vm1271_vm13, %vm1387_vm12  ;;  %vm2251_vm12 = vcmp.eq.s32.totalorder %v5020_v26, %v5008_v21 }
  0xba   : > { %vm1699_vm3 = vmor %vm1483_vm15, %vm1599_vm14  ;;  %vm410_vm14 = vcmp.eq.s32.totalorder %v5213_v27, %v4701_v18  ;;  %vm526_vm15 = vcmp.eq.s32.totalorder %v5213_v27, %v4704_v19 }
  0xbb   : > { %vm1703_vm5 = vmor %vm1487_vm1, %vm1603_vm0  ;;  %vm414_vm1 = vcmp.eq.s32.totalorder %v5218_v44, %v4701_v18 }
  0xbc   : > { %vm1915_vm7 = vmor %vm1699_vm3, %vm1815_vm2  ;;  %vm530_vm2 = vcmp.eq.s32.totalorder %v5218_v44, %v4704_v19 }
  0xbd   : > { %vm1919_vm9 = vmor %vm1703_vm5, %vm1819_vm4  ;;  %vm742_vm4 = vcmp.eq.s32.totalorder %v5213_v27, %v4707_v20 }
  0xbe   : > { %vm2131_vm11 = vmor %vm1915_vm7, %vm2031_vm6  ;;  %vm746_vm6 = vcmp.eq.s32.totalorder %v5218_v44, %v4707_v20 }
  0xbf   : > { %vm2135_vm13 = vmor %vm1919_vm9, %vm2035_vm8  ;;  %vm958_vm8 = vcmp.eq.s32.totalorder %v5213_v27, %v4713_v22 }
  0xc0   : > { %vm2347_vm0 = vmor %vm2131_vm11, %vm2247_vm10  ;;  %vm962_vm10 = vcmp.eq.s32.totalorder %v5218_v44, %v4713_v22 }
  0xc1   : > { %vm2351_vm3 = vmor %vm2135_vm13, %vm2251_vm12  ;;  %v5233_v24 = vsel %vm2347_vm0, 1.0, %v7965_v37  ;;  %vm1174_vm12 = vcmp.eq.s32.totalorder %v5213_v27, %v4716_v23  ;;  %vm1390_vm0 = vcmp.eq.s32.totalorder %v5213_v27, %v4736_v25 }
  0xc2   : > { %v5238_v26 = vsel %vm2351_vm3, 1.0, %v7965_v37  ;;  %vm626_vm5 = vmor %vm410_vm14, %vm526_vm15  ;;  %vm1178_vm14 = vcmp.eq.s32.totalorder %v5218_v44, %v4716_v23 }
  0xc3   : > { %8049 = vst [vmem:[#allocation9_spill] sm:$0xff] %v5238_v26  ;;  %v2643_v59 = vpack.c.bf16 %v5238_v26, %v5233_v24  ;;  %vm630_vm7 = vmor %vm414_vm1, %vm530_vm2  ;;  %vm1394_vm2 = vcmp.eq.s32.totalorder %v5218_v44, %v4736_v25  ;;  %v7972_v26 = vmov 0  }
  0xc4   : > { %vm842_vm9 = vmor %vm626_vm5, %vm742_vm4  ;;  %vm1606_vm4 = vcmp.eq.s32.totalorder %v5213_v27, %v4747_v28  ;;  %4467 = vset.pattern.permute.xlu0 %v7972_v26  ;;  %4468 = vset.pattern.permute.xlu1 %v7972_v26 }
  0xc5   : > { %2955 = vmatpush1.bf16.msra.mxu1 %v2643_v59  ;;  %vm846_vm11 = vmor %vm630_vm7, %vm746_vm6  ;;  %vm1610_vm6 = vcmp.eq.s32.totalorder %v5218_v44, %v4747_v28 }
  0xc6   : > { %vm1058_vm13 = vmor %vm842_vm9, %vm958_vm8  ;;  %vm1822_vm8 = vcmp.eq.s32.totalorder %v5213_v27, %v4754_v29 }
  0xc7   : > { %vm1062_vm15 = vmor %vm846_vm11, %vm962_vm10  ;;  %vm1826_vm10 = vcmp.eq.s32.totalorder %v5218_v44, %v4754_v29 }
  0xc8   : > { %vm1274_vm1 = vmor %vm1058_vm13, %vm1174_vm12  ;;  %vm2038_vm12 = vcmp.eq.s32.totalorder %v5213_v27, %v4761_v30 }
  0xc9   : > { %vm1278_vm3 = vmor %vm1062_vm15, %vm1178_vm14  ;;  %vm2042_vm14 = vcmp.eq.s32.totalorder %v5218_v44, %v4761_v30 }
  0xca   : > { %vm1490_vm5 = vmor %vm1274_vm1, %vm1390_vm0  ;;  %vm2254_vm0 = vcmp.eq.s32.totalorder %v5213_v27, %v4769_v32 }
  0xcb   : > { %vm1494_vm7 = vmor %vm1278_vm3, %vm1394_vm2  ;;  %vm2258_vm2 = vcmp.eq.s32.totalorder %v5218_v44, %v4769_v32 }
  0xcc   : > { %vm1706_vm9 = vmor %vm1490_vm5, %vm1606_vm4  ;;  %vm412_vm4 = vcmp.eq.s32.totalorder %v5213_v27, %v4776_v33  ;;  %vm528_vm5 = vcmp.eq.s32.totalorder %v5213_v27, %v4779_v34 }
  0xcd   : > { %vm1710_vm11 = vmor %vm1494_vm7, %vm1610_vm6  ;;  %vm416_vm7 = vcmp.eq.s32.totalorder %v5218_v44, %v4776_v33 }
  0xce   : > { %vm1922_vm13 = vmor %vm1706_vm9, %vm1822_vm8  ;;  %vm532_vm8 = vcmp.eq.s32.totalorder %v5218_v44, %v4779_v34 }
  0xcf   : > { %vm1926_vm15 = vmor %vm1710_vm11, %vm1826_vm10  ;;  %vm744_vm10 = vcmp.eq.s32.totalorder %v5213_v27, %v4786_v35 }
  0xd0   : > { %vm2138_vm1 = vmor %vm1922_vm13, %vm2038_vm12  ;;  %vm748_vm12 = vcmp.eq.s32.totalorder %v5218_v44, %v4786_v35 }
  0xd1   : > { %vm2142_vm3 = vmor %vm1926_vm15, %vm2042_vm14  ;;  %vm960_vm14 = vcmp.eq.s32.totalorder %v5213_v27, %v4795_v36 }
  0xd2   : > { %vm2354_vm6 = vmor %vm2138_vm1, %vm2254_vm0  ;;  %vm964_vm0 = vcmp.eq.s32.totalorder %v5218_v44, %v4795_v36 }
  0xd3   : > { %vm2358_vm9 = vmor %vm2142_vm3, %vm2258_vm2  ;;  %v5281_v15 = vsel %vm2354_vm6, 1.0, %v7965_v37  ;;  %vm1176_vm2 = vcmp.eq.s32.totalorder %v5213_v27, %v4807_v39  ;;  %vm1392_vm6 = vcmp.eq.s32.totalorder %v5213_v27, %v4819_v42 }
  0xd4   : > { %8050 = vst [vmem:[#allocation10_spill] sm:$0xff] %v5281_v15  ;;  %v5286_v59 = vsel %vm2358_vm9, 1.0, %v7965_v37  ;;  %vm628_vm11 = vmor %vm412_vm4, %vm528_vm5  ;;  %vm1180_vm4 = vcmp.eq.s32.totalorder %v5218_v44, %v4807_v39 }
  0xd5   : > { %8051 = vst [vmem:[#allocation11_spill] sm:$0xff] %v5286_v59  ;;  %v2646_v9 = vpack.c.bf16 %v5286_v59, %v5281_v15  ;;  %vm632_vm13 = vmor %vm416_vm7, %vm532_vm8  ;;  %vm1396_vm8 = vcmp.eq.s32.totalorder %v5218_v44, %v4819_v42  ;;  %v3078_v15 = vld [vmem:[%s7953_s2 + $0x18] sm:$0xff] }
  0xd6   : > { %vm844_vm15 = vmor %vm628_vm11, %vm744_vm10  ;;  %vm1608_vm10 = vcmp.eq.s32.totalorder %v5213_v27, %v4826_v43 }
  0xd7   : > { %2833 = vmatprep.subr.bf16.mxu0 %v2646_v9  ;;  %vm848_vm1 = vmor %vm632_vm13, %vm748_vm12  ;;  %vm1612_vm12 = vcmp.eq.s32.totalorder %v5218_v44, %v4826_v43 }
  0xd8   : > { %vm1060_vm3 = vmor %vm844_vm15, %vm960_vm14  ;;  %vm1824_vm14 = vcmp.eq.s32.totalorder %v5213_v27, %v4834_v45 }
  0xd9   : > { %vm1064_vm5 = vmor %vm848_vm1, %vm964_vm0  ;;  %vm1828_vm0 = vcmp.eq.s32.totalorder %v5218_v44, %v4834_v45 }
  0xda   : > { %vm1276_vm7 = vmor %vm1060_vm3, %vm1176_vm2  ;;  %vm2040_vm2 = vcmp.eq.s32.totalorder %v5213_v27, %v4841_v46 }
  0xdb   : > { %vm1280_vm9 = vmor %vm1064_vm5, %vm1180_vm4  ;;  %vm2044_vm4 = vcmp.eq.s32.totalorder %v5218_v44, %v4841_v46 }
  0xdc   : > { %vm1492_vm11 = vmor %vm1276_vm7, %vm1392_vm6  ;;  %vm2256_vm6 = vcmp.eq.s32.totalorder %v5213_v27, %v4849_v48 }
  0xdd   : > { %vm1496_vm13 = vmor %vm1280_vm9, %vm1396_vm8  ;;  %vm2260_vm8 = vcmp.eq.s32.totalorder %v5218_v44, %v4849_v48 }
  0xde   : > { %vm1708_vm15 = vmor %vm1492_vm11, %vm1608_vm10  ;;  %vm409_vm10 = vcmp.eq.s32.totalorder %v5213_v27, %v4856_v49  ;;  %vm525_vm11 = vcmp.eq.s32.totalorder %v5213_v27, %v4859_v50 }
  0xdf   : > { %vm1712_vm1 = vmor %vm1496_vm13, %vm1612_vm12  ;;  %vm413_vm13 = vcmp.eq.s32.totalorder %v5218_v44, %v4856_v49 }
  0xe0   : > { %vm1924_vm3 = vmor %vm1708_vm15, %vm1824_vm14  ;;  %vm529_vm14 = vcmp.eq.s32.totalorder %v5218_v44, %v4859_v50 }
  0xe1   : > { %vm1928_vm5 = vmor %vm1712_vm1, %vm1828_vm0  ;;  %vm741_vm0 = vcmp.eq.s32.totalorder %v5213_v27, %v4866_v51 }
  0xe2   : > { %vm2140_vm7 = vmor %vm1924_vm3, %vm2040_vm2  ;;  %vm745_vm2 = vcmp.eq.s32.totalorder %v5218_v44, %v4866_v51 }
  0xe3   : > { %vm2144_vm9 = vmor %vm1928_vm5, %vm2044_vm4  ;;  %vm957_vm4 = vcmp.eq.s32.totalorder %v5213_v27, %v4875_v52 }
  0xe4   : > { %vm2356_vm12 = vmor %vm2140_vm7, %vm2256_vm6  ;;  %vm961_vm6 = vcmp.eq.s32.totalorder %v5218_v44, %v4875_v52 }
  0xe5   : > { %vm2360_vm15 = vmor %vm2144_vm9, %vm2260_vm8  ;;  %v5329_v9 = vsel %vm2356_vm12, 1.0, %v7965_v37  ;;  %vm1173_vm8 = vcmp.eq.s32.totalorder %v5213_v27, %v4887_v54  ;;  %vm1389_vm12 = vcmp.eq.s32.totalorder %v5213_v27, %v4899_v57 }
  0xe6   : > { %8052 = vst [vmem:[#allocation12_spill] sm:$0xff] %v5329_v9  ;;  %v5334_v13 = vsel %vm2360_vm15, 1.0, %v7965_v37  ;;  %vm625_vm1 = vmor %vm409_vm10, %vm525_vm11  ;;  %vm1177_vm10 = vcmp.eq.s32.totalorder %v5218_v44, %v4887_v54 }
  0xe7   : > { %8053 = vst [vmem:[#allocation13_spill] sm:$0xff] %v5334_v13  ;;  %v2648_v59 = vpack.c.bf16 %v5334_v13, %v5329_v9  ;;  %vm629_vm3 = vmor %vm413_vm13, %vm529_vm14  ;;  %vm1393_vm14 = vcmp.eq.s32.totalorder %v5218_v44, %v4899_v57 }
  0xe8   : > { %vm841_vm5 = vmor %vm625_vm1, %vm741_vm0  ;;  %vm1605_vm0 = vcmp.eq.s32.totalorder %v5213_v27, %v4906_v58 }
  0xe9   : > { %2956 = vmatprep.subr.bf16.mxu1 %v2648_v59  ;;  %vm845_vm7 = vmor %vm629_vm3, %vm745_vm2  ;;  %vm1609_vm2 = vcmp.eq.s32.totalorder %v5218_v44, %v4906_v58 }
  0xea   : > { %vm1057_vm9 = vmor %vm841_vm5, %vm957_vm4  ;;  %vm1821_vm4 = vcmp.eq.s32.totalorder %v5213_v27, %v4914_v60 }
  0xeb   : > { %vm1061_vm11 = vmor %vm845_vm7, %vm961_vm6  ;;  %vm1825_vm6 = vcmp.eq.s32.totalorder %v5218_v44, %v4914_v60 }
  0xec   : > { %vm1273_vm13 = vmor %vm1057_vm9, %vm1173_vm8  ;;  %vm2037_vm8 = vcmp.eq.s32.totalorder %v5213_v27, %v4921_v61 }
  0xed   : > { %vm1277_vm15 = vmor %vm1061_vm11, %vm1177_vm10  ;;  %vm2041_vm10 = vcmp.eq.s32.totalorder %v5218_v44, %v4921_v61 }
  0xee   : > { %vm1489_vm1 = vmor %vm1273_vm13, %vm1389_vm12  ;;  %vm2253_vm12 = vcmp.eq.s32.totalorder %v5213_v27, %v4929_v63 }
  0xef   : > { %vm1493_vm3 = vmor %vm1277_vm15, %vm1393_vm14  ;;  %vm2257_vm14 = vcmp.eq.s32.totalorder %v5218_v44, %v4929_v63 }
  0xf0   : > { %vm1705_vm5 = vmor %vm1489_vm1, %vm1605_vm0  ;;  %vm411_vm0 = vcmp.eq.s32.totalorder %v5213_v27, %v4936_v0  ;;  %vm527_vm1 = vcmp.eq.s32.totalorder %v5213_v27, %v4939_v1 }
  0xf1   : > { %vm1709_vm7 = vmor %vm1493_vm3, %vm1609_vm2  ;;  %vm415_vm3 = vcmp.eq.s32.totalorder %v5218_v44, %v4936_v0 }
  0xf2   : > { %vm1921_vm9 = vmor %vm1705_vm5, %vm1821_vm4  ;;  %vm531_vm4 = vcmp.eq.s32.totalorder %v5218_v44, %v4939_v1 }
  0xf3   : > { %vm1925_vm11 = vmor %vm1709_vm7, %vm1825_vm6  ;;  %vm743_vm6 = vcmp.eq.s32.totalorder %v5213_v27, %v4946_v2 }
  0xf4   : > { %vm2137_vm13 = vmor %vm1921_vm9, %vm2037_vm8  ;;  %vm747_vm8 = vcmp.eq.s32.totalorder %v5218_v44, %v4946_v2 }
  0xf5   : > { %vm2141_vm15 = vmor %vm1925_vm11, %vm2041_vm10  ;;  %vm959_vm10 = vcmp.eq.s32.totalorder %v5213_v27, %v4955_v3 }
  0xf6   : > { %vm2353_vm2 = vmor %vm2137_vm13, %vm2253_vm12  ;;  %vm963_vm12 = vcmp.eq.s32.totalorder %v5218_v44, %v4955_v3 }
  0xf7   : > { %vm2357_vm5 = vmor %vm2141_vm15, %vm2257_vm14  ;;  %v5377_v59 = vsel %vm2353_vm2, 1.0, %v7965_v37  ;;  %vm1175_vm14 = vcmp.eq.s32.totalorder %v5213_v27, %v4967_v5  ;;  %vm1391_vm2 = vcmp.eq.s32.totalorder %v5213_v27, %v4979_v8 }
  0xf8   : > { %8054 = vst [vmem:[#allocation14_spill] sm:$0xff] %v5377_v59  ;;  %v5382_v13 = vsel %vm2357_vm5, 1.0, %v7965_v37  ;;  %vm627_vm7 = vmor %vm411_vm0, %vm527_vm1  ;;  %vm1179_vm0 = vcmp.eq.s32.totalorder %v5218_v44, %v4967_v5  ;;  %v5416_v37 = vadd.s32 56, %v4677_v10 }
  0xf9   : > { %8055 = vst [vmem:[#allocation15_spill] sm:$0xff] %v5382_v13  ;;  %v2645_v9 = vpack.c.bf16 %v5382_v13, %v5377_v59  ;;  %vm631_vm9 = vmor %vm415_vm3, %vm531_vm4  ;;  %vm1395_vm4 = vcmp.eq.s32.totalorder %v5218_v44, %v4979_v8  ;;  %v3095_v59 = vld [vmem:[%s7953_s2 + $0xa0] sm:$0xff] }
  0xfa   : > { %vm843_vm11 = vmor %vm627_vm7, %vm743_vm6  ;;  %vm1607_vm6 = vcmp.eq.s32.totalorder %v5213_v27, %v4986_v11 }
  0xfb   : > { %2834 = vmatpush1.bf16.msra.mxu0 %v2645_v9  ;;  %vm847_vm13 = vmor %vm631_vm9, %vm747_vm8  ;;  %vm1611_vm8 = vcmp.eq.s32.totalorder %v5218_v44, %v4986_v11  ;;  %v5411_v9 = vadd.s32 48, %v4677_v10 }
  0xfc   : > { %vm1059_vm15 = vmor %vm843_vm11, %vm959_vm10  ;;  %vm1823_vm10 = vcmp.eq.s32.totalorder %v5213_v27, %v4994_v16 }
  0xfd   : > { %vm1063_vm1 = vmor %vm847_vm13, %vm963_vm12  ;;  %vm1827_vm12 = vcmp.eq.s32.totalorder %v5218_v44, %v4994_v16 }
  0xfe   : > { %vm1275_vm3 = vmor %vm1059_vm15, %vm1175_vm14  ;;  %vm2039_vm14 = vcmp.eq.s32.totalorder %v5213_v27, %v5001_v17 }
  0xff   : > { %vm1279_vm5 = vmor %vm1063_vm1, %vm1179_vm0  ;;  %vm2043_vm0 = vcmp.eq.s32.totalorder %v5218_v44, %v5001_v17 }
 0x100   : > { %vm1491_vm7 = vmor %vm1275_vm3, %vm1391_vm2  ;;  %vm2255_vm2 = vcmp.eq.s32.totalorder %v5213_v27, %v5008_v21  ;;  %v8056_v27 = vmov 0.0  }
 0x101   : > { %vm1495_vm9 = vmor %vm1279_vm5, %vm1395_vm4  ;;  %vm2259_vm4 = vcmp.eq.s32.totalorder %v5218_v44, %v5008_v21 }
 0x102   : > { %vm1707_vm11 = vmor %vm1491_vm7, %vm1607_vm6  ;;  %vm418_vm6 = vcmp.eq.s32.totalorder %v5411_v9, %v4701_v18  ;;  %vm534_vm7 = vcmp.eq.s32.totalorder %v5411_v9, %v4704_v19 }
 0x103   : > { %vm1711_vm13 = vmor %vm1495_vm9, %vm1611_vm8  ;;  %vm422_vm9 = vcmp.eq.s32.totalorder %v5416_v37, %v4701_v18 }
 0x104   : > { %vm1923_vm15 = vmor %vm1707_vm11, %vm1823_vm10  ;;  %vm538_vm10 = vcmp.eq.s32.totalorder %v5416_v37, %v4704_v19 }
 0x105   : > { %vm1927_vm1 = vmor %vm1711_vm13, %vm1827_vm12  ;;  %vm750_vm12 = vcmp.eq.s32.totalorder %v5411_v9, %v4707_v20 }
 0x106   : > { %vm2139_vm3 = vmor %vm1923_vm15, %vm2039_vm14  ;;  %vm754_vm14 = vcmp.eq.s32.totalorder %v5416_v37, %v4707_v20 }
 0x107   : > { %vm2143_vm5 = vmor %vm1927_vm1, %vm2043_vm0  ;;  %vm966_vm0 = vcmp.eq.s32.totalorder %v5411_v9, %v4713_v22 }
 0x108   : > { %vm2355_vm8 = vmor %vm2139_vm3, %vm2255_vm2  ;;  %vm970_vm2 = vcmp.eq.s32.totalorder %v5416_v37, %v4713_v22 }
 0x109   : > { %vm2359_vm11 = vmor %vm2143_vm5, %vm2259_vm4  ;;  %v5431_v13 = vsel %vm2355_vm8, 1.0, %v8056_v27  ;;  %vm1182_vm4 = vcmp.eq.s32.totalorder %v5411_v9, %v4716_v23  ;;  %vm1398_vm8 = vcmp.eq.s32.totalorder %v5411_v9, %v4736_v25 }
 0x10a   : > { %8057 = vst [vmem:[#allocation16_spill] sm:$0xff] %v5431_v13  ;;  %v5436_v44 = vsel %vm2359_vm11, 1.0, %v8056_v27  ;;  %vm634_vm13 = vmor %vm418_vm6, %vm534_vm7  ;;  %vm1186_vm6 = vcmp.eq.s32.totalorder %v5416_v37, %v4716_v23 }
 0x10b   : > { %8058 = vst [vmem:[#allocation17_spill] sm:$0xff] %v5436_v44  ;;  %v2647_v56 = vpack.c.bf16 %v5436_v44, %v5431_v13  ;;  %vm638_vm15 = vmor %vm422_vm9, %vm538_vm10  ;;  %vm1402_vm10 = vcmp.eq.s32.totalorder %v5416_v37, %v4736_v25 }
 0x10c   : > { %vm850_vm1 = vmor %vm634_vm13, %vm750_vm12  ;;  %vm1614_vm12 = vcmp.eq.s32.totalorder %v5411_v9, %v4747_v28 }
 0x10d   : > { %2957 = vmatpush1.bf16.msra.mxu1 %v2647_v56  ;;  %vm854_vm3 = vmor %vm638_vm15, %vm754_vm14  ;;  %vm1618_vm14 = vcmp.eq.s32.totalorder %v5416_v37, %v4747_v28 }
 0x10e   : > { %vm1066_vm5 = vmor %vm850_vm1, %vm966_vm0  ;;  %vm1830_vm0 = vcmp.eq.s32.totalorder %v5411_v9, %v4754_v29 }
 0x10f   : > { %vm1070_vm7 = vmor %vm854_vm3, %vm970_vm2  ;;  %vm1834_vm2 = vcmp.eq.s32.totalorder %v5416_v37, %v4754_v29 }
 0x110   : > { %vm1282_vm9 = vmor %vm1066_vm5, %vm1182_vm4  ;;  %vm2046_vm4 = vcmp.eq.s32.totalorder %v5411_v9, %v4761_v30 }
 0x111   : > { %vm1286_vm11 = vmor %vm1070_vm7, %vm1186_vm6  ;;  %vm2050_vm6 = vcmp.eq.s32.totalorder %v5416_v37, %v4761_v30 }
 0x112   : > { %vm1498_vm13 = vmor %vm1282_vm9, %vm1398_vm8  ;;  %vm2262_vm8 = vcmp.eq.s32.totalorder %v5411_v9, %v4769_v32 }
 0x113   : > { %vm1502_vm15 = vmor %vm1286_vm11, %vm1402_vm10  ;;  %vm2266_vm10 = vcmp.eq.s32.totalorder %v5416_v37, %v4769_v32 }
 0x114   : > { %vm1714_vm1 = vmor %vm1498_vm13, %vm1614_vm12  ;;  %vm420_vm12 = vcmp.eq.s32.totalorder %v5411_v9, %v4776_v33  ;;  %vm536_vm13 = vcmp.eq.s32.totalorder %v5411_v9, %v4779_v34 }
 0x115   : > { %vm1718_vm3 = vmor %vm1502_vm15, %vm1618_vm14  ;;  %vm424_vm15 = vcmp.eq.s32.totalorder %v5416_v37, %v4776_v33 }
 0x116   : > { %vm1930_vm5 = vmor %vm1714_vm1, %vm1830_vm0  ;;  %vm540_vm0 = vcmp.eq.s32.totalorder %v5416_v37, %v4779_v34 }
 0x117   : > { %vm1934_vm7 = vmor %vm1718_vm3, %vm1834_vm2  ;;  %vm752_vm2 = vcmp.eq.s32.totalorder %v5411_v9, %v4786_v35 }
 0x118   : > { %vm2146_vm9 = vmor %vm1930_vm5, %vm2046_vm4  ;;  %vm756_vm4 = vcmp.eq.s32.totalorder %v5416_v37, %v4786_v35 }
 0x119   : > { %vm2150_vm11 = vmor %vm1934_vm7, %vm2050_vm6  ;;  %vm968_vm6 = vcmp.eq.s32.totalorder %v5411_v9, %v4795_v36 }
 0x11a   : > { %vm2362_vm14 = vmor %vm2146_vm9, %vm2262_vm8  ;;  %vm972_vm8 = vcmp.eq.s32.totalorder %v5416_v37, %v4795_v36 }
 0x11b   : > { %vm2366_vm1 = vmor %vm2150_vm11, %vm2266_vm10  ;;  %v5479_v56 = vsel %vm2362_vm14, 1.0, %v8056_v27  ;;  %vm1184_vm10 = vcmp.eq.s32.totalorder %v5411_v9, %v4807_v39  ;;  %vm1400_vm14 = vcmp.eq.s32.totalorder %v5411_v9, %v4819_v42 }
 0x11c   : > { %8059 = vst [vmem:[#allocation18_spill] sm:$0xff] %v5479_v56  ;;  %v5484_v44 = vsel %vm2366_vm1, 1.0, %v8056_v27  ;;  %vm636_vm3 = vmor %vm420_vm12, %vm536_vm13  ;;  %vm1188_vm12 = vcmp.eq.s32.totalorder %v5416_v37, %v4807_v39 }
 0x11d   : > { %8060 = vst [vmem:[#allocation19_spill] sm:$0xff] %v5484_v44  ;;  %v2650_v13 = vpack.c.bf16 %v5484_v44, %v5479_v56  ;;  %vm640_vm5 = vmor %vm424_vm15, %vm540_vm0  ;;  %vm1404_vm0 = vcmp.eq.s32.totalorder %v5416_v37, %v4819_v42  ;;  %v3485_v56 = vld [vmem:[%s7954_s3] sm:$0xff] }
 0x11e   : > { %vm852_vm7 = vmor %vm636_vm3, %vm752_vm2  ;;  %vm1616_vm2 = vcmp.eq.s32.totalorder %v5411_v9, %v4826_v43  ;;  %3503 = vperm.xlu0 %4467, %v3485_v56   ;;  %v5614_v56 = vadd.s32 64, %v4677_v10 }
 0x11f   : > { %2835 = vmatprep.subr.bf16.mxu0 %v2650_v13  ;;  %vm856_vm9 = vmor %vm640_vm5, %vm756_vm4  ;;  %vm1620_vm4 = vcmp.eq.s32.totalorder %v5416_v37, %v4826_v43 }
 0x120   : > { %vm1068_vm11 = vmor %vm852_vm7, %vm968_vm6  ;;  %vm1832_vm6 = vcmp.eq.s32.totalorder %v5411_v9, %v4834_v45 }
 0x121   : > { %vm1072_vm13 = vmor %vm856_vm9, %vm972_vm8  ;;  %vm1836_vm8 = vcmp.eq.s32.totalorder %v5416_v37, %v4834_v45 }
 0x122   : > { %vm1284_vm15 = vmor %vm1068_vm11, %vm1184_vm10  ;;  %vm2048_vm10 = vcmp.eq.s32.totalorder %v5411_v9, %v4841_v46 }
 0x123   : > { %vm1288_vm1 = vmor %vm1072_vm13, %vm1188_vm12  ;;  %vm2052_vm12 = vcmp.eq.s32.totalorder %v5416_v37, %v4841_v46 }
 0x124   : > { %vm1500_vm3 = vmor %vm1284_vm15, %vm1400_vm14  ;;  %vm2264_vm14 = vcmp.eq.s32.totalorder %v5411_v9, %v4849_v48 }
 0x125   : > { %vm1504_vm5 = vmor %vm1288_vm1, %vm1404_vm0  ;;  %vm2268_vm0 = vcmp.eq.s32.totalorder %v5416_v37, %v4849_v48 }
 0x126   : > { %vm1716_vm7 = vmor %vm1500_vm3, %vm1616_vm2  ;;  %vm417_vm2 = vcmp.eq.s32.totalorder %v5411_v9, %v4856_v49  ;;  %vm533_vm3 = vcmp.eq.s32.totalorder %v5411_v9, %v4859_v50 }
 0x127   : > { %vm1720_vm9 = vmor %vm1504_vm5, %vm1620_vm4  ;;  %vm421_vm5 = vcmp.eq.s32.totalorder %v5416_v37, %v4856_v49 }
 0x128   : > { %vm1932_vm11 = vmor %vm1716_vm7, %vm1832_vm6  ;;  %vm537_vm6 = vcmp.eq.s32.totalorder %v5416_v37, %v4859_v50 }
 0x129   : > { %vm1936_vm13 = vmor %vm1720_vm9, %vm1836_vm8  ;;  %vm749_vm8 = vcmp.eq.s32.totalorder %v5411_v9, %v4866_v51 }
 0x12a   : > { %vm2148_vm15 = vmor %vm1932_vm11, %vm2048_vm10  ;;  %vm753_vm10 = vcmp.eq.s32.totalorder %v5416_v37, %v4866_v51 }
 0x12b   : > { %vm2152_vm1 = vmor %vm1936_vm13, %vm2052_vm12  ;;  %vm965_vm12 = vcmp.eq.s32.totalorder %v5411_v9, %v4875_v52 }
 0x12c   : > { %vm2364_vm4 = vmor %vm2148_vm15, %vm2264_vm14  ;;  %vm969_vm14 = vcmp.eq.s32.totalorder %v5416_v37, %v4875_v52 }
 0x12d   : > { %vm2368_vm7 = vmor %vm2152_vm1, %vm2268_vm0  ;;  %v5529_v13 = vsel %vm2364_vm4, 1.0, %v8056_v27  ;;  %vm1181_vm0 = vcmp.eq.s32.totalorder %v5411_v9, %v4887_v54  ;;  %vm1397_vm4 = vcmp.eq.s32.totalorder %v5411_v9, %v4899_v57 }
 0x12e   : > { %8061 = vst [vmem:[#allocation20_spill] sm:$0xff] %v5529_v13  ;;  %v5534_v26 = vsel %vm2368_vm7, 1.0, %v8056_v27  ;;  %vm633_vm9 = vmor %vm417_vm2, %vm533_vm3  ;;  %vm1185_vm2 = vcmp.eq.s32.totalorder %v5416_v37, %v4887_v54 }
 0x12f   : > { %8062 = vst [vmem:[#allocation21_spill] sm:$0xff] %v5534_v26  ;;  %v2652_v44 = vpack.c.bf16 %v5534_v26, %v5529_v13  ;;  %vm637_vm11 = vmor %vm421_vm5, %vm537_vm6  ;;  %vm1401_vm6 = vcmp.eq.s32.totalorder %v5416_v37, %v4899_v57 }
 0x130   : > { %vm849_vm13 = vmor %vm633_vm9, %vm749_vm8  ;;  %vm1613_vm8 = vcmp.eq.s32.totalorder %v5411_v9, %v4906_v58 }
 0x131   : > { %2958 = vmatprep.subr.bf16.mxu1 %v2652_v44  ;;  %vm853_vm15 = vmor %vm637_vm11, %vm753_vm10  ;;  %vm1617_vm10 = vcmp.eq.s32.totalorder %v5416_v37, %v4906_v58 }
 0x132   : > { %vm1065_vm1 = vmor %vm849_vm13, %vm965_vm12  ;;  %vm1829_vm12 = vcmp.eq.s32.totalorder %v5411_v9, %v4914_v60 }
 0x133   : > { %vm1069_vm3 = vmor %vm853_vm15, %vm969_vm14  ;;  %vm1833_vm14 = vcmp.eq.s32.totalorder %v5416_v37, %v4914_v60 }
 0x134   : > { %vm1281_vm5 = vmor %vm1065_vm1, %vm1181_vm0  ;;  %vm2045_vm0 = vcmp.eq.s32.totalorder %v5411_v9, %v4921_v61 }
 0x135   : > { %vm1285_vm7 = vmor %vm1069_vm3, %vm1185_vm2  ;;  %vm2049_vm2 = vcmp.eq.s32.totalorder %v5416_v37, %v4921_v61 }
 0x136   : > { %vm1497_vm9 = vmor %vm1281_vm5, %vm1397_vm4  ;;  %vm2261_vm4 = vcmp.eq.s32.totalorder %v5411_v9, %v4929_v63 }
 0x137   : > { %vm1501_vm11 = vmor %vm1285_vm7, %vm1401_vm6  ;;  %vm2265_vm6 = vcmp.eq.s32.totalorder %v5416_v37, %v4929_v63 }
 0x138   : > { %vm1713_vm13 = vmor %vm1497_vm9, %vm1613_vm8  ;;  %vm419_vm8 = vcmp.eq.s32.totalorder %v5411_v9, %v4936_v0  ;;  %vm535_vm9 = vcmp.eq.s32.totalorder %v5411_v9, %v4939_v1 }
 0x139   : > { %vm1717_vm15 = vmor %vm1501_vm11, %vm1617_vm10  ;;  %vm423_vm11 = vcmp.eq.s32.totalorder %v5416_v37, %v4936_v0 }
 0x13a   : > { %vm1929_vm1 = vmor %vm1713_vm13, %vm1829_vm12  ;;  %vm539_vm12 = vcmp.eq.s32.totalorder %v5416_v37, %v4939_v1 }
 0x13b   : > { %vm1933_vm3 = vmor %vm1717_vm15, %vm1833_vm14  ;;  %vm751_vm14 = vcmp.eq.s32.totalorder %v5411_v9, %v4946_v2 }
 0x13c   : > { %vm2145_vm5 = vmor %vm1929_vm1, %vm2045_vm0  ;;  %vm755_vm0 = vcmp.eq.s32.totalorder %v5416_v37, %v4946_v2 }
 0x13d   : > { %vm2149_vm7 = vmor %vm1933_vm3, %vm2049_vm2  ;;  %vm967_vm2 = vcmp.eq.s32.totalorder %v5411_v9, %v4955_v3 }
 0x13e   : > { %vm2361_vm10 = vmor %vm2145_vm5, %vm2261_vm4  ;;  %vm971_vm4 = vcmp.eq.s32.totalorder %v5416_v37, %v4955_v3 }
 0x13f   : > { %vm2365_vm13 = vmor %vm2149_vm7, %vm2265_vm6  ;;  %v5577_v44 = vsel %vm2361_vm10, 1.0, %v8056_v27  ;;  %vm1183_vm6 = vcmp.eq.s32.totalorder %v5411_v9, %v4967_v5  ;;  %vm1399_vm10 = vcmp.eq.s32.totalorder %v5411_v9, %v4979_v8 }
 0x140   : > { %8063 = vst [vmem:[#allocation22_spill] sm:$0xff] %v5577_v44  ;;  %v5582_v26 = vsel %vm2365_vm13, 1.0, %v8056_v27  ;;  %vm635_vm15 = vmor %vm419_vm8, %vm535_vm9  ;;  %vm1187_vm8 = vcmp.eq.s32.totalorder %v5416_v37, %v4967_v5 }
 0x141   : > { %8064 = vst [vmem:[#allocation23_spill] sm:$0xff] %v5582_v26  ;;  %v2649_v13 = vpack.c.bf16 %v5582_v26, %v5577_v44  ;;  %vm639_vm1 = vmor %vm423_vm11, %vm539_vm12  ;;  %vm1403_vm12 = vcmp.eq.s32.totalorder %v5416_v37, %v4979_v8  ;;  %v3486_v44 = vld [vmem:[%s7954_s3 + $0x8] sm:$0xff] }
 0x142   : > { %vm851_vm3 = vmor %vm635_vm15, %vm751_vm14  ;;  %vm1615_vm14 = vcmp.eq.s32.totalorder %v5411_v9, %v4986_v11  ;;  %3508 = vperm.xlu0 %4467, %v3486_v44   ;;  %v5815_v44 = vadd.s32 80, %v4677_v10 }
 0x143   : > { %2836 = vmatpush1.bf16.msra.mxu0 %v2649_v13  ;;  %vm855_vm5 = vmor %vm639_vm1, %vm755_vm0  ;;  %vm1619_vm0 = vcmp.eq.s32.totalorder %v5416_v37, %v4986_v11  ;;  %v5619_v13 = vadd.s32 72, %v4677_v10 }
 0x144   : > { %vm1067_vm7 = vmor %vm851_vm3, %vm967_vm2  ;;  %vm1831_vm2 = vcmp.eq.s32.totalorder %v5411_v9, %v4994_v16 }
 0x145   : > { %vm1071_vm9 = vmor %vm855_vm5, %vm971_vm4  ;;  %vm1835_vm4 = vcmp.eq.s32.totalorder %v5416_v37, %v4994_v16 }
 0x146   : > { %vm1283_vm11 = vmor %vm1067_vm7, %vm1183_vm6  ;;  %vm2047_vm6 = vcmp.eq.s32.totalorder %v5411_v9, %v5001_v17 }
 0x147   : > { %vm1287_vm13 = vmor %vm1071_vm9, %vm1187_vm8  ;;  %vm2051_vm8 = vcmp.eq.s32.totalorder %v5416_v37, %v5001_v17 }
 0x148   : > { %vm1499_vm15 = vmor %vm1283_vm11, %vm1399_vm10  ;;  %vm2263_vm10 = vcmp.eq.s32.totalorder %v5411_v9, %v5008_v21 }
 0x149   : > { %vm1503_vm1 = vmor %vm1287_vm13, %vm1403_vm12  ;;  %vm2267_vm12 = vcmp.eq.s32.totalorder %v5416_v37, %v5008_v21 }
 0x14a   : > { %vm1715_vm3 = vmor %vm1499_vm15, %vm1615_vm14  ;;  %vm426_vm14 = vcmp.eq.s32.totalorder %v5614_v56, %v4701_v18  ;;  %vm542_vm15 = vcmp.eq.s32.totalorder %v5614_v56, %v4704_v19 }
 0x14b   : > { %vm1719_vm5 = vmor %vm1503_vm1, %vm1619_vm0  ;;  %vm430_vm1 = vcmp.eq.s32.totalorder %v5619_v13, %v4701_v18 }
 0x14c   : > { %vm1931_vm7 = vmor %vm1715_vm3, %vm1831_vm2  ;;  %vm546_vm2 = vcmp.eq.s32.totalorder %v5619_v13, %v4704_v19 }
 0x14d   : > { %vm1935_vm9 = vmor %vm1719_vm5, %vm1835_vm4  ;;  %vm758_vm4 = vcmp.eq.s32.totalorder %v5614_v56, %v4707_v20 }
 0x14e   : > { %vm2147_vm11 = vmor %vm1931_vm7, %vm2047_vm6  ;;  %vm762_vm6 = vcmp.eq.s32.totalorder %v5619_v13, %v4707_v20 }
 0x14f   : > { %vm2151_vm13 = vmor %vm1935_vm9, %vm2051_vm8  ;;  %vm974_vm8 = vcmp.eq.s32.totalorder %v5614_v56, %v4713_v22 }
 0x150   : > { %vm2363_vm0 = vmor %vm2147_vm11, %vm2263_vm10  ;;  %vm978_vm10 = vcmp.eq.s32.totalorder %v5619_v13, %v4713_v22 }
 0x151   : > { %vm2367_vm3 = vmor %vm2151_vm13, %vm2267_vm12  ;;  %v5634_v9 = vsel %vm2363_vm0, 1.0, %v8056_v27  ;;  %vm1190_vm12 = vcmp.eq.s32.totalorder %v5614_v56, %v4716_v23  ;;  %vm1406_vm0 = vcmp.eq.s32.totalorder %v5614_v56, %v4736_v25 }
 0x152   : > { %8065 = vst [vmem:[#allocation24_spill] sm:$0xff] %v5634_v9  ;;  %v5639_v37 = vsel %vm2367_vm3, 1.0, %v8056_v27  ;;  %vm642_vm5 = vmor %vm426_vm14, %vm542_vm15  ;;  %vm1194_vm14 = vcmp.eq.s32.totalorder %v5619_v13, %v4716_v23 }
 0x153   : > { %8066 = vst [vmem:[#allocation25_spill] sm:$0xff] %v5639_v37  ;;  %v2651_v26 = vpack.c.bf16 %v5639_v37, %v5634_v9  ;;  %vm646_vm7 = vmor %vm430_vm1, %vm546_vm2  ;;  %vm1410_vm2 = vcmp.eq.s32.totalorder %v5619_v13, %v4736_v25 }
 0x154   : > { %vm858_vm9 = vmor %vm642_vm5, %vm758_vm4  ;;  %vm1622_vm4 = vcmp.eq.s32.totalorder %v5614_v56, %v4747_v28 }
 0x155   : > { %2959 = vmatpush1.bf16.msra.mxu1 %v2651_v26  ;;  %vm862_vm11 = vmor %vm646_vm7, %vm762_vm6  ;;  %vm1626_vm6 = vcmp.eq.s32.totalorder %v5619_v13, %v4747_v28 }
 0x156   : > { %vm1074_vm13 = vmor %vm858_vm9, %vm974_vm8  ;;  %vm1838_vm8 = vcmp.eq.s32.totalorder %v5614_v56, %v4754_v29 }
 0x157   : > { %vm1078_vm15 = vmor %vm862_vm11, %vm978_vm10  ;;  %vm1842_vm10 = vcmp.eq.s32.totalorder %v5619_v13, %v4754_v29 }
 0x158   : > { %vm1290_vm1 = vmor %vm1074_vm13, %vm1190_vm12  ;;  %vm2054_vm12 = vcmp.eq.s32.totalorder %v5614_v56, %v4761_v30 }
 0x159   : > { %vm1294_vm3 = vmor %vm1078_vm15, %vm1194_vm14  ;;  %vm2058_vm14 = vcmp.eq.s32.totalorder %v5619_v13, %v4761_v30 }
 0x15a   : > { %vm1506_vm5 = vmor %vm1290_vm1, %vm1406_vm0  ;;  %vm2270_vm0 = vcmp.eq.s32.totalorder %v5614_v56, %v4769_v32 }
 0x15b   : > { %vm1510_vm7 = vmor %vm1294_vm3, %vm1410_vm2  ;;  %vm2274_vm2 = vcmp.eq.s32.totalorder %v5619_v13, %v4769_v32 }
 0x15c   : > { %vm1722_vm9 = vmor %vm1506_vm5, %vm1622_vm4  ;;  %vm428_vm4 = vcmp.eq.s32.totalorder %v5614_v56, %v4776_v33  ;;  %vm544_vm5 = vcmp.eq.s32.totalorder %v5614_v56, %v4779_v34 }
 0x15d   : > { %vm1726_vm11 = vmor %vm1510_vm7, %vm1626_vm6  ;;  %vm432_vm7 = vcmp.eq.s32.totalorder %v5619_v13, %v4776_v33 }
 0x15e   : > { %vm1938_vm13 = vmor %vm1722_vm9, %vm1838_vm8  ;;  %vm548_vm8 = vcmp.eq.s32.totalorder %v5619_v13, %v4779_v34 }
 0x15f   : > { %vm1942_vm15 = vmor %vm1726_vm11, %vm1842_vm10  ;;  %vm760_vm10 = vcmp.eq.s32.totalorder %v5614_v56, %v4786_v35 }
 0x160   : > { %vm2154_vm1 = vmor %vm1938_vm13, %vm2054_vm12  ;;  %vm764_vm12 = vcmp.eq.s32.totalorder %v5619_v13, %v4786_v35 }
 0x161   : > { %vm2158_vm3 = vmor %vm1942_vm15, %vm2058_vm14  ;;  %vm976_vm14 = vcmp.eq.s32.totalorder %v5614_v56, %v4795_v36 }
 0x162   : > { %vm2370_vm6 = vmor %vm2154_vm1, %vm2270_vm0  ;;  %vm980_vm0 = vcmp.eq.s32.totalorder %v5619_v13, %v4795_v36 }
 0x163   : > { %vm2374_vm9 = vmor %vm2158_vm3, %vm2274_vm2  ;;  %v5682_v26 = vsel %vm2370_vm6, 1.0, %v8056_v27  ;;  %vm1192_vm2 = vcmp.eq.s32.totalorder %v5614_v56, %v4807_v39  ;;  %vm1408_vm6 = vcmp.eq.s32.totalorder %v5614_v56, %v4819_v42 }
 0x164   : > { %8067 = vst [vmem:[#allocation26_spill] sm:$0xff] %v5682_v26  ;;  %v5687_v37 = vsel %vm2374_vm9, 1.0, %v8056_v27  ;;  %vm644_vm11 = vmor %vm428_vm4, %vm544_vm5  ;;  %vm1196_vm4 = vcmp.eq.s32.totalorder %v5619_v13, %v4807_v39 }
 0x165   : > { %8068 = vst [vmem:[#allocation27_spill] sm:$0xff] %v5687_v37  ;;  %v2654_v9 = vpack.c.bf16 %v5687_v37, %v5682_v26  ;;  %vm648_vm13 = vmor %vm432_vm7, %vm548_vm8  ;;  %vm1412_vm8 = vcmp.eq.s32.totalorder %v5619_v13, %v4819_v42 }
 0x166   : > { %vm860_vm15 = vmor %vm644_vm11, %vm760_vm10  ;;  %vm1624_vm10 = vcmp.eq.s32.totalorder %v5614_v56, %v4826_v43 }
 0x167   : > { %2837 = vmatprep.subr.bf16.mxu0 %v2654_v9  ;;  %vm864_vm1 = vmor %vm648_vm13, %vm764_vm12  ;;  %vm1628_vm12 = vcmp.eq.s32.totalorder %v5619_v13, %v4826_v43 }
 0x168   : > { %vm1076_vm3 = vmor %vm860_vm15, %vm976_vm14  ;;  %vm1840_vm14 = vcmp.eq.s32.totalorder %v5614_v56, %v4834_v45 }
 0x169   : > { %vm1080_vm5 = vmor %vm864_vm1, %vm980_vm0  ;;  %vm1844_vm0 = vcmp.eq.s32.totalorder %v5619_v13, %v4834_v45 }
 0x16a   : > { %vm1292_vm7 = vmor %vm1076_vm3, %vm1192_vm2  ;;  %vm2056_vm2 = vcmp.eq.s32.totalorder %v5614_v56, %v4841_v46 }
 0x16b   : > { %vm1296_vm9 = vmor %vm1080_vm5, %vm1196_vm4  ;;  %vm2060_vm4 = vcmp.eq.s32.totalorder %v5619_v13, %v4841_v46 }
 0x16c   : > { %vm1508_vm11 = vmor %vm1292_vm7, %vm1408_vm6  ;;  %vm2272_vm6 = vcmp.eq.s32.totalorder %v5614_v56, %v4849_v48 }
 0x16d   : > { %vm1512_vm13 = vmor %vm1296_vm9, %vm1412_vm8  ;;  %vm2276_vm8 = vcmp.eq.s32.totalorder %v5619_v13, %v4849_v48 }
 0x16e   : > { %vm1724_vm15 = vmor %vm1508_vm11, %vm1624_vm10  ;;  %vm425_vm10 = vcmp.eq.s32.totalorder %v5614_v56, %v4856_v49  ;;  %vm541_vm11 = vcmp.eq.s32.totalorder %v5614_v56, %v4859_v50 }
 0x16f   : > { %vm1728_vm1 = vmor %vm1512_vm13, %vm1628_vm12  ;;  %vm429_vm13 = vcmp.eq.s32.totalorder %v5619_v13, %v4856_v49 }
 0x170   : > { %vm1940_vm3 = vmor %vm1724_vm15, %vm1840_vm14  ;;  %vm545_vm14 = vcmp.eq.s32.totalorder %v5619_v13, %v4859_v50 }
 0x171   : > { %vm1944_vm5 = vmor %vm1728_vm1, %vm1844_vm0  ;;  %vm757_vm0 = vcmp.eq.s32.totalorder %v5614_v56, %v4866_v51 }
 0x172   : > { %vm2156_vm7 = vmor %vm1940_vm3, %vm2056_vm2  ;;  %vm761_vm2 = vcmp.eq.s32.totalorder %v5619_v13, %v4866_v51 }
 0x173   : > { %vm2160_vm9 = vmor %vm1944_vm5, %vm2060_vm4  ;;  %vm973_vm4 = vcmp.eq.s32.totalorder %v5614_v56, %v4875_v52 }
 0x174   : > { %vm2372_vm12 = vmor %vm2156_vm7, %vm2272_vm6  ;;  %vm977_vm6 = vcmp.eq.s32.totalorder %v5619_v13, %v4875_v52 }
 0x175   : > { %vm2376_vm15 = vmor %vm2160_vm9, %vm2276_vm8  ;;  %v5730_v9 = vsel %vm2372_vm12, 1.0, %v8056_v27  ;;  %vm1189_vm8 = vcmp.eq.s32.totalorder %v5614_v56, %v4887_v54  ;;  %vm1405_vm12 = vcmp.eq.s32.totalorder %v5614_v56, %v4899_v57 }
 0x176   : > { %8069 = vst [vmem:[#allocation28_spill] sm:$0xff] %v5730_v9  ;;  %v5735_v37 = vsel %vm2376_vm15, 1.0, %v8056_v27  ;;  %vm641_vm1 = vmor %vm425_vm10, %vm541_vm11  ;;  %vm1193_vm10 = vcmp.eq.s32.totalorder %v5619_v13, %v4887_v54 }
 0x177   : > { %8070 = vst [vmem:[#allocation29_spill] sm:$0xff] %v5735_v37  ;;  %v2656_v26 = vpack.c.bf16 %v5735_v37, %v5730_v9  ;;  %vm645_vm3 = vmor %vm429_vm13, %vm545_vm14  ;;  %vm1409_vm14 = vcmp.eq.s32.totalorder %v5619_v13, %v4899_v57 }
 0x178   : > { %vm857_vm5 = vmor %vm641_vm1, %vm757_vm0  ;;  %vm1621_vm0 = vcmp.eq.s32.totalorder %v5614_v56, %v4906_v58 }
 0x179   : > { %2960 = vmatprep.subr.bf16.mxu1 %v2656_v26  ;;  %vm861_vm7 = vmor %vm645_vm3, %vm761_vm2  ;;  %vm1625_vm2 = vcmp.eq.s32.totalorder %v5619_v13, %v4906_v58 }
 0x17a   : > { %vm1073_vm9 = vmor %vm857_vm5, %vm973_vm4  ;;  %vm1837_vm4 = vcmp.eq.s32.totalorder %v5614_v56, %v4914_v60 }
 0x17b   : > { %vm1077_vm11 = vmor %vm861_vm7, %vm977_vm6  ;;  %vm1841_vm6 = vcmp.eq.s32.totalorder %v5619_v13, %v4914_v60 }
 0x17c   : > { %vm1289_vm13 = vmor %vm1073_vm9, %vm1189_vm8  ;;  %vm2053_vm8 = vcmp.eq.s32.totalorder %v5614_v56, %v4921_v61 }
 0x17d   : > { %vm1293_vm15 = vmor %vm1077_vm11, %vm1193_vm10  ;;  %vm2057_vm10 = vcmp.eq.s32.totalorder %v5619_v13, %v4921_v61 }
 0x17e   : > { %vm1505_vm1 = vmor %vm1289_vm13, %vm1405_vm12  ;;  %vm2269_vm12 = vcmp.eq.s32.totalorder %v5614_v56, %v4929_v63 }
 0x17f   : > { %vm1509_vm3 = vmor %vm1293_vm15, %vm1409_vm14  ;;  %vm2273_vm14 = vcmp.eq.s32.totalorder %v5619_v13, %v4929_v63 }
 0x180   : > { %vm1721_vm5 = vmor %vm1505_vm1, %vm1621_vm0  ;;  %vm427_vm0 = vcmp.eq.s32.totalorder %v5614_v56, %v4936_v0  ;;  %vm543_vm1 = vcmp.eq.s32.totalorder %v5614_v56, %v4939_v1 }
 0x181   : > { %vm1725_vm7 = vmor %vm1509_vm3, %vm1625_vm2  ;;  %vm431_vm3 = vcmp.eq.s32.totalorder %v5619_v13, %v4936_v0 }
 0x182   : > { %vm1937_vm9 = vmor %vm1721_vm5, %vm1837_vm4  ;;  %vm547_vm4 = vcmp.eq.s32.totalorder %v5619_v13, %v4939_v1 }
 0x183   : > { %vm1941_vm11 = vmor %vm1725_vm7, %vm1841_vm6  ;;  %vm759_vm6 = vcmp.eq.s32.totalorder %v5614_v56, %v4946_v2 }
 0x184   : > { %vm2153_vm13 = vmor %vm1937_vm9, %vm2053_vm8  ;;  %vm763_vm8 = vcmp.eq.s32.totalorder %v5619_v13, %v4946_v2 }
 0x185   : > { %vm2157_vm15 = vmor %vm1941_vm11, %vm2057_vm10  ;;  %vm975_vm10 = vcmp.eq.s32.totalorder %v5614_v56, %v4955_v3 }
 0x186   : > { %vm2369_vm2 = vmor %vm2153_vm13, %vm2269_vm12  ;;  %vm979_vm12 = vcmp.eq.s32.totalorder %v5619_v13, %v4955_v3 }
 0x187   : > { %vm2373_vm5 = vmor %vm2157_vm15, %vm2273_vm14  ;;  %v5778_v26 = vsel %vm2369_vm2, 1.0, %v8056_v27  ;;  %vm1191_vm14 = vcmp.eq.s32.totalorder %v5614_v56, %v4967_v5  ;;  %vm1407_vm2 = vcmp.eq.s32.totalorder %v5614_v56, %v4979_v8 }
 0x188   : > { %8071 = vst [vmem:[#allocation30_spill] sm:$0xff] %v5778_v26  ;;  %v5783_v37 = vsel %vm2373_vm5, 1.0, %v8056_v27  ;;  %vm643_vm7 = vmor %vm427_vm0, %vm543_vm1  ;;  %vm1195_vm0 = vcmp.eq.s32.totalorder %v5619_v13, %v4967_v5 }
 0x189   : > { %8072 = vst [vmem:[#allocation31_spill] sm:$0xff] %v5783_v37  ;;  %v2653_v9 = vpack.c.bf16 %v5783_v37, %v5778_v26  ;;  %vm647_vm9 = vmor %vm431_vm3, %vm547_vm4  ;;  %vm1411_vm4 = vcmp.eq.s32.totalorder %v5619_v13, %v4979_v8  ;;  %v3487_v26 = vld [vmem:[%s7954_s3 + $0x10] sm:$0xff] }
 0x18a   : > { %vm859_vm11 = vmor %vm643_vm7, %vm759_vm6  ;;  %vm1623_vm6 = vcmp.eq.s32.totalorder %v5614_v56, %v4986_v11  ;;  %3513 = vperm.xlu1 %4468, %v3487_v26  }
 0x18b   : > { %2838 = vmatpush1.bf16.msra.mxu0 %v2653_v9  ;;  %vm863_vm13 = vmor %vm647_vm9, %vm763_vm8  ;;  %vm1627_vm8 = vcmp.eq.s32.totalorder %v5619_v13, %v4986_v11  ;;  %v5820_v9 = vadd.s32 88, %v4677_v10 }
 0x18c   : > { %vm1075_vm15 = vmor %vm859_vm11, %vm975_vm10  ;;  %vm1839_vm10 = vcmp.eq.s32.totalorder %v5614_v56, %v4994_v16 }
 0x18d   : > { %vm1079_vm1 = vmor %vm863_vm13, %vm979_vm12  ;;  %vm1843_vm12 = vcmp.eq.s32.totalorder %v5619_v13, %v4994_v16 }
 0x18e   : > { %vm1291_vm3 = vmor %vm1075_vm15, %vm1191_vm14  ;;  %vm2055_vm14 = vcmp.eq.s32.totalorder %v5614_v56, %v5001_v17 }
 0x18f   : > { %vm1295_vm5 = vmor %vm1079_vm1, %vm1195_vm0  ;;  %vm2059_vm0 = vcmp.eq.s32.totalorder %v5619_v13, %v5001_v17 }
 0x190   : > { %vm1507_vm7 = vmor %vm1291_vm3, %vm1407_vm2  ;;  %vm2271_vm2 = vcmp.eq.s32.totalorder %v5614_v56, %v5008_v21 }
 0x191   : > { %vm1511_vm9 = vmor %vm1295_vm5, %vm1411_vm4  ;;  %vm2275_vm4 = vcmp.eq.s32.totalorder %v5619_v13, %v5008_v21 }
 0x192   : > { %vm1723_vm11 = vmor %vm1507_vm7, %vm1623_vm6  ;;  %vm434_vm6 = vcmp.eq.s32.totalorder %v5815_v44, %v4701_v18  ;;  %vm550_vm7 = vcmp.eq.s32.totalorder %v5815_v44, %v4704_v19 }
 0x193   : > { %vm1727_vm13 = vmor %vm1511_vm9, %vm1627_vm8  ;;  %vm438_vm9 = vcmp.eq.s32.totalorder %v5820_v9, %v4701_v18 }
 0x194   : > { %vm1939_vm15 = vmor %vm1723_vm11, %vm1839_vm10  ;;  %vm554_vm10 = vcmp.eq.s32.totalorder %v5820_v9, %v4704_v19 }
 0x195   : > { %vm1943_vm1 = vmor %vm1727_vm13, %vm1843_vm12  ;;  %vm766_vm12 = vcmp.eq.s32.totalorder %v5815_v44, %v4707_v20 }
 0x196   : > { %vm2155_vm3 = vmor %vm1939_vm15, %vm2055_vm14  ;;  %vm770_vm14 = vcmp.eq.s32.totalorder %v5820_v9, %v4707_v20 }
 0x197   : > { %vm2159_vm5 = vmor %vm1943_vm1, %vm2059_vm0  ;;  %vm982_vm0 = vcmp.eq.s32.totalorder %v5815_v44, %v4713_v22 }
 0x198   : > { %vm2371_vm8 = vmor %vm2155_vm3, %vm2271_vm2  ;;  %vm986_vm2 = vcmp.eq.s32.totalorder %v5820_v9, %v4713_v22 }
 0x199   : > { %vm2375_vm11 = vmor %vm2159_vm5, %vm2275_vm4  ;;  %v5835_v56 = vsel %vm2371_vm8, 1.0, %v8056_v27  ;;  %vm1198_vm4 = vcmp.eq.s32.totalorder %v5815_v44, %v4716_v23  ;;  %vm1414_vm8 = vcmp.eq.s32.totalorder %v5815_v44, %v4736_v25 }
 0x19a   : > { %8073 = vst [vmem:[#allocation32_spill] sm:$0xff] %v5835_v56  ;;  %v5840_v13 = vsel %vm2375_vm11, 1.0, %v8056_v27  ;;  %vm650_vm13 = vmor %vm434_vm6, %vm550_vm7  ;;  %vm1202_vm6 = vcmp.eq.s32.totalorder %v5820_v9, %v4716_v23 }
 0x19b   : > { %8074 = vst [vmem:[#allocation33_spill] sm:$0xff] %v5840_v13  ;;  %v2655_v37 = vpack.c.bf16 %v5840_v13, %v5835_v56  ;;  %vm654_vm15 = vmor %vm438_vm9, %vm554_vm10  ;;  %vm1418_vm10 = vcmp.eq.s32.totalorder %v5820_v9, %v4736_v25 }
 0x19c   : > { %vm866_vm1 = vmor %vm650_vm13, %vm766_vm12  ;;  %vm1630_vm12 = vcmp.eq.s32.totalorder %v5815_v44, %v4747_v28 }
 0x19d   : > { %2961 = vmatpush1.bf16.msra.mxu1 %v2655_v37  ;;  %vm870_vm3 = vmor %vm654_vm15, %vm770_vm14  ;;  %vm1634_vm14 = vcmp.eq.s32.totalorder %v5820_v9, %v4747_v28 }
 0x19e   : > { %vm1082_vm5 = vmor %vm866_vm1, %vm982_vm0  ;;  %vm1846_vm0 = vcmp.eq.s32.totalorder %v5815_v44, %v4754_v29 }
 0x19f   : > { %vm1086_vm7 = vmor %vm870_vm3, %vm986_vm2  ;;  %vm1850_vm2 = vcmp.eq.s32.totalorder %v5820_v9, %v4754_v29 }
 0x1a0   : > { %vm1298_vm9 = vmor %vm1082_vm5, %vm1198_vm4  ;;  %vm2062_vm4 = vcmp.eq.s32.totalorder %v5815_v44, %v4761_v30 }
 0x1a1   : > { %vm1302_vm11 = vmor %vm1086_vm7, %vm1202_vm6  ;;  %vm2066_vm6 = vcmp.eq.s32.totalorder %v5820_v9, %v4761_v30 }
 0x1a2   : > { %vm1514_vm13 = vmor %vm1298_vm9, %vm1414_vm8  ;;  %vm2278_vm8 = vcmp.eq.s32.totalorder %v5815_v44, %v4769_v32 }
 0x1a3   : > { %vm1518_vm15 = vmor %vm1302_vm11, %vm1418_vm10  ;;  %vm2282_vm10 = vcmp.eq.s32.totalorder %v5820_v9, %v4769_v32 }
 0x1a4   : > { %vm1730_vm1 = vmor %vm1514_vm13, %vm1630_vm12  ;;  %vm436_vm12 = vcmp.eq.s32.totalorder %v5815_v44, %v4776_v33  ;;  %vm552_vm13 = vcmp.eq.s32.totalorder %v5815_v44, %v4779_v34 }
 0x1a5   : > { %vm1734_vm3 = vmor %vm1518_vm15, %vm1634_vm14  ;;  %vm440_vm15 = vcmp.eq.s32.totalorder %v5820_v9, %v4776_v33 }
 0x1a6   : > { %vm1946_vm5 = vmor %vm1730_vm1, %vm1846_vm0  ;;  %vm556_vm0 = vcmp.eq.s32.totalorder %v5820_v9, %v4779_v34 }
 0x1a7   : > { %vm1950_vm7 = vmor %vm1734_vm3, %vm1850_vm2  ;;  %vm768_vm2 = vcmp.eq.s32.totalorder %v5815_v44, %v4786_v35 }
 0x1a8   : > { %vm2162_vm9 = vmor %vm1946_vm5, %vm2062_vm4  ;;  %vm772_vm4 = vcmp.eq.s32.totalorder %v5820_v9, %v4786_v35 }
 0x1a9   : > { %vm2166_vm11 = vmor %vm1950_vm7, %vm2066_vm6  ;;  %vm984_vm6 = vcmp.eq.s32.totalorder %v5815_v44, %v4795_v36 }
 0x1aa   : > { %vm2378_vm14 = vmor %vm2162_vm9, %vm2278_vm8  ;;  %vm988_vm8 = vcmp.eq.s32.totalorder %v5820_v9, %v4795_v36 }
 0x1ab   : > { %vm2382_vm1 = vmor %vm2166_vm11, %vm2282_vm10  ;;  %v5883_v37 = vsel %vm2378_vm14, 1.0, %v8056_v27  ;;  %vm1200_vm10 = vcmp.eq.s32.totalorder %v5815_v44, %v4807_v39  ;;  %vm1416_vm14 = vcmp.eq.s32.totalorder %v5815_v44, %v4819_v42 }
 0x1ac   : > { %8075 = vst [vmem:[#allocation34_spill] sm:$0xff] %v5883_v37  ;;  %v5888_v13 = vsel %vm2382_vm1, 1.0, %v8056_v27  ;;  %vm652_vm3 = vmor %vm436_vm12, %vm552_vm13  ;;  %vm1204_vm12 = vcmp.eq.s32.totalorder %v5820_v9, %v4807_v39 }
 0x1ad   : > { %8076 = vst [vmem:[#allocation35_spill] sm:$0xff] %v5888_v13  ;;  %v2658_v56 = vpack.c.bf16 %v5888_v13, %v5883_v37  ;;  %vm656_vm5 = vmor %vm440_vm15, %vm556_vm0  ;;  %vm1420_vm0 = vcmp.eq.s32.totalorder %v5820_v9, %v4819_v42  ;;  %v3489_v37 = vld [vmem:[%s7954_s3 + $0x20] sm:$0xff] }
 0x1ae   : > { %vm868_vm7 = vmor %vm652_vm3, %vm768_vm2  ;;  %vm1632_vm2 = vcmp.eq.s32.totalorder %v5815_v44, %v4826_v43  ;;  %3523 = vperm.xlu0 %4467, %v3489_v37   ;;  %v6019_v37 = vadd.s32 96, %v4677_v10 }
 0x1af   : > { %2839 = vmatprep.subr.bf16.mxu0 %v2658_v56  ;;  %vm872_vm9 = vmor %vm656_vm5, %vm772_vm4  ;;  %vm1636_vm4 = vcmp.eq.s32.totalorder %v5820_v9, %v4826_v43 }
 0x1b0   : > { %vm1084_vm11 = vmor %vm868_vm7, %vm984_vm6  ;;  %vm1848_vm6 = vcmp.eq.s32.totalorder %v5815_v44, %v4834_v45 }
 0x1b1   : > { %vm1088_vm13 = vmor %vm872_vm9, %vm988_vm8  ;;  %vm1852_vm8 = vcmp.eq.s32.totalorder %v5820_v9, %v4834_v45 }
 0x1b2   : > { %vm1300_vm15 = vmor %vm1084_vm11, %vm1200_vm10  ;;  %vm2064_vm10 = vcmp.eq.s32.totalorder %v5815_v44, %v4841_v46 }
 0x1b3   : > { %vm1304_vm1 = vmor %vm1088_vm13, %vm1204_vm12  ;;  %vm2068_vm12 = vcmp.eq.s32.totalorder %v5820_v9, %v4841_v46 }
 0x1b4   : > { %vm1516_vm3 = vmor %vm1300_vm15, %vm1416_vm14  ;;  %vm2280_vm14 = vcmp.eq.s32.totalorder %v5815_v44, %v4849_v48 }
 0x1b5   : > { %vm1520_vm5 = vmor %vm1304_vm1, %vm1420_vm0  ;;  %vm2284_vm0 = vcmp.eq.s32.totalorder %v5820_v9, %v4849_v48 }
 0x1b6   : > { %vm1732_vm7 = vmor %vm1516_vm3, %vm1632_vm2  ;;  %vm433_vm2 = vcmp.eq.s32.totalorder %v5815_v44, %v4856_v49  ;;  %vm549_vm3 = vcmp.eq.s32.totalorder %v5815_v44, %v4859_v50 }
 0x1b7   : > { %vm1736_vm9 = vmor %vm1520_vm5, %vm1636_vm4  ;;  %vm437_vm5 = vcmp.eq.s32.totalorder %v5820_v9, %v4856_v49 }
 0x1b8   : > { %vm1948_vm11 = vmor %vm1732_vm7, %vm1848_vm6  ;;  %vm553_vm6 = vcmp.eq.s32.totalorder %v5820_v9, %v4859_v50 }
 0x1b9   : > { %vm1952_vm13 = vmor %vm1736_vm9, %vm1852_vm8  ;;  %vm765_vm8 = vcmp.eq.s32.totalorder %v5815_v44, %v4866_v51 }
 0x1ba   : > { %vm2164_vm15 = vmor %vm1948_vm11, %vm2064_vm10  ;;  %vm769_vm10 = vcmp.eq.s32.totalorder %v5820_v9, %v4866_v51 }
 0x1bb   : > { %vm2168_vm1 = vmor %vm1952_vm13, %vm2068_vm12  ;;  %vm981_vm12 = vcmp.eq.s32.totalorder %v5815_v44, %v4875_v52 }
 0x1bc   : > { %vm2380_vm4 = vmor %vm2164_vm15, %vm2280_vm14  ;;  %vm985_vm14 = vcmp.eq.s32.totalorder %v5820_v9, %v4875_v52 }
 0x1bd   : > { %vm2384_vm7 = vmor %vm2168_vm1, %vm2284_vm0  ;;  %v5934_v26 = vsel %vm2380_vm4, 1.0, %v8056_v27  ;;  %vm1197_vm0 = vcmp.eq.s32.totalorder %v5815_v44, %v4887_v54  ;;  %vm1413_vm4 = vcmp.eq.s32.totalorder %v5815_v44, %v4899_v57 }
 0x1be   : > { %8077 = vst [vmem:[#allocation36_spill] sm:$0xff] %v5934_v26  ;;  %v5939_v56 = vsel %vm2384_vm7, 1.0, %v8056_v27  ;;  %vm649_vm9 = vmor %vm433_vm2, %vm549_vm3  ;;  %vm1201_vm2 = vcmp.eq.s32.totalorder %v5820_v9, %v4887_v54 }
 0x1bf   : > { %8078 = vst [vmem:[#allocation37_spill] sm:$0xff] %v5939_v56  ;;  %v2660_v13 = vpack.c.bf16 %v5939_v56, %v5934_v26  ;;  %vm653_vm11 = vmor %vm437_vm5, %vm553_vm6  ;;  %vm1417_vm6 = vcmp.eq.s32.totalorder %v5820_v9, %v4899_v57 }
 0x1c0   : > { %vm865_vm13 = vmor %vm649_vm9, %vm765_vm8  ;;  %vm1629_vm8 = vcmp.eq.s32.totalorder %v5815_v44, %v4906_v58 }
 0x1c1   : > { %2962 = vmatprep.subr.bf16.mxu1 %v2660_v13  ;;  %vm869_vm15 = vmor %vm653_vm11, %vm769_vm10  ;;  %vm1633_vm10 = vcmp.eq.s32.totalorder %v5820_v9, %v4906_v58 }
 0x1c2   : > { %vm1081_vm1 = vmor %vm865_vm13, %vm981_vm12  ;;  %vm1845_vm12 = vcmp.eq.s32.totalorder %v5815_v44, %v4914_v60 }
 0x1c3   : > { %vm1085_vm3 = vmor %vm869_vm15, %vm985_vm14  ;;  %vm1849_vm14 = vcmp.eq.s32.totalorder %v5820_v9, %v4914_v60 }
 0x1c4   : > { %vm1297_vm5 = vmor %vm1081_vm1, %vm1197_vm0  ;;  %vm2061_vm0 = vcmp.eq.s32.totalorder %v5815_v44, %v4921_v61 }
 0x1c5   : > { %vm1301_vm7 = vmor %vm1085_vm3, %vm1201_vm2  ;;  %vm2065_vm2 = vcmp.eq.s32.totalorder %v5820_v9, %v4921_v61 }
 0x1c6   : > { %vm1513_vm9 = vmor %vm1297_vm5, %vm1413_vm4  ;;  %vm2277_vm4 = vcmp.eq.s32.totalorder %v5815_v44, %v4929_v63 }
 0x1c7   : > { %vm1517_vm11 = vmor %vm1301_vm7, %vm1417_vm6  ;;  %vm2281_vm6 = vcmp.eq.s32.totalorder %v5820_v9, %v4929_v63 }
 0x1c8   : > { %vm1729_vm13 = vmor %vm1513_vm9, %vm1629_vm8  ;;  %vm435_vm8 = vcmp.eq.s32.totalorder %v5815_v44, %v4936_v0  ;;  %vm551_vm9 = vcmp.eq.s32.totalorder %v5815_v44, %v4939_v1 }
 0x1c9   : > { %vm1733_vm15 = vmor %vm1517_vm11, %vm1633_vm10  ;;  %vm439_vm11 = vcmp.eq.s32.totalorder %v5820_v9, %v4936_v0 }
 0x1ca   : > { %vm1945_vm1 = vmor %vm1729_vm13, %vm1845_vm12  ;;  %vm555_vm12 = vcmp.eq.s32.totalorder %v5820_v9, %v4939_v1 }
 0x1cb   : > { %vm1949_vm3 = vmor %vm1733_vm15, %vm1849_vm14  ;;  %vm767_vm14 = vcmp.eq.s32.totalorder %v5815_v44, %v4946_v2 }
 0x1cc   : > { %vm2161_vm5 = vmor %vm1945_vm1, %vm2061_vm0  ;;  %vm771_vm0 = vcmp.eq.s32.totalorder %v5820_v9, %v4946_v2 }
 0x1cd   : > { %vm2165_vm7 = vmor %vm1949_vm3, %vm2065_vm2  ;;  %vm983_vm2 = vcmp.eq.s32.totalorder %v5815_v44, %v4955_v3 }
 0x1ce   : > { %vm2377_vm10 = vmor %vm2161_vm5, %vm2277_vm4  ;;  %vm987_vm4 = vcmp.eq.s32.totalorder %v5820_v9, %v4955_v3 }
 0x1cf   : > { %vm2381_vm13 = vmor %vm2165_vm7, %vm2281_vm6  ;;  %v5982_v13 = vsel %vm2377_vm10, 1.0, %v8056_v27  ;;  %vm1199_vm6 = vcmp.eq.s32.totalorder %v5815_v44, %v4967_v5  ;;  %vm1415_vm10 = vcmp.eq.s32.totalorder %v5815_v44, %v4979_v8 }
 0x1d0   : > { %8079 = vst [vmem:[#allocation38_spill] sm:$0xff] %v5982_v13  ;;  %v5987_v56 = vsel %vm2381_vm13, 1.0, %v8056_v27  ;;  %vm651_vm15 = vmor %vm435_vm8, %vm551_vm9  ;;  %vm1203_vm8 = vcmp.eq.s32.totalorder %v5820_v9, %v4967_v5 }
 0x1d1   : > { %8080 = vst [vmem:[#allocation39_spill] sm:$0xff] %v5987_v56  ;;  %v2657_v26 = vpack.c.bf16 %v5987_v56, %v5982_v13  ;;  %vm655_vm1 = vmor %vm439_vm11, %vm555_vm12  ;;  %vm1419_vm12 = vcmp.eq.s32.totalorder %v5820_v9, %v4979_v8  ;;  %v3488_v13 = vld [vmem:[%s7954_s3 + $0x18] sm:$0xff] }
 0x1d2   : > { %vm867_vm3 = vmor %vm651_vm15, %vm767_vm14  ;;  %vm1631_vm14 = vcmp.eq.s32.totalorder %v5815_v44, %v4986_v11  ;;  %3518 = vperm.xlu1 %4468, %v3488_v13  }
 0x1d3   : > { %2840 = vmatpush1.bf16.msra.mxu0 %v2657_v26  ;;  %vm871_vm5 = vmor %vm655_vm1, %vm771_vm0  ;;  %vm1635_vm0 = vcmp.eq.s32.totalorder %v5820_v9, %v4986_v11  ;;  %v6024_v26 = vadd.s32 104, %v4677_v10 }
 0x1d4   : > { %vm1083_vm7 = vmor %vm867_vm3, %vm983_vm2  ;;  %vm1847_vm2 = vcmp.eq.s32.totalorder %v5815_v44, %v4994_v16 }
 0x1d5   : > { %vm1087_vm9 = vmor %vm871_vm5, %vm987_vm4  ;;  %vm1851_vm4 = vcmp.eq.s32.totalorder %v5820_v9, %v4994_v16 }
 0x1d6   : > { %vm1299_vm11 = vmor %vm1083_vm7, %vm1199_vm6  ;;  %vm2063_vm6 = vcmp.eq.s32.totalorder %v5815_v44, %v5001_v17 }
 0x1d7   : > { %vm1303_vm13 = vmor %vm1087_vm9, %vm1203_vm8  ;;  %vm2067_vm8 = vcmp.eq.s32.totalorder %v5820_v9, %v5001_v17 }
 0x1d8   : > { %vm1515_vm15 = vmor %vm1299_vm11, %vm1415_vm10  ;;  %vm2279_vm10 = vcmp.eq.s32.totalorder %v5815_v44, %v5008_v21 }
 0x1d9   : > { %vm1519_vm1 = vmor %vm1303_vm13, %vm1419_vm12  ;;  %vm2283_vm12 = vcmp.eq.s32.totalorder %v5820_v9, %v5008_v21 }
 0x1da   : > { %vm1731_vm3 = vmor %vm1515_vm15, %vm1631_vm14  ;;  %vm442_vm14 = vcmp.eq.s32.totalorder %v6019_v37, %v4701_v18  ;;  %vm558_vm15 = vcmp.eq.s32.totalorder %v6019_v37, %v4704_v19 }
 0x1db   : > { %vm1735_vm5 = vmor %vm1519_vm1, %vm1635_vm0  ;;  %vm446_vm1 = vcmp.eq.s32.totalorder %v6024_v26, %v4701_v18 }
 0x1dc   : > { %vm1947_vm7 = vmor %vm1731_vm3, %vm1847_vm2  ;;  %vm562_vm2 = vcmp.eq.s32.totalorder %v6024_v26, %v4704_v19 }
 0x1dd   : > { %vm1951_vm9 = vmor %vm1735_vm5, %vm1851_vm4  ;;  %vm774_vm4 = vcmp.eq.s32.totalorder %v6019_v37, %v4707_v20 }
 0x1de   : > { %vm2163_vm11 = vmor %vm1947_vm7, %vm2063_vm6  ;;  %vm778_vm6 = vcmp.eq.s32.totalorder %v6024_v26, %v4707_v20 }
 0x1df   : > { %vm2167_vm13 = vmor %vm1951_vm9, %vm2067_vm8  ;;  %vm990_vm8 = vcmp.eq.s32.totalorder %v6019_v37, %v4713_v22 }
 0x1e0   : > { %vm2379_vm0 = vmor %vm2163_vm11, %vm2279_vm10  ;;  %vm994_vm10 = vcmp.eq.s32.totalorder %v6024_v26, %v4713_v22 }
 0x1e1   : > { %vm2383_vm3 = vmor %vm2167_vm13, %vm2283_vm12  ;;  %v6039_v44 = vsel %vm2379_vm0, 1.0, %v8056_v27  ;;  %vm1206_vm12 = vcmp.eq.s32.totalorder %v6019_v37, %v4716_v23  ;;  %vm1422_vm0 = vcmp.eq.s32.totalorder %v6019_v37, %v4736_v25 }
 0x1e2   : > { %8081 = vst [vmem:[#allocation40_spill] sm:$0xff] %v6039_v44  ;;  %v6044_v9 = vsel %vm2383_vm3, 1.0, %v8056_v27  ;;  %vm658_vm5 = vmor %vm442_vm14, %vm558_vm15  ;;  %vm1210_vm14 = vcmp.eq.s32.totalorder %v6024_v26, %v4716_v23 }
 0x1e3   : > { %8082 = vst [vmem:[#allocation41_spill] sm:$0xff] %v6044_v9  ;;  %v2659_v56 = vpack.c.bf16 %v6044_v9, %v6039_v44  ;;  %vm662_vm7 = vmor %vm446_vm1, %vm562_vm2  ;;  %vm1426_vm2 = vcmp.eq.s32.totalorder %v6024_v26, %v4736_v25 }
 0x1e4   : > { %vm874_vm9 = vmor %vm658_vm5, %vm774_vm4  ;;  %vm1638_vm4 = vcmp.eq.s32.totalorder %v6019_v37, %v4747_v28 }
 0x1e5   : > { %2963 = vmatpush1.bf16.msra.mxu1 %v2659_v56  ;;  %vm878_vm11 = vmor %vm662_vm7, %vm778_vm6  ;;  %vm1642_vm6 = vcmp.eq.s32.totalorder %v6024_v26, %v4747_v28 }
 0x1e6   : > { %vm1090_vm13 = vmor %vm874_vm9, %vm990_vm8  ;;  %vm1854_vm8 = vcmp.eq.s32.totalorder %v6019_v37, %v4754_v29 }
 0x1e7   : > { %vm1094_vm15 = vmor %vm878_vm11, %vm994_vm10  ;;  %vm1858_vm10 = vcmp.eq.s32.totalorder %v6024_v26, %v4754_v29 }
 0x1e8   : > { %vm1306_vm1 = vmor %vm1090_vm13, %vm1206_vm12  ;;  %vm2070_vm12 = vcmp.eq.s32.totalorder %v6019_v37, %v4761_v30 }
 0x1e9   : > { %vm1310_vm3 = vmor %vm1094_vm15, %vm1210_vm14  ;;  %vm2074_vm14 = vcmp.eq.s32.totalorder %v6024_v26, %v4761_v30 }
 0x1ea   : > { %vm1522_vm5 = vmor %vm1306_vm1, %vm1422_vm0  ;;  %vm2286_vm0 = vcmp.eq.s32.totalorder %v6019_v37, %v4769_v32 }
 0x1eb   : > { %vm1526_vm7 = vmor %vm1310_vm3, %vm1426_vm2  ;;  %vm2290_vm2 = vcmp.eq.s32.totalorder %v6024_v26, %v4769_v32 }
 0x1ec   : > { %vm1738_vm9 = vmor %vm1522_vm5, %vm1638_vm4  ;;  %vm444_vm4 = vcmp.eq.s32.totalorder %v6019_v37, %v4776_v33  ;;  %vm560_vm5 = vcmp.eq.s32.totalorder %v6019_v37, %v4779_v34 }
 0x1ed   : > { %vm1742_vm11 = vmor %vm1526_vm7, %vm1642_vm6  ;;  %vm448_vm7 = vcmp.eq.s32.totalorder %v6024_v26, %v4776_v33 }
 0x1ee   : > { %vm1954_vm13 = vmor %vm1738_vm9, %vm1854_vm8  ;;  %vm564_vm8 = vcmp.eq.s32.totalorder %v6024_v26, %v4779_v34 }
 0x1ef   : > { %vm1958_vm15 = vmor %vm1742_vm11, %vm1858_vm10  ;;  %vm776_vm10 = vcmp.eq.s32.totalorder %v6019_v37, %v4786_v35 }
 0x1f0   : > { %vm2170_vm1 = vmor %vm1954_vm13, %vm2070_vm12  ;;  %vm780_vm12 = vcmp.eq.s32.totalorder %v6024_v26, %v4786_v35 }
 0x1f1   : > { %vm2174_vm3 = vmor %vm1958_vm15, %vm2074_vm14  ;;  %vm992_vm14 = vcmp.eq.s32.totalorder %v6019_v37, %v4795_v36 }
 0x1f2   : > { %vm2386_vm6 = vmor %vm2170_vm1, %vm2286_vm0  ;;  %vm996_vm0 = vcmp.eq.s32.totalorder %v6024_v26, %v4795_v36 }
 0x1f3   : > { %vm2390_vm9 = vmor %vm2174_vm3, %vm2290_vm2  ;;  %v6087_v56 = vsel %vm2386_vm6, 1.0, %v8056_v27  ;;  %vm1208_vm2 = vcmp.eq.s32.totalorder %v6019_v37, %v4807_v39  ;;  %vm1424_vm6 = vcmp.eq.s32.totalorder %v6019_v37, %v4819_v42 }
 0x1f4   : > { %8083 = vst [vmem:[#allocation42_spill] sm:$0xff] %v6087_v56  ;;  %v6092_v9 = vsel %vm2390_vm9, 1.0, %v8056_v27  ;;  %vm660_vm11 = vmor %vm444_vm4, %vm560_vm5  ;;  %vm1212_vm4 = vcmp.eq.s32.totalorder %v6024_v26, %v4807_v39 }
 0x1f5   : > { %8084 = vst [vmem:[#allocation43_spill] sm:$0xff] %v6092_v9  ;;  %v2662_v44 = vpack.c.bf16 %v6092_v9, %v6087_v56  ;;  %vm664_vm13 = vmor %vm448_vm7, %vm564_vm8  ;;  %vm1428_vm8 = vcmp.eq.s32.totalorder %v6024_v26, %v4819_v42  ;;  %v3491_v56 = vld [vmem:[%s7954_s3 + $0x30] sm:$0xff] }
 0x1f6   : > { %vm876_vm15 = vmor %vm660_vm11, %vm776_vm10  ;;  %vm1640_vm10 = vcmp.eq.s32.totalorder %v6019_v37, %v4826_v43  ;;  %3533 = vperm.xlu0 %4467, %v3491_v56   ;;  %v6223_v56 = vadd.s32 112, %v4677_v10 }
 0x1f7   : > { %2841 = vmatprep.subr.bf16.mxu0 %v2662_v44  ;;  %vm880_vm1 = vmor %vm664_vm13, %vm780_vm12  ;;  %vm1644_vm12 = vcmp.eq.s32.totalorder %v6024_v26, %v4826_v43 }
 0x1f8   : > { %vm1092_vm3 = vmor %vm876_vm15, %vm992_vm14  ;;  %vm1856_vm14 = vcmp.eq.s32.totalorder %v6019_v37, %v4834_v45 }
 0x1f9   : > { %vm1096_vm5 = vmor %vm880_vm1, %vm996_vm0  ;;  %vm1860_vm0 = vcmp.eq.s32.totalorder %v6024_v26, %v4834_v45 }
 0x1fa   : > { %vm1308_vm7 = vmor %vm1092_vm3, %vm1208_vm2  ;;  %vm2072_vm2 = vcmp.eq.s32.totalorder %v6019_v37, %v4841_v46 }
 0x1fb   : > { %vm1312_vm9 = vmor %vm1096_vm5, %vm1212_vm4  ;;  %vm2076_vm4 = vcmp.eq.s32.totalorder %v6024_v26, %v4841_v46 }
 0x1fc   : > { %vm1524_vm11 = vmor %vm1308_vm7, %vm1424_vm6  ;;  %vm2288_vm6 = vcmp.eq.s32.totalorder %v6019_v37, %v4849_v48 }
 0x1fd   : > { %vm1528_vm13 = vmor %vm1312_vm9, %vm1428_vm8  ;;  %vm2292_vm8 = vcmp.eq.s32.totalorder %v6024_v26, %v4849_v48 }
 0x1fe   : > { %vm1740_vm15 = vmor %vm1524_vm11, %vm1640_vm10  ;;  %vm441_vm10 = vcmp.eq.s32.totalorder %v6019_v37, %v4856_v49  ;;  %vm557_vm11 = vcmp.eq.s32.totalorder %v6019_v37, %v4859_v50 }
 0x1ff   : > { %vm1744_vm1 = vmor %vm1528_vm13, %vm1644_vm12  ;;  %vm445_vm13 = vcmp.eq.s32.totalorder %v6024_v26, %v4856_v49 }
 0x200   : > { %vm1956_vm3 = vmor %vm1740_vm15, %vm1856_vm14  ;;  %vm561_vm14 = vcmp.eq.s32.totalorder %v6024_v26, %v4859_v50 }
 0x201   : > { %vm1960_vm5 = vmor %vm1744_vm1, %vm1860_vm0  ;;  %vm773_vm0 = vcmp.eq.s32.totalorder %v6019_v37, %v4866_v51 }
 0x202   : > { %vm2172_vm7 = vmor %vm1956_vm3, %vm2072_vm2  ;;  %vm777_vm2 = vcmp.eq.s32.totalorder %v6024_v26, %v4866_v51 }
 0x203   : > { %vm2176_vm9 = vmor %vm1960_vm5, %vm2076_vm4  ;;  %vm989_vm4 = vcmp.eq.s32.totalorder %v6019_v37, %v4875_v52 }
 0x204   : > { %vm2388_vm12 = vmor %vm2172_vm7, %vm2288_vm6  ;;  %vm993_vm6 = vcmp.eq.s32.totalorder %v6024_v26, %v4875_v52 }
 0x205   : > { %vm2392_vm15 = vmor %vm2176_vm9, %vm2292_vm8  ;;  %v6138_v13 = vsel %vm2388_vm12, 1.0, %v8056_v27  ;;  %vm1205_vm8 = vcmp.eq.s32.totalorder %v6019_v37, %v4887_v54  ;;  %vm1421_vm12 = vcmp.eq.s32.totalorder %v6019_v37, %v4899_v57 }
 0x206   : > { %8085 = vst [vmem:[#allocation44_spill] sm:$0xff] %v6138_v13  ;;  %v6143_v44 = vsel %vm2392_vm15, 1.0, %v8056_v27  ;;  %vm657_vm1 = vmor %vm441_vm10, %vm557_vm11  ;;  %vm1209_vm10 = vcmp.eq.s32.totalorder %v6024_v26, %v4887_v54 }
 0x207   : > { %8086 = vst [vmem:[#allocation45_spill] sm:$0xff] %v6143_v44  ;;  %v2664_v9 = vpack.c.bf16 %v6143_v44, %v6138_v13  ;;  %vm661_vm3 = vmor %vm445_vm13, %vm561_vm14  ;;  %vm1425_vm14 = vcmp.eq.s32.totalorder %v6024_v26, %v4899_v57 }
 0x208   : > { %vm873_vm5 = vmor %vm657_vm1, %vm773_vm0  ;;  %vm1637_vm0 = vcmp.eq.s32.totalorder %v6019_v37, %v4906_v58 }
 0x209   : > { %2964 = vmatprep.subr.bf16.mxu1 %v2664_v9  ;;  %vm877_vm7 = vmor %vm661_vm3, %vm777_vm2  ;;  %vm1641_vm2 = vcmp.eq.s32.totalorder %v6024_v26, %v4906_v58 }
 0x20a   : > { %vm1089_vm9 = vmor %vm873_vm5, %vm989_vm4  ;;  %vm1853_vm4 = vcmp.eq.s32.totalorder %v6019_v37, %v4914_v60 }
 0x20b   : > { %vm1093_vm11 = vmor %vm877_vm7, %vm993_vm6  ;;  %vm1857_vm6 = vcmp.eq.s32.totalorder %v6024_v26, %v4914_v60 }
 0x20c   : > { %vm1305_vm13 = vmor %vm1089_vm9, %vm1205_vm8  ;;  %vm2069_vm8 = vcmp.eq.s32.totalorder %v6019_v37, %v4921_v61 }
 0x20d   : > { %vm1309_vm15 = vmor %vm1093_vm11, %vm1209_vm10  ;;  %vm2073_vm10 = vcmp.eq.s32.totalorder %v6024_v26, %v4921_v61 }
 0x20e   : > { %vm1521_vm1 = vmor %vm1305_vm13, %vm1421_vm12  ;;  %vm2285_vm12 = vcmp.eq.s32.totalorder %v6019_v37, %v4929_v63 }
 0x20f   : > { %vm1525_vm3 = vmor %vm1309_vm15, %vm1425_vm14  ;;  %vm2289_vm14 = vcmp.eq.s32.totalorder %v6024_v26, %v4929_v63 }
 0x210   : > { %vm1737_vm5 = vmor %vm1521_vm1, %vm1637_vm0  ;;  %vm443_vm0 = vcmp.eq.s32.totalorder %v6019_v37, %v4936_v0  ;;  %vm559_vm1 = vcmp.eq.s32.totalorder %v6019_v37, %v4939_v1 }
 0x211   : > { %vm1741_vm7 = vmor %vm1525_vm3, %vm1641_vm2  ;;  %vm447_vm3 = vcmp.eq.s32.totalorder %v6024_v26, %v4936_v0 }
 0x212   : > { %vm1953_vm9 = vmor %vm1737_vm5, %vm1853_vm4  ;;  %vm563_vm4 = vcmp.eq.s32.totalorder %v6024_v26, %v4939_v1 }
 0x213   : > { %vm1957_vm11 = vmor %vm1741_vm7, %vm1857_vm6  ;;  %vm775_vm6 = vcmp.eq.s32.totalorder %v6019_v37, %v4946_v2 }
 0x214   : > { %vm2169_vm13 = vmor %vm1953_vm9, %vm2069_vm8  ;;  %vm779_vm8 = vcmp.eq.s32.totalorder %v6024_v26, %v4946_v2 }
 0x215   : > { %vm2173_vm15 = vmor %vm1957_vm11, %vm2073_vm10  ;;  %vm991_vm10 = vcmp.eq.s32.totalorder %v6019_v37, %v4955_v3 }
 0x216   : > { %vm2385_vm2 = vmor %vm2169_vm13, %vm2285_vm12  ;;  %vm995_vm12 = vcmp.eq.s32.totalorder %v6024_v26, %v4955_v3 }
 0x217   : > { %vm2389_vm5 = vmor %vm2173_vm15, %vm2289_vm14  ;;  %v6186_v9 = vsel %vm2385_vm2, 1.0, %v8056_v27  ;;  %vm1207_vm14 = vcmp.eq.s32.totalorder %v6019_v37, %v4967_v5  ;;  %vm1423_vm2 = vcmp.eq.s32.totalorder %v6019_v37, %v4979_v8 }
 0x218   : > { %8087 = vst [vmem:[#allocation46_spill] sm:$0xff] %v6186_v9  ;;  %v6191_v44 = vsel %vm2389_vm5, 1.0, %v8056_v27  ;;  %vm659_vm7 = vmor %vm443_vm0, %vm559_vm1  ;;  %vm1211_vm0 = vcmp.eq.s32.totalorder %v6024_v26, %v4967_v5 }
 0x219   : > { %8088 = vst [vmem:[#allocation47_spill] sm:$0xff] %v6191_v44  ;;  %v2661_v13 = vpack.c.bf16 %v6191_v44, %v6186_v9  ;;  %vm663_vm9 = vmor %vm447_vm3, %vm563_vm4  ;;  %vm1427_vm4 = vcmp.eq.s32.totalorder %v6024_v26, %v4979_v8  ;;  %v3490_v9 = vld [vmem:[%s7954_s3 + $0x28] sm:$0xff] }
 0x21a   : > { %vm875_vm11 = vmor %vm659_vm7, %vm775_vm6  ;;  %vm1639_vm6 = vcmp.eq.s32.totalorder %v6019_v37, %v4986_v11  ;;  %3528 = vperm.xlu1 %4468, %v3490_v9  }
 0x21b   : > { %2842 = vmatpush1.bf16.msra.mxu0 %v2661_v13  ;;  %vm879_vm13 = vmor %vm663_vm9, %vm779_vm8  ;;  %vm1643_vm8 = vcmp.eq.s32.totalorder %v6024_v26, %v4986_v11  ;;  %v6228_v13 = vadd.s32 120, %v4677_v10 }
 0x21c   : > { %vm1091_vm15 = vmor %vm875_vm11, %vm991_vm10  ;;  %vm1855_vm10 = vcmp.eq.s32.totalorder %v6019_v37, %v4994_v16 }
 0x21d   : > { %vm1095_vm1 = vmor %vm879_vm13, %vm995_vm12  ;;  %vm1859_vm12 = vcmp.eq.s32.totalorder %v6024_v26, %v4994_v16 }
 0x21e   : > { %vm1307_vm3 = vmor %vm1091_vm15, %vm1207_vm14  ;;  %vm2071_vm14 = vcmp.eq.s32.totalorder %v6019_v37, %v5001_v17 }
 0x21f   : > { %vm1311_vm5 = vmor %vm1095_vm1, %vm1211_vm0  ;;  %vm2075_vm0 = vcmp.eq.s32.totalorder %v6024_v26, %v5001_v17 }
 0x220   : > { %vm1523_vm7 = vmor %vm1307_vm3, %vm1423_vm2  ;;  %vm2287_vm2 = vcmp.eq.s32.totalorder %v6019_v37, %v5008_v21 }
 0x221   : > { %vm1527_vm9 = vmor %vm1311_vm5, %vm1427_vm4  ;;  %vm2291_vm4 = vcmp.eq.s32.totalorder %v6024_v26, %v5008_v21 }
 0x222   : > { %vm1739_vm11 = vmor %vm1523_vm7, %vm1639_vm6  ;;  %vm450_vm6 = vcmp.eq.s32.totalorder %v6223_v56, %v4701_v18  ;;  %vm566_vm7 = vcmp.eq.s32.totalorder %v6223_v56, %v4704_v19 }
 0x223   : > { %vm1743_vm13 = vmor %vm1527_vm9, %vm1643_vm8  ;;  %vm454_vm9 = vcmp.eq.s32.totalorder %v6228_v13, %v4701_v18 }
 0x224   : > { %vm1955_vm15 = vmor %vm1739_vm11, %vm1855_vm10  ;;  %vm570_vm10 = vcmp.eq.s32.totalorder %v6228_v13, %v4704_v19 }
 0x225   : > { %vm1959_vm1 = vmor %vm1743_vm13, %vm1859_vm12  ;;  %vm782_vm12 = vcmp.eq.s32.totalorder %v6223_v56, %v4707_v20 }
 0x226   : > { %vm2171_vm3 = vmor %vm1955_vm15, %vm2071_vm14  ;;  %vm786_vm14 = vcmp.eq.s32.totalorder %v6228_v13, %v4707_v20 }
 0x227   : > { %vm2175_vm5 = vmor %vm1959_vm1, %vm2075_vm0  ;;  %vm998_vm0 = vcmp.eq.s32.totalorder %v6223_v56, %v4713_v22 }
 0x228   : > { %vm2387_vm8 = vmor %vm2171_vm3, %vm2287_vm2  ;;  %vm1002_vm2 = vcmp.eq.s32.totalorder %v6228_v13, %v4713_v22 }
 0x229   : > { %vm2391_vm11 = vmor %vm2175_vm5, %vm2291_vm4  ;;  %v6243_v37 = vsel %vm2387_vm8, 1.0, %v8056_v27  ;;  %vm1214_vm4 = vcmp.eq.s32.totalorder %v6223_v56, %v4716_v23  ;;  %vm1430_vm8 = vcmp.eq.s32.totalorder %v6223_v56, %v4736_v25 }
 0x22a   : > { %8089 = vst [vmem:[#allocation48_spill] sm:$0xff] %v6243_v37  ;;  %v6248_v26 = vsel %vm2391_vm11, 1.0, %v8056_v27  ;;  %vm666_vm13 = vmor %vm450_vm6, %vm566_vm7  ;;  %vm1218_vm6 = vcmp.eq.s32.totalorder %v6228_v13, %v4716_v23 }
 0x22b   : > { %8090 = vst [vmem:[#allocation49_spill] sm:$0xff] %v6248_v26  ;;  %v2663_v44 = vpack.c.bf16 %v6248_v26, %v6243_v37  ;;  %vm670_vm15 = vmor %vm454_vm9, %vm570_vm10  ;;  %vm1434_vm10 = vcmp.eq.s32.totalorder %v6228_v13, %v4736_v25 }
 0x22c   : > { %vm882_vm1 = vmor %vm666_vm13, %vm782_vm12  ;;  %vm1646_vm12 = vcmp.eq.s32.totalorder %v6223_v56, %v4747_v28 }
 0x22d   : > { %2965 = vmatpush1.bf16.msra.mxu1 %v2663_v44  ;;  %vm886_vm3 = vmor %vm670_vm15, %vm786_vm14  ;;  %vm1650_vm14 = vcmp.eq.s32.totalorder %v6228_v13, %v4747_v28 }
 0x22e   : > { %vm1098_vm5 = vmor %vm882_vm1, %vm998_vm0  ;;  %vm1862_vm0 = vcmp.eq.s32.totalorder %v6223_v56, %v4754_v29 }
 0x22f   : > { %vm1102_vm7 = vmor %vm886_vm3, %vm1002_vm2  ;;  %vm1866_vm2 = vcmp.eq.s32.totalorder %v6228_v13, %v4754_v29 }
 0x230   : > { %vm1314_vm9 = vmor %vm1098_vm5, %vm1214_vm4  ;;  %vm2078_vm4 = vcmp.eq.s32.totalorder %v6223_v56, %v4761_v30 }
 0x231   : > { %vm1318_vm11 = vmor %vm1102_vm7, %vm1218_vm6  ;;  %vm2082_vm6 = vcmp.eq.s32.totalorder %v6228_v13, %v4761_v30 }
 0x232   : > { %vm1530_vm13 = vmor %vm1314_vm9, %vm1430_vm8  ;;  %vm2294_vm8 = vcmp.eq.s32.totalorder %v6223_v56, %v4769_v32 }
 0x233   : > { %vm1534_vm15 = vmor %vm1318_vm11, %vm1434_vm10  ;;  %vm2298_vm10 = vcmp.eq.s32.totalorder %v6228_v13, %v4769_v32 }
 0x234   : > { %vm1746_vm1 = vmor %vm1530_vm13, %vm1646_vm12  ;;  %vm452_vm12 = vcmp.eq.s32.totalorder %v6223_v56, %v4776_v33  ;;  %vm568_vm13 = vcmp.eq.s32.totalorder %v6223_v56, %v4779_v34 }
 0x235   : > { %vm1750_vm3 = vmor %vm1534_vm15, %vm1650_vm14  ;;  %vm456_vm15 = vcmp.eq.s32.totalorder %v6228_v13, %v4776_v33 }
 0x236   : > { %vm1962_vm5 = vmor %vm1746_vm1, %vm1862_vm0  ;;  %vm572_vm0 = vcmp.eq.s32.totalorder %v6228_v13, %v4779_v34 }
 0x237   : > { %vm1966_vm7 = vmor %vm1750_vm3, %vm1866_vm2  ;;  %vm784_vm2 = vcmp.eq.s32.totalorder %v6223_v56, %v4786_v35 }
 0x238   : > { %vm2178_vm9 = vmor %vm1962_vm5, %vm2078_vm4  ;;  %vm788_vm4 = vcmp.eq.s32.totalorder %v6228_v13, %v4786_v35 }
 0x239   : > { %vm2182_vm11 = vmor %vm1966_vm7, %vm2082_vm6  ;;  %vm1000_vm6 = vcmp.eq.s32.totalorder %v6223_v56, %v4795_v36 }
 0x23a   : > { %vm2394_vm14 = vmor %vm2178_vm9, %vm2294_vm8  ;;  %vm1004_vm8 = vcmp.eq.s32.totalorder %v6228_v13, %v4795_v36 }
 0x23b   : > { %vm2398_vm1 = vmor %vm2182_vm11, %vm2298_vm10  ;;  %v6291_v44 = vsel %vm2394_vm14, 1.0, %v8056_v27  ;;  %vm1216_vm10 = vcmp.eq.s32.totalorder %v6223_v56, %v4807_v39  ;;  %vm1432_vm14 = vcmp.eq.s32.totalorder %v6223_v56, %v4819_v42 }
 0x23c   : > { %8091 = vst [vmem:[#allocation50_spill] sm:$0xff] %v6291_v44  ;;  %v6296_v26 = vsel %vm2398_vm1, 1.0, %v8056_v27  ;;  %vm668_vm3 = vmor %vm452_vm12, %vm568_vm13  ;;  %vm1220_vm12 = vcmp.eq.s32.totalorder %v6228_v13, %v4807_v39 }
 0x23d   : > { %8092 = vst [vmem:[#allocation51_spill] sm:$0xff] %v6296_v26  ;;  %v2666_v37 = vpack.c.bf16 %v6296_v26, %v6291_v44  ;;  %vm672_vm5 = vmor %vm456_vm15, %vm572_vm0  ;;  %vm1436_vm0 = vcmp.eq.s32.totalorder %v6228_v13, %v4819_v42  ;;  %v3493_v44 = vld [vmem:[%s7954_s3 + $0x40] sm:$0xff] }
 0x23e   : > { %vm884_vm7 = vmor %vm668_vm3, %vm784_vm2  ;;  %vm1648_vm2 = vcmp.eq.s32.totalorder %v6223_v56, %v4826_v43  ;;  %3543 = vperm.xlu0 %4467, %v3493_v44   ;;  %v6427_v44 = vadd.s32 128, %v4677_v10 }
 0x23f   : > { %2843 = vmatprep.subr.bf16.mxu0 %v2666_v37  ;;  %vm888_vm9 = vmor %vm672_vm5, %vm788_vm4  ;;  %vm1652_vm4 = vcmp.eq.s32.totalorder %v6228_v13, %v4826_v43 }
 0x240   : > { %vm1100_vm11 = vmor %vm884_vm7, %vm1000_vm6  ;;  %vm1864_vm6 = vcmp.eq.s32.totalorder %v6223_v56, %v4834_v45 }
 0x241   : > { %vm1104_vm13 = vmor %vm888_vm9, %vm1004_vm8  ;;  %vm1868_vm8 = vcmp.eq.s32.totalorder %v6228_v13, %v4834_v45 }
 0x242   : > { %vm1316_vm15 = vmor %vm1100_vm11, %vm1216_vm10  ;;  %vm2080_vm10 = vcmp.eq.s32.totalorder %v6223_v56, %v4841_v46 }
 0x243   : > { %vm1320_vm1 = vmor %vm1104_vm13, %vm1220_vm12  ;;  %vm2084_vm12 = vcmp.eq.s32.totalorder %v6228_v13, %v4841_v46 }
 0x244   : > { %vm1532_vm3 = vmor %vm1316_vm15, %vm1432_vm14  ;;  %vm2296_vm14 = vcmp.eq.s32.totalorder %v6223_v56, %v4849_v48 }
 0x245   : > { %vm1536_vm5 = vmor %vm1320_vm1, %vm1436_vm0  ;;  %vm2300_vm0 = vcmp.eq.s32.totalorder %v6228_v13, %v4849_v48 }
 0x246   : > { %vm1748_vm7 = vmor %vm1532_vm3, %vm1648_vm2  ;;  %vm449_vm2 = vcmp.eq.s32.totalorder %v6223_v56, %v4856_v49  ;;  %vm565_vm3 = vcmp.eq.s32.totalorder %v6223_v56, %v4859_v50 }
 0x247   : > { %vm1752_vm9 = vmor %vm1536_vm5, %vm1652_vm4  ;;  %vm453_vm5 = vcmp.eq.s32.totalorder %v6228_v13, %v4856_v49 }
 0x248   : > { %vm1964_vm11 = vmor %vm1748_vm7, %vm1864_vm6  ;;  %vm569_vm6 = vcmp.eq.s32.totalorder %v6228_v13, %v4859_v50 }
 0x249   : > { %vm1968_vm13 = vmor %vm1752_vm9, %vm1868_vm8  ;;  %vm781_vm8 = vcmp.eq.s32.totalorder %v6223_v56, %v4866_v51 }
 0x24a   : > { %vm2180_vm15 = vmor %vm1964_vm11, %vm2080_vm10  ;;  %vm785_vm10 = vcmp.eq.s32.totalorder %v6228_v13, %v4866_v51 }
 0x24b   : > { %vm2184_vm1 = vmor %vm1968_vm13, %vm2084_vm12  ;;  %vm997_vm12 = vcmp.eq.s32.totalorder %v6223_v56, %v4875_v52 }
 0x24c   : > { %vm2396_vm4 = vmor %vm2180_vm15, %vm2296_vm14  ;;  %vm1001_vm14 = vcmp.eq.s32.totalorder %v6228_v13, %v4875_v52 }
 0x24d   : > { %vm2400_vm7 = vmor %vm2184_vm1, %vm2300_vm0  ;;  %v6342_v9 = vsel %vm2396_vm4, 1.0, %v8056_v27  ;;  %vm1213_vm0 = vcmp.eq.s32.totalorder %v6223_v56, %v4887_v54  ;;  %vm1429_vm4 = vcmp.eq.s32.totalorder %v6223_v56, %v4899_v57 }
 0x24e   : > { %8093 = vst [vmem:[#allocation52_spill] sm:$0xff] %v6342_v9  ;;  %v6347_v37 = vsel %vm2400_vm7, 1.0, %v8056_v27  ;;  %vm665_vm9 = vmor %vm449_vm2, %vm565_vm3  ;;  %vm1217_vm2 = vcmp.eq.s32.totalorder %v6228_v13, %v4887_v54 }
 0x24f   : > { %8094 = vst [vmem:[#allocation53_spill] sm:$0xff] %v6347_v37  ;;  %v2668_v26 = vpack.c.bf16 %v6347_v37, %v6342_v9  ;;  %vm669_vm11 = vmor %vm453_vm5, %vm569_vm6  ;;  %vm1433_vm6 = vcmp.eq.s32.totalorder %v6228_v13, %v4899_v57 }
 0x250   : > { %vm881_vm13 = vmor %vm665_vm9, %vm781_vm8  ;;  %vm1645_vm8 = vcmp.eq.s32.totalorder %v6223_v56, %v4906_v58 }
 0x251   : > { %2966 = vmatprep.subr.bf16.mxu1 %v2668_v26  ;;  %vm885_vm15 = vmor %vm669_vm11, %vm785_vm10  ;;  %vm1649_vm10 = vcmp.eq.s32.totalorder %v6228_v13, %v4906_v58 }
 0x252   : > { %vm1097_vm1 = vmor %vm881_vm13, %vm997_vm12  ;;  %vm1861_vm12 = vcmp.eq.s32.totalorder %v6223_v56, %v4914_v60 }
 0x253   : > { %vm1101_vm3 = vmor %vm885_vm15, %vm1001_vm14  ;;  %vm1865_vm14 = vcmp.eq.s32.totalorder %v6228_v13, %v4914_v60 }
 0x254   : > { %vm1313_vm5 = vmor %vm1097_vm1, %vm1213_vm0  ;;  %vm2077_vm0 = vcmp.eq.s32.totalorder %v6223_v56, %v4921_v61 }
 0x255   : > { %vm1317_vm7 = vmor %vm1101_vm3, %vm1217_vm2  ;;  %vm2081_vm2 = vcmp.eq.s32.totalorder %v6228_v13, %v4921_v61 }
 0x256   : > { %vm1529_vm9 = vmor %vm1313_vm5, %vm1429_vm4  ;;  %vm2293_vm4 = vcmp.eq.s32.totalorder %v6223_v56, %v4929_v63 }
 0x257   : > { %vm1533_vm11 = vmor %vm1317_vm7, %vm1433_vm6  ;;  %vm2297_vm6 = vcmp.eq.s32.totalorder %v6228_v13, %v4929_v63 }
 0x258   : > { %vm1745_vm13 = vmor %vm1529_vm9, %vm1645_vm8  ;;  %vm451_vm8 = vcmp.eq.s32.totalorder %v6223_v56, %v4936_v0  ;;  %vm567_vm9 = vcmp.eq.s32.totalorder %v6223_v56, %v4939_v1 }
 0x259   : > { %vm1749_vm15 = vmor %vm1533_vm11, %vm1649_vm10  ;;  %vm455_vm11 = vcmp.eq.s32.totalorder %v6228_v13, %v4936_v0 }
 0x25a   : > { %vm1961_vm1 = vmor %vm1745_vm13, %vm1861_vm12  ;;  %vm571_vm12 = vcmp.eq.s32.totalorder %v6228_v13, %v4939_v1 }
 0x25b   : > { %vm1965_vm3 = vmor %vm1749_vm15, %vm1865_vm14  ;;  %vm783_vm14 = vcmp.eq.s32.totalorder %v6223_v56, %v4946_v2 }
 0x25c   : > { %vm2177_vm5 = vmor %vm1961_vm1, %vm2077_vm0  ;;  %vm787_vm0 = vcmp.eq.s32.totalorder %v6228_v13, %v4946_v2 }
 0x25d   : > { %vm2181_vm7 = vmor %vm1965_vm3, %vm2081_vm2  ;;  %vm999_vm2 = vcmp.eq.s32.totalorder %v6223_v56, %v4955_v3 }
 0x25e   : > { %vm2393_vm10 = vmor %vm2177_vm5, %vm2293_vm4  ;;  %vm1003_vm4 = vcmp.eq.s32.totalorder %v6228_v13, %v4955_v3 }
 0x25f   : > { %vm2397_vm13 = vmor %vm2181_vm7, %vm2297_vm6  ;;  %v6390_v26 = vsel %vm2393_vm10, 1.0, %v8056_v27  ;;  %vm1215_vm6 = vcmp.eq.s32.totalorder %v6223_v56, %v4967_v5  ;;  %vm1431_vm10 = vcmp.eq.s32.totalorder %v6223_v56, %v4979_v8 }
 0x260   : > { %8095 = vst [vmem:[#allocation54_spill] sm:$0xff] %v6390_v26  ;;  %v6395_v37 = vsel %vm2397_vm13, 1.0, %v8056_v27  ;;  %vm667_vm15 = vmor %vm451_vm8, %vm567_vm9  ;;  %vm1219_vm8 = vcmp.eq.s32.totalorder %v6228_v13, %v4967_v5 }
 0x261   : > { %8096 = vst [vmem:[#allocation55_spill] sm:$0xff] %v6395_v37  ;;  %v2665_v9 = vpack.c.bf16 %v6395_v37, %v6390_v26  ;;  %vm671_vm1 = vmor %vm455_vm11, %vm571_vm12  ;;  %vm1435_vm12 = vcmp.eq.s32.totalorder %v6228_v13, %v4979_v8  ;;  %v3492_v26 = vld [vmem:[%s7954_s3 + $0x38] sm:$0xff] }
 0x262   : > { %vm883_vm3 = vmor %vm667_vm15, %vm783_vm14  ;;  %vm1647_vm14 = vcmp.eq.s32.totalorder %v6223_v56, %v4986_v11  ;;  %3538 = vperm.xlu1 %4468, %v3492_v26  }
 0x263   : > { %2844 = vmatpush1.bf16.msra.mxu0 %v2665_v9  ;;  %vm887_vm5 = vmor %vm671_vm1, %vm787_vm0  ;;  %vm1651_vm0 = vcmp.eq.s32.totalorder %v6228_v13, %v4986_v11  ;;  %v6432_v9 = vadd.s32 136, %v4677_v10 }
 0x264   : > { %vm1099_vm7 = vmor %vm883_vm3, %vm999_vm2  ;;  %vm1863_vm2 = vcmp.eq.s32.totalorder %v6223_v56, %v4994_v16 }
 0x265   : > { %vm1103_vm9 = vmor %vm887_vm5, %vm1003_vm4  ;;  %vm1867_vm4 = vcmp.eq.s32.totalorder %v6228_v13, %v4994_v16 }
 0x266   : > { %vm1315_vm11 = vmor %vm1099_vm7, %vm1215_vm6  ;;  %vm2079_vm6 = vcmp.eq.s32.totalorder %v6223_v56, %v5001_v17 }
 0x267   : > { %vm1319_vm13 = vmor %vm1103_vm9, %vm1219_vm8  ;;  %vm2083_vm8 = vcmp.eq.s32.totalorder %v6228_v13, %v5001_v17 }
 0x268   : > { %vm1531_vm15 = vmor %vm1315_vm11, %vm1431_vm10  ;;  %vm2295_vm10 = vcmp.eq.s32.totalorder %v6223_v56, %v5008_v21 }
 0x269   : > { %vm1535_vm1 = vmor %vm1319_vm13, %vm1435_vm12  ;;  %vm2299_vm12 = vcmp.eq.s32.totalorder %v6228_v13, %v5008_v21 }
 0x26a   : > { %vm1747_vm3 = vmor %vm1531_vm15, %vm1647_vm14  ;;  %vm458_vm14 = vcmp.eq.s32.totalorder %v6427_v44, %v4701_v18  ;;  %vm574_vm15 = vcmp.eq.s32.totalorder %v6427_v44, %v4704_v19 }
 0x26b   : > { %vm1751_vm5 = vmor %vm1535_vm1, %vm1651_vm0  ;;  %vm462_vm1 = vcmp.eq.s32.totalorder %v6432_v9, %v4701_v18 }
 0x26c   : > { %vm1963_vm7 = vmor %vm1747_vm3, %vm1863_vm2  ;;  %vm578_vm2 = vcmp.eq.s32.totalorder %v6432_v9, %v4704_v19 }
 0x26d   : > { %vm1967_vm9 = vmor %vm1751_vm5, %vm1867_vm4  ;;  %vm790_vm4 = vcmp.eq.s32.totalorder %v6427_v44, %v4707_v20 }
 0x26e   : > { %vm2179_vm11 = vmor %vm1963_vm7, %vm2079_vm6  ;;  %vm794_vm6 = vcmp.eq.s32.totalorder %v6432_v9, %v4707_v20 }
 0x26f   : > { %vm2183_vm13 = vmor %vm1967_vm9, %vm2083_vm8  ;;  %vm1006_vm8 = vcmp.eq.s32.totalorder %v6427_v44, %v4713_v22 }
 0x270   : > { %vm2395_vm0 = vmor %vm2179_vm11, %vm2295_vm10  ;;  %vm1010_vm10 = vcmp.eq.s32.totalorder %v6432_v9, %v4713_v22 }
 0x271   : > { %vm2399_vm3 = vmor %vm2183_vm13, %vm2299_vm12  ;;  %v6447_v56 = vsel %vm2395_vm0, 1.0, %v8056_v27  ;;  %vm1222_vm12 = vcmp.eq.s32.totalorder %v6427_v44, %v4716_v23  ;;  %vm1438_vm0 = vcmp.eq.s32.totalorder %v6427_v44, %v4736_v25 }
 0x272   : > { %8097 = vst [vmem:[#allocation56_spill] sm:$0xff] %v6447_v56  ;;  %v6452_v13 = vsel %vm2399_vm3, 1.0, %v8056_v27  ;;  %vm674_vm5 = vmor %vm458_vm14, %vm574_vm15  ;;  %vm1226_vm14 = vcmp.eq.s32.totalorder %v6432_v9, %v4716_v23 }
 0x273   : > { %8098 = vst [vmem:[#allocation57_spill] sm:$0xff] %v6452_v13  ;;  %v2667_v37 = vpack.c.bf16 %v6452_v13, %v6447_v56  ;;  %vm678_vm7 = vmor %vm462_vm1, %vm578_vm2  ;;  %vm1442_vm2 = vcmp.eq.s32.totalorder %v6432_v9, %v4736_v25 }
 0x274   : > { %vm890_vm9 = vmor %vm674_vm5, %vm790_vm4  ;;  %vm1654_vm4 = vcmp.eq.s32.totalorder %v6427_v44, %v4747_v28 }
 0x275   : > { %2967 = vmatpush1.bf16.msra.mxu1 %v2667_v37  ;;  %vm894_vm11 = vmor %vm678_vm7, %vm794_vm6  ;;  %vm1658_vm6 = vcmp.eq.s32.totalorder %v6432_v9, %v4747_v28 }
 0x276   : > { %vm1106_vm13 = vmor %vm890_vm9, %vm1006_vm8  ;;  %vm1870_vm8 = vcmp.eq.s32.totalorder %v6427_v44, %v4754_v29 }
 0x277   : > { %vm1110_vm15 = vmor %vm894_vm11, %vm1010_vm10  ;;  %vm1874_vm10 = vcmp.eq.s32.totalorder %v6432_v9, %v4754_v29 }
 0x278   : > { %vm1322_vm1 = vmor %vm1106_vm13, %vm1222_vm12  ;;  %vm2086_vm12 = vcmp.eq.s32.totalorder %v6427_v44, %v4761_v30 }
 0x279   : > { %vm1326_vm3 = vmor %vm1110_vm15, %vm1226_vm14  ;;  %vm2090_vm14 = vcmp.eq.s32.totalorder %v6432_v9, %v4761_v30 }
 0x27a   : > { %vm1538_vm5 = vmor %vm1322_vm1, %vm1438_vm0  ;;  %vm2302_vm0 = vcmp.eq.s32.totalorder %v6427_v44, %v4769_v32 }
 0x27b   : > { %vm1542_vm7 = vmor %vm1326_vm3, %vm1442_vm2  ;;  %vm2306_vm2 = vcmp.eq.s32.totalorder %v6432_v9, %v4769_v32 }
 0x27c   : > { %vm1754_vm9 = vmor %vm1538_vm5, %vm1654_vm4  ;;  %vm460_vm4 = vcmp.eq.s32.totalorder %v6427_v44, %v4776_v33  ;;  %vm576_vm5 = vcmp.eq.s32.totalorder %v6427_v44, %v4779_v34 }
 0x27d   : > { %vm1758_vm11 = vmor %vm1542_vm7, %vm1658_vm6  ;;  %vm464_vm7 = vcmp.eq.s32.totalorder %v6432_v9, %v4776_v33 }
 0x27e   : > { %vm1970_vm13 = vmor %vm1754_vm9, %vm1870_vm8  ;;  %vm580_vm8 = vcmp.eq.s32.totalorder %v6432_v9, %v4779_v34 }
 0x27f   : > { %vm1974_vm15 = vmor %vm1758_vm11, %vm1874_vm10  ;;  %vm792_vm10 = vcmp.eq.s32.totalorder %v6427_v44, %v4786_v35 }
 0x280   : > { %vm2186_vm1 = vmor %vm1970_vm13, %vm2086_vm12  ;;  %vm796_vm12 = vcmp.eq.s32.totalorder %v6432_v9, %v4786_v35 }
 0x281   : > { %vm2190_vm3 = vmor %vm1974_vm15, %vm2090_vm14  ;;  %vm1008_vm14 = vcmp.eq.s32.totalorder %v6427_v44, %v4795_v36 }
 0x282   : > { %vm2402_vm6 = vmor %vm2186_vm1, %vm2302_vm0  ;;  %vm1012_vm0 = vcmp.eq.s32.totalorder %v6432_v9, %v4795_v36 }
 0x283   : > { %vm2406_vm9 = vmor %vm2190_vm3, %vm2306_vm2  ;;  %v6495_v37 = vsel %vm2402_vm6, 1.0, %v8056_v27  ;;  %vm1224_vm2 = vcmp.eq.s32.totalorder %v6427_v44, %v4807_v39  ;;  %vm1440_vm6 = vcmp.eq.s32.totalorder %v6427_v44, %v4819_v42 }
 0x284   : > { %8099 = vst [vmem:[#allocation58_spill] sm:$0xff] %v6495_v37  ;;  %v6500_v13 = vsel %vm2406_vm9, 1.0, %v8056_v27  ;;  %vm676_vm11 = vmor %vm460_vm4, %vm576_vm5  ;;  %vm1228_vm4 = vcmp.eq.s32.totalorder %v6432_v9, %v4807_v39 }
 0x285   : > { %8100 = vst [vmem:[#allocation59_spill] sm:$0xff] %v6500_v13  ;;  %v2670_v56 = vpack.c.bf16 %v6500_v13, %v6495_v37  ;;  %vm680_vm13 = vmor %vm464_vm7, %vm580_vm8  ;;  %vm1444_vm8 = vcmp.eq.s32.totalorder %v6432_v9, %v4819_v42  ;;  %v3495_v37 = vld [vmem:[%s7954_s3 + $0x50] sm:$0xff] }
 0x286   : > { %vm892_vm15 = vmor %vm676_vm11, %vm792_vm10  ;;  %vm1656_vm10 = vcmp.eq.s32.totalorder %v6427_v44, %v4826_v43  ;;  %3553 = vperm.xlu0 %4467, %v3495_v37   ;;  %v6631_v37 = vadd.s32 144, %v4677_v10 }
 0x287   : > { %2845 = vmatprep.subr.bf16.mxu0 %v2670_v56  ;;  %vm896_vm1 = vmor %vm680_vm13, %vm796_vm12  ;;  %vm1660_vm12 = vcmp.eq.s32.totalorder %v6432_v9, %v4826_v43 }
 0x288   : > { %vm1108_vm3 = vmor %vm892_vm15, %vm1008_vm14  ;;  %vm1872_vm14 = vcmp.eq.s32.totalorder %v6427_v44, %v4834_v45 }
 0x289   : > { %vm1112_vm5 = vmor %vm896_vm1, %vm1012_vm0  ;;  %vm1876_vm0 = vcmp.eq.s32.totalorder %v6432_v9, %v4834_v45 }
 0x28a   : > { %vm1324_vm7 = vmor %vm1108_vm3, %vm1224_vm2  ;;  %vm2088_vm2 = vcmp.eq.s32.totalorder %v6427_v44, %v4841_v46 }
 0x28b   : > { %vm1328_vm9 = vmor %vm1112_vm5, %vm1228_vm4  ;;  %vm2092_vm4 = vcmp.eq.s32.totalorder %v6432_v9, %v4841_v46 }
 0x28c   : > { %vm1540_vm11 = vmor %vm1324_vm7, %vm1440_vm6  ;;  %vm2304_vm6 = vcmp.eq.s32.totalorder %v6427_v44, %v4849_v48 }
 0x28d   : > { %vm1544_vm13 = vmor %vm1328_vm9, %vm1444_vm8  ;;  %vm2308_vm8 = vcmp.eq.s32.totalorder %v6432_v9, %v4849_v48 }
 0x28e   : > { %vm1756_vm15 = vmor %vm1540_vm11, %vm1656_vm10  ;;  %vm457_vm10 = vcmp.eq.s32.totalorder %v6427_v44, %v4856_v49  ;;  %vm573_vm11 = vcmp.eq.s32.totalorder %v6427_v44, %v4859_v50 }
 0x28f   : > { %vm1760_vm1 = vmor %vm1544_vm13, %vm1660_vm12  ;;  %vm461_vm13 = vcmp.eq.s32.totalorder %v6432_v9, %v4856_v49 }
 0x290   : > { %vm1972_vm3 = vmor %vm1756_vm15, %vm1872_vm14  ;;  %vm577_vm14 = vcmp.eq.s32.totalorder %v6432_v9, %v4859_v50 }
 0x291   : > { %vm1976_vm5 = vmor %vm1760_vm1, %vm1876_vm0  ;;  %vm789_vm0 = vcmp.eq.s32.totalorder %v6427_v44, %v4866_v51 }
 0x292   : > { %vm2188_vm7 = vmor %vm1972_vm3, %vm2088_vm2  ;;  %vm793_vm2 = vcmp.eq.s32.totalorder %v6432_v9, %v4866_v51 }
 0x293   : > { %vm2192_vm9 = vmor %vm1976_vm5, %vm2092_vm4  ;;  %vm1005_vm4 = vcmp.eq.s32.totalorder %v6427_v44, %v4875_v52 }
 0x294   : > { %vm2404_vm12 = vmor %vm2188_vm7, %vm2304_vm6  ;;  %vm1009_vm6 = vcmp.eq.s32.totalorder %v6432_v9, %v4875_v52 }
 0x295   : > { %vm2408_vm15 = vmor %vm2192_vm9, %vm2308_vm8  ;;  %v6546_v26 = vsel %vm2404_vm12, 1.0, %v8056_v27  ;;  %vm1221_vm8 = vcmp.eq.s32.totalorder %v6427_v44, %v4887_v54  ;;  %vm1437_vm12 = vcmp.eq.s32.totalorder %v6427_v44, %v4899_v57 }
 0x296   : > { %8101 = vst [vmem:[#allocation60_spill] sm:$0xff] %v6546_v26  ;;  %v6551_v56 = vsel %vm2408_vm15, 1.0, %v8056_v27  ;;  %vm673_vm1 = vmor %vm457_vm10, %vm573_vm11  ;;  %vm1225_vm10 = vcmp.eq.s32.totalorder %v6432_v9, %v4887_v54 }
 0x297   : > { %8102 = vst [vmem:[#allocation61_spill] sm:$0xff] %v6551_v56  ;;  %v2672_v13 = vpack.c.bf16 %v6551_v56, %v6546_v26  ;;  %vm677_vm3 = vmor %vm461_vm13, %vm577_vm14  ;;  %vm1441_vm14 = vcmp.eq.s32.totalorder %v6432_v9, %v4899_v57 }
 0x298   : > { %vm889_vm5 = vmor %vm673_vm1, %vm789_vm0  ;;  %vm1653_vm0 = vcmp.eq.s32.totalorder %v6427_v44, %v4906_v58 }
 0x299   : > { %2968 = vmatprep.subr.bf16.mxu1 %v2672_v13  ;;  %vm893_vm7 = vmor %vm677_vm3, %vm793_vm2  ;;  %vm1657_vm2 = vcmp.eq.s32.totalorder %v6432_v9, %v4906_v58 }
 0x29a   : > { %vm1105_vm9 = vmor %vm889_vm5, %vm1005_vm4  ;;  %vm1869_vm4 = vcmp.eq.s32.totalorder %v6427_v44, %v4914_v60 }
 0x29b   : > { %vm1109_vm11 = vmor %vm893_vm7, %vm1009_vm6  ;;  %vm1873_vm6 = vcmp.eq.s32.totalorder %v6432_v9, %v4914_v60 }
 0x29c   : > { %vm1321_vm13 = vmor %vm1105_vm9, %vm1221_vm8  ;;  %vm2085_vm8 = vcmp.eq.s32.totalorder %v6427_v44, %v4921_v61 }
 0x29d   : > { %vm1325_vm15 = vmor %vm1109_vm11, %vm1225_vm10  ;;  %vm2089_vm10 = vcmp.eq.s32.totalorder %v6432_v9, %v4921_v61 }
 0x29e   : > { %vm1537_vm1 = vmor %vm1321_vm13, %vm1437_vm12  ;;  %vm2301_vm12 = vcmp.eq.s32.totalorder %v6427_v44, %v4929_v63 }
 0x29f   : > { %vm1541_vm3 = vmor %vm1325_vm15, %vm1441_vm14  ;;  %vm2305_vm14 = vcmp.eq.s32.totalorder %v6432_v9, %v4929_v63 }
 0x2a0   : > { %vm1753_vm5 = vmor %vm1537_vm1, %vm1653_vm0  ;;  %vm459_vm0 = vcmp.eq.s32.totalorder %v6427_v44, %v4936_v0  ;;  %vm575_vm1 = vcmp.eq.s32.totalorder %v6427_v44, %v4939_v1 }
 0x2a1   : > { %vm1757_vm7 = vmor %vm1541_vm3, %vm1657_vm2  ;;  %vm463_vm3 = vcmp.eq.s32.totalorder %v6432_v9, %v4936_v0 }
 0x2a2   : > { %vm1969_vm9 = vmor %vm1753_vm5, %vm1869_vm4  ;;  %vm579_vm4 = vcmp.eq.s32.totalorder %v6432_v9, %v4939_v1 }
 0x2a3   : > { %vm1973_vm11 = vmor %vm1757_vm7, %vm1873_vm6  ;;  %vm791_vm6 = vcmp.eq.s32.totalorder %v6427_v44, %v4946_v2 }
 0x2a4   : > { %vm2185_vm13 = vmor %vm1969_vm9, %vm2085_vm8  ;;  %vm795_vm8 = vcmp.eq.s32.totalorder %v6432_v9, %v4946_v2 }
 0x2a5   : > { %vm2189_vm15 = vmor %vm1973_vm11, %vm2089_vm10  ;;  %vm1007_vm10 = vcmp.eq.s32.totalorder %v6427_v44, %v4955_v3 }
 0x2a6   : > { %vm2401_vm2 = vmor %vm2185_vm13, %vm2301_vm12  ;;  %vm1011_vm12 = vcmp.eq.s32.totalorder %v6432_v9, %v4955_v3 }
 0x2a7   : > { %vm2405_vm5 = vmor %vm2189_vm15, %vm2305_vm14  ;;  %v6594_v13 = vsel %vm2401_vm2, 1.0, %v8056_v27  ;;  %vm1223_vm14 = vcmp.eq.s32.totalorder %v6427_v44, %v4967_v5  ;;  %vm1439_vm2 = vcmp.eq.s32.totalorder %v6427_v44, %v4979_v8 }
 0x2a8   : > { %8103 = vst [vmem:[#allocation62_spill] sm:$0xff] %v6594_v13  ;;  %v6599_v56 = vsel %vm2405_vm5, 1.0, %v8056_v27  ;;  %vm675_vm7 = vmor %vm459_vm0, %vm575_vm1  ;;  %vm1227_vm0 = vcmp.eq.s32.totalorder %v6432_v9, %v4967_v5 }
 0x2a9   : > { %8104 = vst [vmem:[#allocation63_spill] sm:$0xff] %v6599_v56  ;;  %v2669_v26 = vpack.c.bf16 %v6599_v56, %v6594_v13  ;;  %vm679_vm9 = vmor %vm463_vm3, %vm579_vm4  ;;  %vm1443_vm4 = vcmp.eq.s32.totalorder %v6432_v9, %v4979_v8  ;;  %v3494_v13 = vld [vmem:[%s7954_s3 + $0x48] sm:$0xff] }
 0x2aa   : > { %vm891_vm11 = vmor %vm675_vm7, %vm791_vm6  ;;  %vm1655_vm6 = vcmp.eq.s32.totalorder %v6427_v44, %v4986_v11  ;;  %3548 = vperm.xlu1 %4468, %v3494_v13  }
 0x2ab   : > { %2846 = vmatpush1.bf16.msra.mxu0 %v2669_v26  ;;  %vm895_vm13 = vmor %vm679_vm9, %vm795_vm8  ;;  %vm1659_vm8 = vcmp.eq.s32.totalorder %v6432_v9, %v4986_v11  ;;  %v6636_v26 = vadd.s32 152, %v4677_v10 }
 0x2ac   : > { %vm1107_vm15 = vmor %vm891_vm11, %vm1007_vm10  ;;  %vm1871_vm10 = vcmp.eq.s32.totalorder %v6427_v44, %v4994_v16 }
 0x2ad   : > { %vm1111_vm1 = vmor %vm895_vm13, %vm1011_vm12  ;;  %vm1875_vm12 = vcmp.eq.s32.totalorder %v6432_v9, %v4994_v16 }
 0x2ae   : > { %vm1323_vm3 = vmor %vm1107_vm15, %vm1223_vm14  ;;  %vm2087_vm14 = vcmp.eq.s32.totalorder %v6427_v44, %v5001_v17 }
 0x2af   : > { %vm1327_vm5 = vmor %vm1111_vm1, %vm1227_vm0  ;;  %vm2091_vm0 = vcmp.eq.s32.totalorder %v6432_v9, %v5001_v17 }
 0x2b0   : > { %vm1539_vm7 = vmor %vm1323_vm3, %vm1439_vm2  ;;  %vm2303_vm2 = vcmp.eq.s32.totalorder %v6427_v44, %v5008_v21 }
 0x2b1   : > { %vm1543_vm9 = vmor %vm1327_vm5, %vm1443_vm4  ;;  %vm2307_vm4 = vcmp.eq.s32.totalorder %v6432_v9, %v5008_v21 }
 0x2b2   : > { %vm1755_vm11 = vmor %vm1539_vm7, %vm1655_vm6  ;;  %vm466_vm6 = vcmp.eq.s32.totalorder %v6631_v37, %v4701_v18  ;;  %vm582_vm7 = vcmp.eq.s32.totalorder %v6631_v37, %v4704_v19 }
 0x2b3   : > { %vm1759_vm13 = vmor %vm1543_vm9, %vm1659_vm8  ;;  %vm470_vm9 = vcmp.eq.s32.totalorder %v6636_v26, %v4701_v18 }
 0x2b4   : > { %vm1971_vm15 = vmor %vm1755_vm11, %vm1871_vm10  ;;  %vm586_vm10 = vcmp.eq.s32.totalorder %v6636_v26, %v4704_v19 }
 0x2b5   : > { %vm1975_vm1 = vmor %vm1759_vm13, %vm1875_vm12  ;;  %vm798_vm12 = vcmp.eq.s32.totalorder %v6631_v37, %v4707_v20 }
 0x2b6   : > { %vm2187_vm3 = vmor %vm1971_vm15, %vm2087_vm14  ;;  %vm802_vm14 = vcmp.eq.s32.totalorder %v6636_v26, %v4707_v20 }
 0x2b7   : > { %vm2191_vm5 = vmor %vm1975_vm1, %vm2091_vm0  ;;  %vm1014_vm0 = vcmp.eq.s32.totalorder %v6631_v37, %v4713_v22 }
 0x2b8   : > { %vm2403_vm8 = vmor %vm2187_vm3, %vm2303_vm2  ;;  %vm1018_vm2 = vcmp.eq.s32.totalorder %v6636_v26, %v4713_v22 }
 0x2b9   : > { %vm2407_vm11 = vmor %vm2191_vm5, %vm2307_vm4  ;;  %v6651_v44 = vsel %vm2403_vm8, 1.0, %v8056_v27  ;;  %vm1230_vm4 = vcmp.eq.s32.totalorder %v6631_v37, %v4716_v23  ;;  %vm1446_vm8 = vcmp.eq.s32.totalorder %v6631_v37, %v4736_v25 }
 0x2ba   : > { %8105 = vst [vmem:[#allocation64_spill] sm:$0xff] %v6651_v44  ;;  %v6656_v9 = vsel %vm2407_vm11, 1.0, %v8056_v27  ;;  %vm682_vm13 = vmor %vm466_vm6, %vm582_vm7  ;;  %vm1234_vm6 = vcmp.eq.s32.totalorder %v6636_v26, %v4716_v23 }
 0x2bb   : > { %8106 = vst [vmem:[#allocation65_spill] sm:$0xff] %v6656_v9  ;;  %v2671_v56 = vpack.c.bf16 %v6656_v9, %v6651_v44  ;;  %vm686_vm15 = vmor %vm470_vm9, %vm586_vm10  ;;  %vm1450_vm10 = vcmp.eq.s32.totalorder %v6636_v26, %v4736_v25 }
 0x2bc   : > { %vm898_vm1 = vmor %vm682_vm13, %vm798_vm12  ;;  %vm1662_vm12 = vcmp.eq.s32.totalorder %v6631_v37, %v4747_v28 }
 0x2bd   : > { %2969 = vmatpush1.bf16.msra.mxu1 %v2671_v56  ;;  %vm902_vm3 = vmor %vm686_vm15, %vm802_vm14  ;;  %vm1666_vm14 = vcmp.eq.s32.totalorder %v6636_v26, %v4747_v28 }
 0x2be   : > { %vm1114_vm5 = vmor %vm898_vm1, %vm1014_vm0  ;;  %vm1878_vm0 = vcmp.eq.s32.totalorder %v6631_v37, %v4754_v29 }
 0x2bf   : > { %vm1118_vm7 = vmor %vm902_vm3, %vm1018_vm2  ;;  %vm1882_vm2 = vcmp.eq.s32.totalorder %v6636_v26, %v4754_v29 }
 0x2c0   : > { %vm1330_vm9 = vmor %vm1114_vm5, %vm1230_vm4  ;;  %vm2094_vm4 = vcmp.eq.s32.totalorder %v6631_v37, %v4761_v30 }
 0x2c1   : > { %vm1334_vm11 = vmor %vm1118_vm7, %vm1234_vm6  ;;  %vm2098_vm6 = vcmp.eq.s32.totalorder %v6636_v26, %v4761_v30 }
 0x2c2   : > { %vm1546_vm13 = vmor %vm1330_vm9, %vm1446_vm8  ;;  %vm2310_vm8 = vcmp.eq.s32.totalorder %v6631_v37, %v4769_v32 }
 0x2c3   : > { %vm1550_vm15 = vmor %vm1334_vm11, %vm1450_vm10  ;;  %vm2314_vm10 = vcmp.eq.s32.totalorder %v6636_v26, %v4769_v32 }
 0x2c4   : > { %vm1762_vm1 = vmor %vm1546_vm13, %vm1662_vm12  ;;  %vm468_vm12 = vcmp.eq.s32.totalorder %v6631_v37, %v4776_v33  ;;  %vm584_vm13 = vcmp.eq.s32.totalorder %v6631_v37, %v4779_v34 }
 0x2c5   : > { %vm1766_vm3 = vmor %vm1550_vm15, %vm1666_vm14  ;;  %vm472_vm15 = vcmp.eq.s32.totalorder %v6636_v26, %v4776_v33 }
 0x2c6   : > { %vm1978_vm5 = vmor %vm1762_vm1, %vm1878_vm0  ;;  %vm588_vm0 = vcmp.eq.s32.totalorder %v6636_v26, %v4779_v34 }
 0x2c7   : > { %vm1982_vm7 = vmor %vm1766_vm3, %vm1882_vm2  ;;  %vm800_vm2 = vcmp.eq.s32.totalorder %v6631_v37, %v4786_v35 }
 0x2c8   : > { %vm2194_vm9 = vmor %vm1978_vm5, %vm2094_vm4  ;;  %vm804_vm4 = vcmp.eq.s32.totalorder %v6636_v26, %v4786_v35 }
 0x2c9   : > { %vm2198_vm11 = vmor %vm1982_vm7, %vm2098_vm6  ;;  %vm1016_vm6 = vcmp.eq.s32.totalorder %v6631_v37, %v4795_v36 }
 0x2ca   : > { %vm2410_vm14 = vmor %vm2194_vm9, %vm2310_vm8  ;;  %vm1020_vm8 = vcmp.eq.s32.totalorder %v6636_v26, %v4795_v36 }
 0x2cb   : > { %vm2414_vm1 = vmor %vm2198_vm11, %vm2314_vm10  ;;  %v6699_v56 = vsel %vm2410_vm14, 1.0, %v8056_v27  ;;  %vm1232_vm10 = vcmp.eq.s32.totalorder %v6631_v37, %v4807_v39  ;;  %vm1448_vm14 = vcmp.eq.s32.totalorder %v6631_v37, %v4819_v42 }
 0x2cc   : > { %8107 = vst [vmem:[#allocation66_spill] sm:$0xff] %v6699_v56  ;;  %v6704_v9 = vsel %vm2414_vm1, 1.0, %v8056_v27  ;;  %vm684_vm3 = vmor %vm468_vm12, %vm584_vm13  ;;  %vm1236_vm12 = vcmp.eq.s32.totalorder %v6636_v26, %v4807_v39 }
 0x2cd   : > { %8108 = vst [vmem:[#allocation67_spill] sm:$0xff] %v6704_v9  ;;  %v2674_v44 = vpack.c.bf16 %v6704_v9, %v6699_v56  ;;  %vm688_vm5 = vmor %vm472_vm15, %vm588_vm0  ;;  %vm1452_vm0 = vcmp.eq.s32.totalorder %v6636_v26, %v4819_v42  ;;  %v3497_v56 = vld [vmem:[%s7954_s3 + $0x60] sm:$0xff] }
 0x2ce   : > { %vm900_vm7 = vmor %vm684_vm3, %vm800_vm2  ;;  %vm1664_vm2 = vcmp.eq.s32.totalorder %v6631_v37, %v4826_v43  ;;  %3563 = vperm.xlu0 %4467, %v3497_v56   ;;  %v6835_v56 = vadd.s32 160, %v4677_v10 }
 0x2cf   : > { %2847 = vmatprep.subr.bf16.mxu0 %v2674_v44  ;;  %vm904_vm9 = vmor %vm688_vm5, %vm804_vm4  ;;  %vm1668_vm4 = vcmp.eq.s32.totalorder %v6636_v26, %v4826_v43 }
 0x2d0   : > { %vm1116_vm11 = vmor %vm900_vm7, %vm1016_vm6  ;;  %vm1880_vm6 = vcmp.eq.s32.totalorder %v6631_v37, %v4834_v45 }
 0x2d1   : > { %vm1120_vm13 = vmor %vm904_vm9, %vm1020_vm8  ;;  %vm1884_vm8 = vcmp.eq.s32.totalorder %v6636_v26, %v4834_v45 }
 0x2d2   : > { %vm1332_vm15 = vmor %vm1116_vm11, %vm1232_vm10  ;;  %vm2096_vm10 = vcmp.eq.s32.totalorder %v6631_v37, %v4841_v46 }
 0x2d3   : > { %vm1336_vm1 = vmor %vm1120_vm13, %vm1236_vm12  ;;  %vm2100_vm12 = vcmp.eq.s32.totalorder %v6636_v26, %v4841_v46 }
 0x2d4   : > { %vm1548_vm3 = vmor %vm1332_vm15, %vm1448_vm14  ;;  %vm2312_vm14 = vcmp.eq.s32.totalorder %v6631_v37, %v4849_v48 }
 0x2d5   : > { %vm1552_vm5 = vmor %vm1336_vm1, %vm1452_vm0  ;;  %vm2316_vm0 = vcmp.eq.s32.totalorder %v6636_v26, %v4849_v48 }
 0x2d6   : > { %vm1764_vm7 = vmor %vm1548_vm3, %vm1664_vm2  ;;  %vm465_vm2 = vcmp.eq.s32.totalorder %v6631_v37, %v4856_v49  ;;  %vm581_vm3 = vcmp.eq.s32.totalorder %v6631_v37, %v4859_v50 }
 0x2d7   : > { %vm1768_vm9 = vmor %vm1552_vm5, %vm1668_vm4  ;;  %vm469_vm5 = vcmp.eq.s32.totalorder %v6636_v26, %v4856_v49 }
 0x2d8   : > { %vm1980_vm11 = vmor %vm1764_vm7, %vm1880_vm6  ;;  %vm585_vm6 = vcmp.eq.s32.totalorder %v6636_v26, %v4859_v50 }
 0x2d9   : > { %vm1984_vm13 = vmor %vm1768_vm9, %vm1884_vm8  ;;  %vm797_vm8 = vcmp.eq.s32.totalorder %v6631_v37, %v4866_v51 }
 0x2da   : > { %vm2196_vm15 = vmor %vm1980_vm11, %vm2096_vm10  ;;  %vm801_vm10 = vcmp.eq.s32.totalorder %v6636_v26, %v4866_v51 }
 0x2db   : > { %vm2200_vm1 = vmor %vm1984_vm13, %vm2100_vm12  ;;  %vm1013_vm12 = vcmp.eq.s32.totalorder %v6631_v37, %v4875_v52 }
 0x2dc   : > { %vm2412_vm4 = vmor %vm2196_vm15, %vm2312_vm14  ;;  %vm1017_vm14 = vcmp.eq.s32.totalorder %v6636_v26, %v4875_v52 }
 0x2dd   : > { %vm2416_vm7 = vmor %vm2200_vm1, %vm2316_vm0  ;;  %v6750_v13 = vsel %vm2412_vm4, 1.0, %v8056_v27  ;;  %vm1229_vm0 = vcmp.eq.s32.totalorder %v6631_v37, %v4887_v54  ;;  %vm1445_vm4 = vcmp.eq.s32.totalorder %v6631_v37, %v4899_v57 }
 0x2de   : > { %8109 = vst [vmem:[#allocation68_spill] sm:$0xff] %v6750_v13  ;;  %v6755_v44 = vsel %vm2416_vm7, 1.0, %v8056_v27  ;;  %vm681_vm9 = vmor %vm465_vm2, %vm581_vm3  ;;  %vm1233_vm2 = vcmp.eq.s32.totalorder %v6636_v26, %v4887_v54 }
 0x2df   : > { %8110 = vst [vmem:[#allocation69_spill] sm:$0xff] %v6755_v44  ;;  %v2676_v9 = vpack.c.bf16 %v6755_v44, %v6750_v13  ;;  %vm685_vm11 = vmor %vm469_vm5, %vm585_vm6  ;;  %vm1449_vm6 = vcmp.eq.s32.totalorder %v6636_v26, %v4899_v57 }
 0x2e0   : > { %vm897_vm13 = vmor %vm681_vm9, %vm797_vm8  ;;  %vm1661_vm8 = vcmp.eq.s32.totalorder %v6631_v37, %v4906_v58 }
 0x2e1   : > { %2970 = vmatprep.subr.bf16.mxu1 %v2676_v9  ;;  %vm901_vm15 = vmor %vm685_vm11, %vm801_vm10  ;;  %vm1665_vm10 = vcmp.eq.s32.totalorder %v6636_v26, %v4906_v58 }
 0x2e2   : > { %vm1113_vm1 = vmor %vm897_vm13, %vm1013_vm12  ;;  %vm1877_vm12 = vcmp.eq.s32.totalorder %v6631_v37, %v4914_v60 }
 0x2e3   : > { %vm1117_vm3 = vmor %vm901_vm15, %vm1017_vm14  ;;  %vm1881_vm14 = vcmp.eq.s32.totalorder %v6636_v26, %v4914_v60 }
 0x2e4   : > { %vm1329_vm5 = vmor %vm1113_vm1, %vm1229_vm0  ;;  %vm2093_vm0 = vcmp.eq.s32.totalorder %v6631_v37, %v4921_v61 }
 0x2e5   : > { %vm1333_vm7 = vmor %vm1117_vm3, %vm1233_vm2  ;;  %vm2097_vm2 = vcmp.eq.s32.totalorder %v6636_v26, %v4921_v61 }
 0x2e6   : > { %vm1545_vm9 = vmor %vm1329_vm5, %vm1445_vm4  ;;  %vm2309_vm4 = vcmp.eq.s32.totalorder %v6631_v37, %v4929_v63 }
 0x2e7   : > { %vm1549_vm11 = vmor %vm1333_vm7, %vm1449_vm6  ;;  %vm2313_vm6 = vcmp.eq.s32.totalorder %v6636_v26, %v4929_v63 }
 0x2e8   : > { %vm1761_vm13 = vmor %vm1545_vm9, %vm1661_vm8  ;;  %vm467_vm8 = vcmp.eq.s32.totalorder %v6631_v37, %v4936_v0  ;;  %vm583_vm9 = vcmp.eq.s32.totalorder %v6631_v37, %v4939_v1 }
 0x2e9   : > { %vm1765_vm15 = vmor %vm1549_vm11, %vm1665_vm10  ;;  %vm471_vm11 = vcmp.eq.s32.totalorder %v6636_v26, %v4936_v0 }
 0x2ea   : > { %vm1977_vm1 = vmor %vm1761_vm13, %vm1877_vm12  ;;  %vm587_vm12 = vcmp.eq.s32.totalorder %v6636_v26, %v4939_v1 }
 0x2eb   : > { %vm1981_vm3 = vmor %vm1765_vm15, %vm1881_vm14  ;;  %vm799_vm14 = vcmp.eq.s32.totalorder %v6631_v37, %v4946_v2 }
 0x2ec   : > { %vm2193_vm5 = vmor %vm1977_vm1, %vm2093_vm0  ;;  %vm803_vm0 = vcmp.eq.s32.totalorder %v6636_v26, %v4946_v2 }
 0x2ed   : > { %vm2197_vm7 = vmor %vm1981_vm3, %vm2097_vm2  ;;  %vm1015_vm2 = vcmp.eq.s32.totalorder %v6631_v37, %v4955_v3 }
 0x2ee   : > { %vm2409_vm10 = vmor %vm2193_vm5, %vm2309_vm4  ;;  %vm1019_vm4 = vcmp.eq.s32.totalorder %v6636_v26, %v4955_v3 }
 0x2ef   : > { %vm2413_vm13 = vmor %vm2197_vm7, %vm2313_vm6  ;;  %v6798_v9 = vsel %vm2409_vm10, 1.0, %v8056_v27  ;;  %vm1231_vm6 = vcmp.eq.s32.totalorder %v6631_v37, %v4967_v5  ;;  %vm1447_vm10 = vcmp.eq.s32.totalorder %v6631_v37, %v4979_v8 }
 0x2f0   : > { %8111 = vst [vmem:[#allocation70_spill] sm:$0xff] %v6798_v9  ;;  %v6803_v44 = vsel %vm2413_vm13, 1.0, %v8056_v27  ;;  %vm683_vm15 = vmor %vm467_vm8, %vm583_vm9  ;;  %vm1235_vm8 = vcmp.eq.s32.totalorder %v6636_v26, %v4967_v5 }
 0x2f1   : > { %8112 = vst [vmem:[#allocation71_spill] sm:$0xff] %v6803_v44  ;;  %v2673_v13 = vpack.c.bf16 %v6803_v44, %v6798_v9  ;;  %vm687_vm1 = vmor %vm471_vm11, %vm587_vm12  ;;  %vm1451_vm12 = vcmp.eq.s32.totalorder %v6636_v26, %v4979_v8  ;;  %v3496_v9 = vld [vmem:[%s7954_s3 + $0x58] sm:$0xff] }
 0x2f2   : > { %vm899_vm3 = vmor %vm683_vm15, %vm799_vm14  ;;  %vm1663_vm14 = vcmp.eq.s32.totalorder %v6631_v37, %v4986_v11  ;;  %3558 = vperm.xlu1 %4468, %v3496_v9  }
 0x2f3   : > { %2848 = vmatpush1.bf16.msra.mxu0 %v2673_v13  ;;  %vm903_vm5 = vmor %vm687_vm1, %vm803_vm0  ;;  %vm1667_vm0 = vcmp.eq.s32.totalorder %v6636_v26, %v4986_v11  ;;  %v6840_v13 = vadd.s32 168, %v4677_v10 }
 0x2f4   : > { %vm1115_vm7 = vmor %vm899_vm3, %vm1015_vm2  ;;  %vm1879_vm2 = vcmp.eq.s32.totalorder %v6631_v37, %v4994_v16 }
 0x2f5   : > { %vm1119_vm9 = vmor %vm903_vm5, %vm1019_vm4  ;;  %vm1883_vm4 = vcmp.eq.s32.totalorder %v6636_v26, %v4994_v16 }
 0x2f6   : > { %vm1331_vm11 = vmor %vm1115_vm7, %vm1231_vm6  ;;  %vm2095_vm6 = vcmp.eq.s32.totalorder %v6631_v37, %v5001_v17 }
 0x2f7   : > { %vm1335_vm13 = vmor %vm1119_vm9, %vm1235_vm8  ;;  %vm2099_vm8 = vcmp.eq.s32.totalorder %v6636_v26, %v5001_v17 }
 0x2f8   : > { %vm1547_vm15 = vmor %vm1331_vm11, %vm1447_vm10  ;;  %vm2311_vm10 = vcmp.eq.s32.totalorder %v6631_v37, %v5008_v21 }
 0x2f9   : > { %vm1551_vm1 = vmor %vm1335_vm13, %vm1451_vm12  ;;  %vm2315_vm12 = vcmp.eq.s32.totalorder %v6636_v26, %v5008_v21 }
 0x2fa   : > { %vm1763_vm3 = vmor %vm1547_vm15, %vm1663_vm14  ;;  %vm474_vm14 = vcmp.eq.s32.totalorder %v6835_v56, %v4701_v18  ;;  %vm590_vm15 = vcmp.eq.s32.totalorder %v6835_v56, %v4704_v19 }
 0x2fb   : > { %vm1767_vm5 = vmor %vm1551_vm1, %vm1667_vm0  ;;  %vm478_vm1 = vcmp.eq.s32.totalorder %v6840_v13, %v4701_v18 }
 0x2fc   : > { %vm1979_vm7 = vmor %vm1763_vm3, %vm1879_vm2  ;;  %vm594_vm2 = vcmp.eq.s32.totalorder %v6840_v13, %v4704_v19 }
 0x2fd   : > { %vm1983_vm9 = vmor %vm1767_vm5, %vm1883_vm4  ;;  %vm806_vm4 = vcmp.eq.s32.totalorder %v6835_v56, %v4707_v20 }
 0x2fe   : > { %vm2195_vm11 = vmor %vm1979_vm7, %vm2095_vm6  ;;  %vm810_vm6 = vcmp.eq.s32.totalorder %v6840_v13, %v4707_v20 }
 0x2ff   : > { %vm2199_vm13 = vmor %vm1983_vm9, %vm2099_vm8  ;;  %vm1022_vm8 = vcmp.eq.s32.totalorder %v6835_v56, %v4713_v22 }
 0x300   : > { %vm2411_vm0 = vmor %vm2195_vm11, %vm2311_vm10  ;;  %vm1026_vm10 = vcmp.eq.s32.totalorder %v6840_v13, %v4713_v22 }
 0x301   : > { %vm2415_vm3 = vmor %vm2199_vm13, %vm2315_vm12  ;;  %v6855_v37 = vsel %vm2411_vm0, 1.0, %v8056_v27  ;;  %vm1238_vm12 = vcmp.eq.s32.totalorder %v6835_v56, %v4716_v23  ;;  %vm1454_vm0 = vcmp.eq.s32.totalorder %v6835_v56, %v4736_v25 }
 0x302   : > { %8113 = vst [vmem:[#allocation72_spill] sm:$0xff] %v6855_v37  ;;  %v6860_v26 = vsel %vm2415_vm3, 1.0, %v8056_v27  ;;  %vm690_vm5 = vmor %vm474_vm14, %vm590_vm15  ;;  %vm1242_vm14 = vcmp.eq.s32.totalorder %v6840_v13, %v4716_v23 }
 0x303   : > { %8114 = vst [vmem:[#allocation73_spill] sm:$0xff] %v6860_v26  ;;  %v2675_v44 = vpack.c.bf16 %v6860_v26, %v6855_v37  ;;  %vm694_vm7 = vmor %vm478_vm1, %vm594_vm2  ;;  %vm1458_vm2 = vcmp.eq.s32.totalorder %v6840_v13, %v4736_v25 }
 0x304   : > { %vm906_vm9 = vmor %vm690_vm5, %vm806_vm4  ;;  %vm1670_vm4 = vcmp.eq.s32.totalorder %v6835_v56, %v4747_v28 }
 0x305   : > { %2971 = vmatpush1.bf16.msra.mxu1 %v2675_v44  ;;  %vm910_vm11 = vmor %vm694_vm7, %vm810_vm6  ;;  %vm1674_vm6 = vcmp.eq.s32.totalorder %v6840_v13, %v4747_v28 }
 0x306   : > { %vm1122_vm13 = vmor %vm906_vm9, %vm1022_vm8  ;;  %vm1886_vm8 = vcmp.eq.s32.totalorder %v6835_v56, %v4754_v29 }
 0x307   : > { %vm1126_vm15 = vmor %vm910_vm11, %vm1026_vm10  ;;  %vm1890_vm10 = vcmp.eq.s32.totalorder %v6840_v13, %v4754_v29 }
 0x308   : > { %vm1338_vm1 = vmor %vm1122_vm13, %vm1238_vm12  ;;  %vm2102_vm12 = vcmp.eq.s32.totalorder %v6835_v56, %v4761_v30 }
 0x309   : > { %vm1342_vm3 = vmor %vm1126_vm15, %vm1242_vm14  ;;  %vm2106_vm14 = vcmp.eq.s32.totalorder %v6840_v13, %v4761_v30 }
 0x30a   : > { %vm1554_vm5 = vmor %vm1338_vm1, %vm1454_vm0  ;;  %vm2318_vm0 = vcmp.eq.s32.totalorder %v6835_v56, %v4769_v32 }
 0x30b   : > { %vm1558_vm7 = vmor %vm1342_vm3, %vm1458_vm2  ;;  %vm2322_vm2 = vcmp.eq.s32.totalorder %v6840_v13, %v4769_v32 }
 0x30c   : > { %vm1770_vm9 = vmor %vm1554_vm5, %vm1670_vm4  ;;  %vm476_vm4 = vcmp.eq.s32.totalorder %v6835_v56, %v4776_v33  ;;  %vm592_vm5 = vcmp.eq.s32.totalorder %v6835_v56, %v4779_v34 }
 0x30d   : > { %vm1774_vm11 = vmor %vm1558_vm7, %vm1674_vm6  ;;  %vm480_vm7 = vcmp.eq.s32.totalorder %v6840_v13, %v4776_v33 }
 0x30e   : > { %vm1986_vm13 = vmor %vm1770_vm9, %vm1886_vm8  ;;  %vm596_vm8 = vcmp.eq.s32.totalorder %v6840_v13, %v4779_v34 }
 0x30f   : > { %vm1990_vm15 = vmor %vm1774_vm11, %vm1890_vm10  ;;  %vm808_vm10 = vcmp.eq.s32.totalorder %v6835_v56, %v4786_v35 }
 0x310   : > { %vm2202_vm1 = vmor %vm1986_vm13, %vm2102_vm12  ;;  %vm812_vm12 = vcmp.eq.s32.totalorder %v6840_v13, %v4786_v35 }
 0x311   : > { %vm2206_vm3 = vmor %vm1990_vm15, %vm2106_vm14  ;;  %vm1024_vm14 = vcmp.eq.s32.totalorder %v6835_v56, %v4795_v36 }
 0x312   : > { %vm2418_vm6 = vmor %vm2202_vm1, %vm2318_vm0  ;;  %vm1028_vm0 = vcmp.eq.s32.totalorder %v6840_v13, %v4795_v36 }
 0x313   : > { %vm2422_vm9 = vmor %vm2206_vm3, %vm2322_vm2  ;;  %v6903_v44 = vsel %vm2418_vm6, 1.0, %v8056_v27  ;;  %vm1240_vm2 = vcmp.eq.s32.totalorder %v6835_v56, %v4807_v39  ;;  %vm1456_vm6 = vcmp.eq.s32.totalorder %v6835_v56, %v4819_v42 }
 0x314   : > { %8115 = vst [vmem:[#allocation74_spill] sm:$0xff] %v6903_v44  ;;  %v6908_v26 = vsel %vm2422_vm9, 1.0, %v8056_v27  ;;  %vm692_vm11 = vmor %vm476_vm4, %vm592_vm5  ;;  %vm1244_vm4 = vcmp.eq.s32.totalorder %v6840_v13, %v4807_v39 }
 0x315   : > { %8116 = vst [vmem:[#allocation75_spill] sm:$0xff] %v6908_v26  ;;  %v2678_v37 = vpack.c.bf16 %v6908_v26, %v6903_v44  ;;  %vm696_vm13 = vmor %vm480_vm7, %vm596_vm8  ;;  %vm1460_vm8 = vcmp.eq.s32.totalorder %v6840_v13, %v4819_v42  ;;  %v3499_v44 = vld [vmem:[%s7954_s3 + $0x70] sm:$0xff] }
 0x316   : > { %vm908_vm15 = vmor %vm692_vm11, %vm808_vm10  ;;  %vm1672_vm10 = vcmp.eq.s32.totalorder %v6835_v56, %v4826_v43  ;;  %3573 = vperm.xlu0 %4467, %v3499_v44  }
 0x317   : > { %2849 = vmatprep.subr.bf16.mxu0 %v2678_v37  ;;  %vm912_vm1 = vmor %vm696_vm13, %vm812_vm12  ;;  %vm1676_vm12 = vcmp.eq.s32.totalorder %v6840_v13, %v4826_v43 }
 0x318   : > { %vm1124_vm3 = vmor %vm908_vm15, %vm1024_vm14  ;;  %vm1888_vm14 = vcmp.eq.s32.totalorder %v6835_v56, %v4834_v45 }
 0x319   : > { %vm1128_vm5 = vmor %vm912_vm1, %vm1028_vm0  ;;  %vm1892_vm0 = vcmp.eq.s32.totalorder %v6840_v13, %v4834_v45 }
 0x31a   : > { %vm1340_vm7 = vmor %vm1124_vm3, %vm1240_vm2  ;;  %vm2104_vm2 = vcmp.eq.s32.totalorder %v6835_v56, %v4841_v46 }
 0x31b   : > { %vm1344_vm9 = vmor %vm1128_vm5, %vm1244_vm4  ;;  %vm2108_vm4 = vcmp.eq.s32.totalorder %v6840_v13, %v4841_v46 }
 0x31c   : > { %vm1556_vm11 = vmor %vm1340_vm7, %vm1456_vm6  ;;  %vm2320_vm6 = vcmp.eq.s32.totalorder %v6835_v56, %v4849_v48 }
 0x31d   : > { %vm1560_vm13 = vmor %vm1344_vm9, %vm1460_vm8  ;;  %vm2324_vm8 = vcmp.eq.s32.totalorder %v6840_v13, %v4849_v48 }
 0x31e   : > { %vm1772_vm15 = vmor %vm1556_vm11, %vm1672_vm10  ;;  %vm473_vm10 = vcmp.eq.s32.totalorder %v6835_v56, %v4856_v49  ;;  %vm589_vm11 = vcmp.eq.s32.totalorder %v6835_v56, %v4859_v50 }
 0x31f   : > { %vm1776_vm1 = vmor %vm1560_vm13, %vm1676_vm12  ;;  %vm477_vm13 = vcmp.eq.s32.totalorder %v6840_v13, %v4856_v49 }
 0x320   : > { %vm1988_vm3 = vmor %vm1772_vm15, %vm1888_vm14  ;;  %vm593_vm14 = vcmp.eq.s32.totalorder %v6840_v13, %v4859_v50 }
 0x321   : > { %vm1992_vm5 = vmor %vm1776_vm1, %vm1892_vm0  ;;  %vm805_vm0 = vcmp.eq.s32.totalorder %v6835_v56, %v4866_v51 }
 0x322   : > { %vm2204_vm7 = vmor %vm1988_vm3, %vm2104_vm2  ;;  %vm809_vm2 = vcmp.eq.s32.totalorder %v6840_v13, %v4866_v51 }
 0x323   : > { %vm2208_vm9 = vmor %vm1992_vm5, %vm2108_vm4  ;;  %vm1021_vm4 = vcmp.eq.s32.totalorder %v6835_v56, %v4875_v52 }
 0x324   : > { %vm2420_vm12 = vmor %vm2204_vm7, %vm2320_vm6  ;;  %vm1025_vm6 = vcmp.eq.s32.totalorder %v6840_v13, %v4875_v52 }
 0x325   : > { %vm2424_vm15 = vmor %vm2208_vm9, %vm2324_vm8  ;;  %v6954_v9 = vsel %vm2420_vm12, 1.0, %v8056_v27  ;;  %vm1237_vm8 = vcmp.eq.s32.totalorder %v6835_v56, %v4887_v54  ;;  %vm1453_vm12 = vcmp.eq.s32.totalorder %v6835_v56, %v4899_v57 }
 0x326   : > { %8117 = vst [vmem:[#allocation76_spill] sm:$0xff] %v6954_v9  ;;  %v6959_v37 = vsel %vm2424_vm15, 1.0, %v8056_v27  ;;  %vm689_vm1 = vmor %vm473_vm10, %vm589_vm11  ;;  %vm1241_vm10 = vcmp.eq.s32.totalorder %v6840_v13, %v4887_v54 }
 0x327   : > { %8118 = vst [vmem:[#allocation77_spill] sm:$0xff] %v6959_v37  ;;  %v2680_v26 = vpack.c.bf16 %v6959_v37, %v6954_v9  ;;  %vm693_vm3 = vmor %vm477_vm13, %vm593_vm14  ;;  %vm1457_vm14 = vcmp.eq.s32.totalorder %v6840_v13, %v4899_v57  ;;  %v3498_v9 = vld [vmem:[%s7954_s3 + $0x68] sm:$0xff] }
 0x328   : > { %vm905_vm5 = vmor %vm689_vm1, %vm805_vm0  ;;  %vm1669_vm0 = vcmp.eq.s32.totalorder %v6835_v56, %v4906_v58  ;;  %3568 = vperm.xlu1 %4468, %v3498_v9   ;;  %v3075_v9 = vld [vmem:[%s7953_s2] sm:$0xff] }
 0x329   : > { %2972 = vmatprep.subr.bf16.mxu1 %v2680_v26  ;;  %vm909_vm7 = vmor %vm693_vm3, %vm809_vm2  ;;  %vm1673_vm2 = vcmp.eq.s32.totalorder %v6840_v13, %v4906_v58  ;;  %3102 = vperm.xlu0 %4467, %v3075_v9   ;;  %v7059_v9 = vadd.s32 176, %v4677_v10 }
 0x32a   : > { %vm1121_vm9 = vmor %vm905_vm5, %vm1021_vm4  ;;  %vm1885_vm4 = vcmp.eq.s32.totalorder %v6835_v56, %v4914_v60 }
 0x32b   : > { %vm1125_vm11 = vmor %vm909_vm7, %vm1025_vm6  ;;  %vm1889_vm6 = vcmp.eq.s32.totalorder %v6840_v13, %v4914_v60 }
 0x32c   : > { %vm1337_vm13 = vmor %vm1121_vm9, %vm1237_vm8  ;;  %vm2101_vm8 = vcmp.eq.s32.totalorder %v6835_v56, %v4921_v61 }
 0x32d   : > { %vm1341_vm15 = vmor %vm1125_vm11, %vm1241_vm10  ;;  %vm2105_vm10 = vcmp.eq.s32.totalorder %v6840_v13, %v4921_v61 }
 0x32e   : > { %vm1553_vm1 = vmor %vm1337_vm13, %vm1453_vm12  ;;  %vm2317_vm12 = vcmp.eq.s32.totalorder %v6835_v56, %v4929_v63 }
 0x32f   : > { %vm1557_vm3 = vmor %vm1341_vm15, %vm1457_vm14  ;;  %vm2321_vm14 = vcmp.eq.s32.totalorder %v6840_v13, %v4929_v63 }
 0x330   : > { %vm1769_vm5 = vmor %vm1553_vm1, %vm1669_vm0  ;;  %vm475_vm0 = vcmp.eq.s32.totalorder %v6835_v56, %v4936_v0  ;;  %vm591_vm1 = vcmp.eq.s32.totalorder %v6835_v56, %v4939_v1 }
 0x331   : > { %vm1773_vm7 = vmor %vm1557_vm3, %vm1673_vm2  ;;  %vm479_vm3 = vcmp.eq.s32.totalorder %v6840_v13, %v4936_v0 }
 0x332   : > { %vm1985_vm9 = vmor %vm1769_vm5, %vm1885_vm4  ;;  %vm595_vm4 = vcmp.eq.s32.totalorder %v6840_v13, %v4939_v1 }
 0x333   : > { %vm1989_vm11 = vmor %vm1773_vm7, %vm1889_vm6  ;;  %vm807_vm6 = vcmp.eq.s32.totalorder %v6835_v56, %v4946_v2 }
 0x334   : > { %vm2201_vm13 = vmor %vm1985_vm9, %vm2101_vm8  ;;  %vm811_vm8 = vcmp.eq.s32.totalorder %v6840_v13, %v4946_v2 }
 0x335   : > { %vm2205_vm15 = vmor %vm1989_vm11, %vm2105_vm10  ;;  %vm1023_vm10 = vcmp.eq.s32.totalorder %v6835_v56, %v4955_v3 }
 0x336   : > { %vm2417_vm2 = vmor %vm2201_vm13, %vm2317_vm12  ;;  %vm1027_vm12 = vcmp.eq.s32.totalorder %v6840_v13, %v4955_v3  ;;  %vm2788_vm13 = vcmask 588800  }
 0x337   : > { %vm2421_vm5 = vmor %vm2205_vm15, %vm2321_vm14  ;;  %v7005_v26 = vsel %vm2417_vm2, 1.0, %v8056_v27  ;;  %vm1239_vm15 = vcmp.eq.s32.totalorder %v6835_v56, %v4967_v5 }
 0x338   : > { %8119 = vst [vmem:[#allocation78_spill] sm:$0xff] %v7005_v26  ;;  %v7010_v44 = vsel %vm2421_vm5, 1.0, %v8056_v27  ;;  %vm691_vm7 = vmor %vm475_vm0, %vm591_vm1  ;;  %vm1243_vm1 = vcmp.eq.s32.totalorder %v6840_v13, %v4967_v5  ;;  %vm1459_vm5 = vcmp.eq.s32.totalorder %v6840_v13, %v4979_v8 }
 0x339   : > { %8120 = vst [vmem:[#allocation79_spill] sm:$0xff] %v7010_v44  ;;  %v2677_v37 = vpack.c.bf16 %v7010_v44, %v7005_v26  ;;  %vm695_vm9 = vmor %vm479_vm3, %vm595_vm4  ;;  %v4471_v44 = vld [vmem:[%s7952_s1 + $0x4] ss:$8 sps:$4 sm:$0xff]   ;;  %vm1455_vm3 = vcmp.eq.s32.totalorder %v6835_v56, %v4979_v8 }
 0x33a   : > { %vm907_vm11 = vmor %vm691_vm7, %vm807_vm6  ;;  %4395 = vmatprep.mubr.msk.bf16.mxu0 %vm2788_vm13, %v4471_v44  ;;  %4405 = vmatprep.mubr.msk.bf16.mxu1 %vm2788_vm13, %v4471_v44  ;;  %vm1671_vm7 = vcmp.eq.s32.totalorder %v6835_v56, %v4986_v11  ;;  %v3077_v44 = vld [vmem:[%s7953_s2 + $0x10] sm:$0xff]  ;;  %v3076_v26 = vld [vmem:[%s7953_s2 + $0x8] sm:$0xff] }
 0x33b   : > { %2850 = vmatpush1.bf16.msra.mxu0 %v2677_v37  ;;  %vm911_vm14 = vmor %vm695_vm9, %vm811_vm8  ;;  %v3500_v37 = vld [vmem:[%s7954_s3 + $0x78] sm:$0xff]  ;;  %vm1675_vm9 = vcmp.eq.s32.totalorder %v6840_v13, %v4986_v11  ;;  %3112 = vperm.xlu0 %4467, %v3077_v44   ;;  %v3079_v44 = vld [vmem:[%s7953_s2 + $0x20] sm:$0xff] }
 0x33c   : > { %vm1123_vm0 = vmor %vm907_vm11, %vm1023_vm10  ;;  %3578 = vperm.xlu1 %4468, %v3500_v37   ;;  %vm1887_vm11 = vcmp.eq.s32.totalorder %v6835_v56, %v4994_v16  ;;  %v7064_v37 = vadd.s32 184, %v4677_v10 }
 0x33d   : > { %vm1127_vm2 = vmor %vm911_vm14, %vm1027_vm12  ;;  %vm1891_vm14 = vcmp.eq.s32.totalorder %v6840_v13, %v4994_v16 }
 0x33e   : > { %vm1339_vm4 = vmor %vm1123_vm0, %vm1239_vm15  ;;  %vm2103_vm0 = vcmp.eq.s32.totalorder %v6835_v56, %v5001_v17 }
 0x33f   : > { %vm1343_vm6 = vmor %vm1127_vm2, %vm1243_vm1  ;;  %vm2107_vm2 = vcmp.eq.s32.totalorder %v6840_v13, %v5001_v17  ;;  %3122 = vperm.xlu0 %4467, %v3079_v44  }
 0x340   : > { %vm1555_vm8 = vmor %vm1339_vm4, %vm1455_vm3  ;;  %3107 = vperm.xlu1 %4468, %v3076_v26   ;;  %vm2319_vm4 = vcmp.eq.s32.totalorder %v6835_v56, %v5008_v21  ;;  %v3081_v56 = vld [vmem:[%s7953_s2 + $0x30] sm:$0xff] }
 0x341   : > { %vm1559_vm10 = vmor %vm1343_vm6, %vm1459_vm5  ;;  %vm2323_vm6 = vcmp.eq.s32.totalorder %v6840_v13, %v5008_v21  ;;  %v3080_v13 = vld [vmem:[%s7953_s2 + $0x28] sm:$0xff] }
 0x342   : > { %vm1771_vm12 = vmor %vm1555_vm8, %vm1671_vm7  ;;  %vm482_vm8 = vcmp.eq.s32.totalorder %v7059_v9, %v4701_v18 }
 0x343   : > { %vm1775_vm15 = vmor %vm1559_vm10, %vm1675_vm9  ;;  %vm598_vm9 = vcmp.eq.s32.totalorder %v7059_v9, %v4704_v19  ;;  %3132 = vperm.xlu0 %4467, %v3081_v56   ;;  %v3083_v56 = vld [vmem:[%s7953_s2 + $0x40] sm:$0xff] }
 0x344   : > { %vm1987_vm1 = vmor %vm1771_vm12, %vm1887_vm11  ;;  %3117 = vperm.xlu1 %4468, %v3078_v15   ;;  %vm486_vm11 = vcmp.eq.s32.totalorder %v7064_v37, %v4701_v18  ;;  %vm602_vm12 = vcmp.eq.s32.totalorder %v7064_v37, %v4704_v19 }
 0x345   : > { %vm1991_vm3 = vmor %vm1775_vm15, %vm1891_vm14  ;;  %vm814_vm15 = vcmp.eq.s32.totalorder %v7059_v9, %v4707_v20 }
 0x346   : > { %vm2203_vm5 = vmor %vm1987_vm1, %vm2103_vm0  ;;  %vm818_vm1 = vcmp.eq.s32.totalorder %v7064_v37, %v4707_v20 }
 0x347   : > { %vm2207_vm7 = vmor %vm1991_vm3, %vm2107_vm2  ;;  %vm1030_vm3 = vcmp.eq.s32.totalorder %v7059_v9, %v4713_v22  ;;  %3142 = vperm.xlu0 %4467, %v3083_v56   ;;  %v3086_v56 = vld [vmem:[%s7953_s2 + $0x58] sm:$0xff] }
 0x348   : > { %vm2419_vm10 = vmor %vm2203_vm5, %vm2319_vm4  ;;  %3127 = vperm.xlu1 %4468, %v3080_v13   ;;  %vm1034_vm5 = vcmp.eq.s32.totalorder %v7064_v37, %v4713_v22  ;;  %v3085_v13 = vld [vmem:[%s7953_s2 + $0x50] sm:$0xff] }
 0x349   : > { %vm2423_vm14 = vmor %vm2207_vm7, %vm2323_vm6  ;;  %v7091_v26 = vsel %vm2419_vm10, 1.0, %v8056_v27  ;;  %vm1246_vm7 = vcmp.eq.s32.totalorder %v7059_v9, %v4716_v23 }
 0x34a   : > { %8121 = vst [vmem:[#allocation80_spill] sm:$0xff] %v7091_v26  ;;  %v7096_v15 = vsel %vm2423_vm14, 1.0, %v8056_v27  ;;  %vm698_vm0 = vmor %vm482_vm8, %vm598_vm9  ;;  %vm1250_vm9 = vcmp.eq.s32.totalorder %v7064_v37, %v4716_v23  ;;  %vm1466_vm14 = vcmp.eq.s32.totalorder %v7064_v37, %v4736_v25 }
 0x34b   : > { %8122 = vst [vmem:[#allocation81_spill] sm:$0xff] %v7096_v15  ;;  %v2679_v44 = vpack.c.bf16 %v7096_v15, %v7091_v26  ;;  %vm702_vm2 = vmor %vm486_vm11, %vm602_vm12  ;;  %v3082_v15 = vld [vmem:[%s7953_s2 + $0x38] sm:$0xff]  ;;  %vm1462_vm11 = vcmp.eq.s32.totalorder %v7059_v9, %v4736_v25  ;;  %3152 = vperm.xlu0 %4467, %v3085_v13   ;;  %v3089_v13 = vld [vmem:[%s7953_s2 + $0x70] sm:$0xff] }
 0x34c   : > { %vm914_vm4 = vmor %vm698_vm0, %vm814_vm15  ;;  %3137 = vperm.xlu1 %4468, %v3082_v15   ;;  %vm1678_vm0 = vcmp.eq.s32.totalorder %v7059_v9, %v4747_v28  ;;  %v3087_v15 = vld [vmem:[%s7953_s2 + $0x60] sm:$0xff] }
 0x34d   : > { %2973 = vmatpush1.bf16.msra.mxu1 %v2679_v44  ;;  %vm918_vm6 = vmor %vm702_vm2, %vm818_vm1  ;;  %v3084_v44 = vld [vmem:[%s7953_s2 + $0x48] sm:$0xff]  ;;  %vm1682_vm2 = vcmp.eq.s32.totalorder %v7064_v37, %v4747_v28 }
 0x34e   : > { %vm1130_vm8 = vmor %vm914_vm4, %vm1030_vm3  ;;  %vm1894_vm4 = vcmp.eq.s32.totalorder %v7059_v9, %v4754_v29 }
 0x34f   : > { %vm1134_vm10 = vmor %vm918_vm6, %vm1034_vm5  ;;  %vm1898_vm6 = vcmp.eq.s32.totalorder %v7064_v37, %v4754_v29  ;;  %3162 = vperm.xlu0 %4467, %v3087_v15  }
 0x350   : > { %vm1346_vm12 = vmor %vm1130_vm8, %vm1246_vm7  ;;  %3147 = vperm.xlu1 %4468, %v3084_v44   ;;  %vm2110_vm8 = vcmp.eq.s32.totalorder %v7059_v9, %v4761_v30  ;;  %v3088_v44 = vld [vmem:[%s7953_s2 + $0x68] sm:$0xff] }
 0x351   : > { %vm1350_vm15 = vmor %vm1134_vm10, %vm1250_vm9  ;;  %vm2114_vm10 = vcmp.eq.s32.totalorder %v7064_v37, %v4761_v30 }
 0x352   : > { %vm1562_vm1 = vmor %vm1346_vm12, %vm1462_vm11  ;;  %vm2326_vm12 = vcmp.eq.s32.totalorder %v7059_v9, %v4769_v32 }
 0x353   : > { %vm1566_vm3 = vmor %vm1350_vm15, %vm1466_vm14  ;;  %vm2330_vm15 = vcmp.eq.s32.totalorder %v7064_v37, %v4769_v32  ;;  %3172 = vperm.xlu0 %4467, %v3089_v13   ;;  %v3091_v13 = vld [vmem:[%s7953_s2 + $0x80] sm:$0xff] }
 0x354   : > { %vm1778_vm5 = vmor %vm1562_vm1, %vm1678_vm0  ;;  %3157 = vperm.xlu1 %4468, %v3086_v56   ;;  %vm484_vm1 = vcmp.eq.s32.totalorder %v7059_v9, %v4776_v33 }
 0x355   : > { %vm1782_vm7 = vmor %vm1566_vm3, %vm1682_vm2  ;;  %vm600_vm2 = vcmp.eq.s32.totalorder %v7059_v9, %v4779_v34 }
 0x356   : > { %vm1994_vm9 = vmor %vm1778_vm5, %vm1894_vm4  ;;  %vm488_vm4 = vcmp.eq.s32.totalorder %v7064_v37, %v4776_v33  ;;  %vm604_vm5 = vcmp.eq.s32.totalorder %v7064_v37, %v4779_v34 }
 0x357   : > { %vm1998_vm11 = vmor %vm1782_vm7, %vm1898_vm6  ;;  %vm816_vm7 = vcmp.eq.s32.totalorder %v7059_v9, %v4786_v35  ;;  %3182 = vperm.xlu0 %4467, %v3091_v13   ;;  %v3751_v13 = vld [vmem:[%s7956_s5 + $0x10] sm:$0xff] }
 0x358   : > { %vm2210_vm14 = vmor %vm1994_vm9, %vm2110_vm8  ;;  %3167 = vperm.xlu1 %4468, %v3088_v44   ;;  %vm820_vm9 = vcmp.eq.s32.totalorder %v7064_v37, %v4786_v35  ;;  %v3090_v44 = vld [vmem:[%s7953_s2 + $0x78] sm:$0xff] }
 0x359   : > { %vm2214_vm0 = vmor %vm1998_vm11, %vm2114_vm10  ;;  %vm1032_vm11 = vcmp.eq.s32.totalorder %v7059_v9, %v4795_v36 }
 0x35a   : > { %vm2426_vm3 = vmor %vm2210_vm14, %vm2326_vm12  ;;  %vm1036_vm14 = vcmp.eq.s32.totalorder %v7064_v37, %v4795_v36 }
 0x35b   : > { %vm2430_vm6 = vmor %vm2214_vm0, %vm2330_vm15  ;;  %v7163_v15 = vsel %vm2426_vm3, 1.0, %v8056_v27  ;;  %vm1248_vm0 = vcmp.eq.s32.totalorder %v7059_v9, %v4807_v39 }
 0x35c   : > { %8123 = vst [vmem:[#allocation82_spill] sm:$0xff] %v7163_v15  ;;  %v7168_v56 = vsel %vm2430_vm6, 1.0, %v8056_v27  ;;  %vm700_vm8 = vmor %vm484_vm1, %vm600_vm2  ;;  %3177 = vperm.xlu1 %4468, %v3090_v44   ;;  %vm1252_vm2 = vcmp.eq.s32.totalorder %v7064_v37, %v4807_v39  ;;  %vm1468_vm6 = vcmp.eq.s32.totalorder %v7064_v37, %v4819_v42 }
 0x35d   : > { %8124 = vst [vmem:[#allocation83_spill] sm:$0xff] %v7168_v56  ;;  %v2682_v26 = vpack.c.bf16 %v7168_v56, %v7163_v15  ;;  %vm704_vm10 = vmor %vm488_vm4, %vm604_vm5  ;;  %v3749_v56 = vld [vmem:[%s7956_s5] sm:$0xff]  ;;  %v3092_v15 = vld [vmem:[%s7953_s2 + $0x88] sm:$0xff]  ;;  %vm1464_vm4 = vcmp.eq.s32.totalorder %v7059_v9, %v4819_v42 }
 0x35e   : > { %vm916_vm12 = vmor %vm700_vm8, %vm816_vm7  ;;  %3759 = vperm.xlu0 %4467, %v3749_v56   ;;  %vm1680_vm8 = vcmp.eq.s32.totalorder %v7059_v9, %v4826_v43  ;;  %v3750_v56 = vld [vmem:[%s7956_s5 + $0x8] sm:$0xff] }
 0x35f   : > { %2851 = vmatprep.subr.bf16.mxu0 %v2682_v26  ;;  %vm920_vm15 = vmor %vm704_vm10, %vm820_vm9  ;;  %vm1684_vm10 = vcmp.eq.s32.totalorder %v7064_v37, %v4826_v43  ;;  %v3093_v26 = vld [vmem:[%s7953_s2 + $0x90] sm:$0xff] }
 0x360   : > { %vm1132_vm1 = vmor %vm916_vm12, %vm1032_vm11  ;;  %3187 = vperm.xlu1 %4468, %v3092_v15   ;;  %vm1896_vm12 = vcmp.eq.s32.totalorder %v7059_v9, %v4834_v45  ;;  %v3094_v15 = vld [vmem:[%s7953_s2 + $0x98] sm:$0xff] }
 0x361   : > { %vm1136_vm3 = vmor %vm920_vm15, %vm1036_vm14  ;;  %vm1900_vm15 = vcmp.eq.s32.totalorder %v7064_v37, %v4834_v45 }
 0x362   : > { %vm1348_vm5 = vmor %vm1132_vm1, %vm1248_vm0  ;;  %3192 = vperm.xlu0 %4467, %v3093_v26   ;;  %vm2112_vm1 = vcmp.eq.s32.totalorder %v7059_v9, %v4841_v46  ;;  %v3999_v26 = vld [vmem:[%s7957_s6] sm:$0xff] }
 0x363   : > { %vm1352_vm7 = vmor %vm1136_vm3, %vm1252_vm2  ;;  %vm2116_vm3 = vcmp.eq.s32.totalorder %v7064_v37, %v4841_v46 }
 0x364   : > { %vm1564_vm9 = vmor %vm1348_vm5, %vm1464_vm4  ;;  %3764 = vperm.xlu1 %4468, %v3750_v56   ;;  %vm2328_vm5 = vcmp.eq.s32.totalorder %v7059_v9, %v4849_v48  ;;  %v3752_v56 = vld [vmem:[%s7956_s5 + $0x18] sm:$0xff] }
 0x365   : > { %vm1568_vm11 = vmor %vm1352_vm7, %vm1468_vm6  ;;  %vm2332_vm7 = vcmp.eq.s32.totalorder %v7064_v37, %v4849_v48 }
 0x366   : > { %vm1780_vm14 = vmor %vm1564_vm9, %vm1680_vm8  ;;  %3197 = vperm.xlu0 %4467, %v3094_v15   ;;  %vm481_vm9 = vcmp.eq.s32.totalorder %v7059_v9, %v4856_v49 }
 0x367   : > { %vm1784_vm0 = vmor %vm1568_vm11, %vm1684_vm10  ;;  %vm597_vm10 = vcmp.eq.s32.totalorder %v7059_v9, %v4859_v50 }
 0x368   : > { %vm1996_vm2 = vmor %vm1780_vm14, %vm1896_vm12  ;;  %3769 = vperm.xlu1 %4468, %v3751_v13   ;;  %vm485_vm12 = vcmp.eq.s32.totalorder %v7064_v37, %v4856_v49  ;;  %vm601_vm14 = vcmp.eq.s32.totalorder %v7064_v37, %v4859_v50 }
 0x369   : > { %vm2000_vm4 = vmor %vm1784_vm0, %vm1900_vm15  ;;  %vm813_vm0 = vcmp.eq.s32.totalorder %v7059_v9, %v4866_v51 }
 0x36a   : > { %vm2212_vm6 = vmor %vm1996_vm2, %vm2112_vm1  ;;  %vm817_vm2 = vcmp.eq.s32.totalorder %v7064_v37, %v4866_v51  ;;  %4009 = vperm.xlu0 %4467, %v3999_v26   ;;  %v4000_v26 = vld [vmem:[%s7957_s6 + $0x8] sm:$0xff] }
 0x36b   : > { %vm2216_vm8 = vmor %vm2000_vm4, %vm2116_vm3  ;;  %vm1029_vm4 = vcmp.eq.s32.totalorder %v7059_v9, %v4875_v52 }
 0x36c   : > { %vm2428_vm11 = vmor %vm2212_vm6, %vm2328_vm5  ;;  %3774 = vperm.xlu1 %4468, %v3752_v56   ;;  %vm1033_vm6 = vcmp.eq.s32.totalorder %v7064_v37, %v4875_v52  ;;  %v4001_v56 = vld [vmem:[%s7957_s6 + $0x10] sm:$0xff] }
 0x36d   : > { %vm2432_vm15 = vmor %vm2216_vm8, %vm2332_vm7  ;;  %v7235_v44 = vsel %vm2428_vm11, 1.0, %v8056_v27  ;;  %vm1245_vm8 = vcmp.eq.s32.totalorder %v7059_v9, %v4887_v54 }
 0x36e   : > { %8125 = vst [vmem:[#allocation84_spill] sm:$0xff] %v7235_v44  ;;  %v7246_v15 = vsel %vm2432_vm15, 1.0, %v8056_v27  ;;  %vm697_vm1 = vmor %vm481_vm9, %vm597_vm10  ;;  %vm1249_vm10 = vcmp.eq.s32.totalorder %v7064_v37, %v4887_v54  ;;  %3202 = vperm.xlu0 %4467, %v3095_v59   ;;  %vm1465_vm15 = vcmp.eq.s32.totalorder %v7064_v37, %v4899_v57  ;;  %v3753_v59 = vld [vmem:[%s7956_s5 + $0x20] sm:$0xff] }
 0x36f   : > { %8126 = vst [vmem:[#allocation85_spill] sm:$0xff] %v7246_v15  ;;  %v2684_v13 = vpack.c.bf16 %v7246_v15, %v7235_v44  ;;  %vm701_vm3 = vmor %vm485_vm12, %vm601_vm14  ;;  %vm1461_vm12 = vcmp.eq.s32.totalorder %v7059_v9, %v4899_v57 }
 0x370   : > { %vm913_vm5 = vmor %vm697_vm1, %vm813_vm0  ;;  %4014 = vperm.xlu1 %4468, %v4000_v26   ;;  %vm1677_vm1 = vcmp.eq.s32.totalorder %v7059_v9, %v4906_v58  ;;  %v3096_v26 = vld [vmem:[%s7953_s2 + $0xa8] sm:$0xff] }
 0x371   : > { %2974 = vmatprep.subr.bf16.mxu1 %v2684_v13  ;;  %vm917_vm7 = vmor %vm701_vm3, %vm817_vm2  ;;  %vm1681_vm3 = vcmp.eq.s32.totalorder %v7064_v37, %v4906_v58  ;;  %v3754_v13 = vld [vmem:[%s7956_s5 + $0x28] sm:$0xff] }
 0x372   : > { %vm1129_vm9 = vmor %vm913_vm5, %vm1029_vm4  ;;  %4019 = vperm.xlu0 %4467, %v4001_v56   ;;  %vm1893_vm5 = vcmp.eq.s32.totalorder %v7059_v9, %v4914_v60  ;;  %v3097_v56 = vld [vmem:[%s7953_s2 + $0xb0] sm:$0xff] }
 0x373   : > { %vm1133_vm11 = vmor %vm917_vm7, %vm1033_vm6  ;;  %vm1897_vm7 = vcmp.eq.s32.totalorder %v7064_v37, %v4914_v60 }
 0x374   : > { %vm1345_vm14 = vmor %vm1129_vm9, %vm1245_vm8  ;;  %3779 = vperm.xlu1 %4468, %v3753_v59   ;;  %vm2109_vm9 = vcmp.eq.s32.totalorder %v7059_v9, %v4921_v61  ;;  %v4002_v59 = vld [vmem:[%s7957_s6 + $0x18] sm:$0xff] }
 0x375   : > { %vm1349_vm0 = vmor %vm1133_vm11, %vm1249_vm10  ;;  %vm2113_vm11 = vcmp.eq.s32.totalorder %v7064_v37, %v4921_v61 }
 0x376   : > { %vm1561_vm2 = vmor %vm1345_vm14, %vm1461_vm12  ;;  %3784 = vperm.xlu0 %4467, %v3754_v13   ;;  %vm2325_vm14 = vcmp.eq.s32.totalorder %v7059_v9, %v4929_v63 }
 0x377   : > { %vm1565_vm4 = vmor %vm1349_vm0, %vm1465_vm15  ;;  %vm2329_vm0 = vcmp.eq.s32.totalorder %v7064_v37, %v4929_v63 }
 0x378   : > { %vm1777_vm6 = vmor %vm1561_vm2, %vm1677_vm1  ;;  %3207 = vperm.xlu1 %4468, %v3096_v26   ;;  %vm483_vm2 = vcmp.eq.s32.totalorder %v7059_v9, %v4936_v0  ;;  %v4003_v26 = vld [vmem:[%s7957_s6 + $0x20] sm:$0xff] }
 0x379   : > { %vm1781_vm8 = vmor %vm1565_vm4, %vm1681_vm3  ;;  %vm599_vm3 = vcmp.eq.s32.totalorder %v7059_v9, %v4939_v1 }
 0x37a   : > { %vm1993_vm10 = vmor %vm1777_vm6, %vm1893_vm5  ;;  %vm487_vm5 = vcmp.eq.s32.totalorder %v7064_v37, %v4936_v0  ;;  %vm603_vm6 = vcmp.eq.s32.totalorder %v7064_v37, %v4939_v1  ;;  %3212 = vperm.xlu0 %4467, %v3097_v56   ;;  %v3755_v56 = vld [vmem:[%s7956_s5 + $0x30] sm:$0xff] }
 0x37b   : > { %vm1997_vm12 = vmor %vm1781_vm8, %vm1897_vm7  ;;  %vm815_vm8 = vcmp.eq.s32.totalorder %v7059_v9, %v4946_v2 }
 0x37c   : > { %vm2209_vm15 = vmor %vm1993_vm10, %vm2109_vm9  ;;  %4024 = vperm.xlu1 %4468, %v4002_v59   ;;  %vm819_vm10 = vcmp.eq.s32.totalorder %v7064_v37, %v4946_v2  ;;  %v3756_v59 = vld [vmem:[%s7956_s5 + $0x38] sm:$0xff] }
 0x37d   : > { %vm2213_vm1 = vmor %vm1997_vm12, %vm2113_vm11  ;;  %vm1031_vm12 = vcmp.eq.s32.totalorder %v7059_v9, %v4955_v3 }
 0x37e   : > { %vm2425_vm4 = vmor %vm2209_vm15, %vm2325_vm14  ;;  %vm1035_vm15 = vcmp.eq.s32.totalorder %v7064_v37, %v4955_v3  ;;  %4029 = vperm.xlu0 %4467, %v4003_v26   ;;  %v4004_v26 = vld [vmem:[%s7957_s6 + $0x28] sm:$0xff] }
 0x37f   : > { %vm2429_vm7 = vmor %vm2213_vm1, %vm2329_vm0  ;;  %v7313_v13 = vsel %vm2425_vm4, 1.0, %v8056_v27  ;;  %vm1247_vm1 = vcmp.eq.s32.totalorder %v7059_v9, %v4967_v5 }
 0x380   : > { %v7321_v15 = vsel %vm2429_vm7, 1.0, %v8056_v27  ;;  %vm699_vm9 = vmor %vm483_vm2, %vm599_vm3  ;;  %3789 = vperm.xlu1 %4468, %v3755_v56   ;;  %vm1251_vm3 = vcmp.eq.s32.totalorder %v7064_v37, %v4967_v5  ;;  %vm1467_vm7 = vcmp.eq.s32.totalorder %v7064_v37, %v4979_v8  ;;  %v4006_v56 = vld [vmem:[%s7957_s6 + $0x38] sm:$0xff] }
 0x381   : > { %8127 = vst [vmem:[#allocation86_spill] sm:$0xff] %v7321_v15  ;;  %v2681_v44 = vpack.c.bf16 %v7321_v15, %v7313_v13  ;;  %vm703_vm11 = vmor %vm487_vm5, %vm603_vm6  ;;  %v3098_v15 = vld [vmem:[%s7953_s2 + $0xb8] sm:$0xff]  ;;  %vm1463_vm5 = vcmp.eq.s32.totalorder %v7059_v9, %v4979_v8 }
 0x382   : > { %vm915_vm14 = vmor %vm699_vm9, %vm815_vm8  ;;  %3794 = vperm.xlu0 %4467, %v3756_v59   ;;  %vm1679_vm9 = vcmp.eq.s32.totalorder %v7059_v9, %v4986_v11  ;;  %v4005_v59 = vld [vmem:[%s7957_s6 + $0x30] sm:$0xff] }
 0x383   : > { %2852 = vmatpush1.bf16.msra.mxu0 %v2681_v44  ;;  %vm919_vm0 = vmor %vm703_vm11, %vm819_vm10  ;;  %v3099_v44 = vld [vmem:[%s7953_s2 + $0xc0] sm:$0xff]  ;;  %vm1683_vm11 = vcmp.eq.s32.totalorder %v7064_v37, %v4986_v11 }
 0x384   : > { %vm1131_vm2 = vmor %vm915_vm14, %vm1031_vm12  ;;  %3217 = vperm.xlu1 %4468, %v3098_v15   ;;  %vm1895_vm14 = vcmp.eq.s32.totalorder %v7059_v9, %v4994_v16  ;;  %v7365_v15 = vadd.s32 192, %v4677_v10 }
 0x385   : > { %vm1135_vm4 = vmor %vm919_vm0, %vm1035_vm15  ;;  %vm1899_vm0 = vcmp.eq.s32.totalorder %v7064_v37, %v4994_v16 }
 0x386   : > { %vm1347_vm6 = vmor %vm1131_vm2, %vm1247_vm1  ;;  %3222 = vperm.xlu0 %4467, %v3099_v44   ;;  %vm2111_vm2 = vcmp.eq.s32.totalorder %v7059_v9, %v5001_v17  ;;  %v4139_v44 = vld [vmem:[#allocation2] sm:$0x1] }
 0x387   : > { %vm1351_vm8 = vmor %vm1135_vm4, %vm1251_vm3  ;;  %vm2115_vm4 = vcmp.eq.s32.totalorder %v7064_v37, %v5001_v17 }
 0x388   : > { %vm1563_vm10 = vmor %vm1347_vm6, %vm1463_vm5  ;;  %4034 = vperm.xlu1 %4468, %v4004_v26   ;;  %vm2327_vm6 = vcmp.eq.s32.totalorder %v7059_v9, %v5008_v21 }
 0x389   : > { %vm1567_vm12 = vmor %vm1351_vm8, %vm1467_vm7  ;;  %vm2331_vm8 = vcmp.eq.s32.totalorder %v7064_v37, %v5008_v21 }
 0x38a   : > { %vm1779_vm15 = vmor %vm1563_vm10, %vm1679_vm9  ;;  %4044 = vperm.xlu0 %4467, %v4006_v56   ;;  %vm490_vm10 = vcmp.eq.s32.totalorder %v7365_v15, %v4701_v18 }
 0x38b   : > { %vm1783_vm1 = vmor %vm1567_vm12, %vm1683_vm11  ;;  %vm606_vm11 = vcmp.eq.s32.totalorder %v7365_v15, %v4704_v19 }
 0x38c   : > { %vm1995_vm3 = vmor %vm1779_vm15, %vm1895_vm14  ;;  %4039 = vperm.xlu1 %4468, %v4005_v59   ;;  %vm822_vm14 = vcmp.eq.s32.totalorder %v7365_v15, %v4707_v20 }
 0x38d   : > { %vm1999_vm5 = vmor %vm1783_vm1, %vm1899_vm0  ;;  %vm1038_vm0 = vcmp.eq.s32.totalorder %v7365_v15, %v4713_v22 }
 0x38e   : > { %vm2211_vm7 = vmor %vm1995_vm3, %vm2111_vm2  ;;  %vm1254_vm2 = vcmp.eq.s32.totalorder %v7365_v15, %v4716_v23 }
 0x38f   : > { %vm2215_vm9 = vmor %vm1999_vm5, %vm2115_vm4  ;;  %vm1470_vm4 = vcmp.eq.s32.totalorder %v7365_v15, %v4736_v25 }
 0x390   : > { %vm2427_vm12 = vmor %vm2211_vm7, %vm2327_vm6  ;;  %4142 = vperm.xlu1 %4468, %v4139_v44   ;;  %vm1686_vm6 = vcmp.eq.s32.totalorder %v7365_v15, %v4747_v28 }
 0x391   : > { %vm2431_vm15 = vmor %vm2215_vm9, %vm2331_vm8  ;;  %v7386_v9 = vsel %vm2427_vm12, 1.0, %v8056_v27  ;;  %vm1902_vm8 = vcmp.eq.s32.totalorder %v7365_v15, %v4754_v29  ;;  %vm2334_vm12 = vcmp.eq.s32.totalorder %v7365_v15, %v4769_v32  ;;  %v4472_v32 = vld [vmem:[%s7952_s1 + $0x14] ss:$8 sps:$4 sm:$0xff]  }
 0x392   : > { %v7391_v37 = vsel %vm2431_vm15, 1.0, %v8056_v27  ;;  %vm706_vm1 = vmor %vm490_vm10, %vm606_vm11  ;;  %vm2118_vm10 = vcmp.eq.s32.totalorder %v7365_v15, %v4761_v30  ;;  %vm492_vm15 = vcmp.eq.s32.totalorder %v7365_v15, %v4776_v33  ;;  %v4469_v30 = vld [vmem:[%s7952_s1] ss:$8 sps:$4 sm:$0xff]  }
 0x393   : > { %v2683_v18 = vpack.c.bf16 %v7391_v37, %v7386_v9  ;;  %vm922_vm3 = vmor %vm706_vm1, %vm822_vm14 }
 0x394   : > { %vm1138_vm5 = vmor %vm922_vm3, %vm1038_vm0  ;;  %vm608_vm0 = vcmp.eq.s32.totalorder %v7365_v15, %v4779_v34 }
 0x395   : > { %2975 = vmatpush1.bf16.msra.mxu1 %v2683_v18  ;;  %vm1354_vm7 = vmor %vm1138_vm5, %vm1254_vm2  ;;  %vm824_vm2 = vcmp.eq.s32.totalorder %v7365_v15, %v4786_v35  ;;  %vm2816_vm5 = vcmask 1043456   ;;  %v4474_v35 = vld [vmem:[%s7952_s1 + $0x10] ss:$8 sps:$4 sm:$0xff]  }
 0x396   : > { %vm1570_vm9 = vmor %vm1354_vm7, %vm1470_vm4  ;;  %vm1040_vm4 = vcmp.eq.s32.totalorder %v7365_v15, %v4795_v36  ;;  %vm1256_vm7 = vcmp.eq.s32.totalorder %v7365_v15, %v4807_v39  ;;  %v4475_v39 = vld [vmem:[%s7952_s1 + $0x24] ss:$8 sps:$4 sm:$0xff]  }
 0x397   : > { %vm1786_vm11 = vmor %vm1570_vm9, %vm1686_vm6  ;;  %vm1472_vm9 = vcmp.eq.s32.totalorder %v7365_v15, %v4819_v42  ;;  %v4477_v42 = vld [vmem:[%s7952_s1 + $0x20] ss:$8 sps:$4 sm:$0xff]  }
 0x398   : > { %vm2002_vm14 = vmor %vm1786_vm11, %vm1902_vm8  ;;  %vm1688_vm11 = vcmp.eq.s32.totalorder %v7365_v15, %v4826_v43  ;;  %v4478_v43 = vld [vmem:[%s7952_s1 + $0x34] ss:$8 sps:$4 sm:$0xff]  }
 0x399   : > { %vm2218_vm1 = vmor %vm2002_vm14, %vm2118_vm10  ;;  %vm1904_vm14 = vcmp.eq.s32.totalorder %v7365_v15, %v4834_v45  ;;  %v4480_v45 = vld [vmem:[%s7952_s1 + $0x30] ss:$8 sps:$4 sm:$0xff]  }
 0x39a   : > { %vm2434_vm3 = vmor %vm2218_vm1, %vm2334_vm12 }
 0x39b   : > { %v7416_v19 = vsel %vm2434_vm3, 1.0, %v8056_v27  ;;  %vm708_vm6 = vmor %vm492_vm15, %vm608_vm0  ;;  %vm2120_vm0 = vcmp.eq.s32.totalorder %v7365_v15, %v4841_v46  ;;  %v4481_v46 = vld [vmem:[%s7952_s1 + $0x44] ss:$8 sps:$4 sm:$0xff]  }
 0x39c   : > { %v2686_v20 = vpack.c.bf16 %v7416_v19, %v7416_v19  ;;  %vm924_vm8 = vmor %vm708_vm6, %vm824_vm2  ;;  %vm2336_vm2 = vcmp.eq.s32.totalorder %v7365_v15, %v4849_v48  ;;  %vm605_vm6 = vcmp.eq.s32.totalorder %v7365_v15, %v4859_v50  ;;  %v4483_v48 = vld [vmem:[%s7952_s1 + $0x40] ss:$8 sps:$4 sm:$0xff]   ;;  %v4486_v50 = vld [vmem:[%s7952_s1 + $0x50] ss:$8 sps:$4 sm:$0xff]  }
 0x39d   : > { %vm1140_vm10 = vmor %vm924_vm8, %vm1040_vm4  ;;  %vm489_vm4 = vcmp.eq.s32.totalorder %v7365_v15, %v4856_v49  ;;  %v4484_v49 = vld [vmem:[%s7952_s1 + $0x54] ss:$8 sps:$4 sm:$0xff]  }
 0x39e   : > { %4394 = vmatprep.subr.msk.bf16.mxu0 %vm2816_vm5, %v2686_v20  ;;  %vm1356_vm12 = vmor %vm1140_vm10, %vm1256_vm7  ;;  %vm821_vm7 = vcmp.eq.s32.totalorder %v7365_v15, %v4866_v51  ;;  %v4487_v51 = vld [vmem:[%s7952_s1 + $0x64] ss:$8 sps:$4 sm:$0xff]  }
 0x39f   : > { %vm1572_vm15 = vmor %vm1356_vm12, %vm1472_vm9  ;;  %vm1037_vm9 = vcmp.eq.s32.totalorder %v7365_v15, %v4875_v52  ;;  %vm1253_vm12 = vcmp.eq.s32.totalorder %v7365_v15, %v4887_v54  ;;  %v4489_v52 = vld [vmem:[%s7952_s1 + $0x60] ss:$8 sps:$4 sm:$0xff]   ;;  %v4490_v54 = vld [vmem:[%s7952_s1 + $0x74] ss:$8 sps:$4 sm:$0xff]  }
 0x3a0   : > { %vm1788_vm1 = vmor %vm1572_vm15, %vm1688_vm11  ;;  %vm1469_vm15 = vcmp.eq.s32.totalorder %v7365_v15, %v4899_v57  ;;  %v4492_v57 = vld [vmem:[%s7952_s1 + $0x70] ss:$8 sps:$4 sm:$0xff]  }
 0x3a1   : > { %vm2004_vm3 = vmor %vm1788_vm1, %vm1904_vm14  ;;  %vm1685_vm1 = vcmp.eq.s32.totalorder %v7365_v15, %v4906_v58  ;;  %v4493_v58 = vld [vmem:[%s7952_s1 + $0x84] ss:$8 sps:$4 sm:$0xff]  }
 0x3a2   : > { %vm2220_vm8 = vmor %vm2004_vm3, %vm2120_vm0  ;;  %vm1901_vm3 = vcmp.eq.s32.totalorder %v7365_v15, %v4914_v60  ;;  %v4495_v60 = vld [vmem:[%s7952_s1 + $0x80] ss:$8 sps:$4 sm:$0xff]  }
 0x3a3   : > { %vm2436_vm10 = vmor %vm2220_vm8, %vm2336_vm2 }
 0x3a4   : > { %v7442_v22 = vsel %vm2436_vm10, 1.0, %v8056_v27  ;;  %vm705_vm11 = vmor %vm489_vm4, %vm605_vm6  ;;  %vm2117_vm6 = vcmp.eq.s32.totalorder %v7365_v15, %v4921_v61  ;;  %v8128_v61 = vmov 0  }
 0x3a5   : > { %v2688_v23 = vpack.c.bf16 %v7442_v22, %v7442_v22  ;;  %vm921_vm14 = vmor %vm705_vm11, %vm821_vm7  ;;  %vm2333_vm7 = vcmp.eq.s32.totalorder %v7365_v15, %v4929_v63  ;;  %vm607_vm11 = vcmp.eq.s32.totalorder %v7365_v15, %v4939_v1  ;;  %v3504_v63 = vpop.permute.xlu0 %3503  ;;  %v3514_v1 = vpop.permute.xlu1 %3513 }
 0x3a6   : > { %vm1137_vm0 = vmor %vm921_vm14, %vm1037_vm9  ;;  %vm491_vm9 = vcmp.eq.s32.totalorder %v7365_v15, %v4936_v0 }
 0x3a7   : > { %4404 = vmatprep.subr.msk.bf16.mxu1 %vm2816_vm5, %v2688_v23  ;;  %vm1353_vm2 = vmor %vm1137_vm0, %vm1253_vm12  ;;  %vm823_vm12 = vcmp.eq.s32.totalorder %v7365_v15, %v4946_v2 }
 0x3a8   : > { %vm1569_vm4 = vmor %vm1353_vm2, %vm1469_vm15  ;;  %vm1039_vm15 = vcmp.eq.s32.totalorder %v7365_v15, %v4955_v3  ;;  %vm1255_vm2 = vcmp.eq.s32.totalorder %v7365_v15, %v4967_v5 }
 0x3a9   : > { %vm1785_vm8 = vmor %vm1569_vm4, %vm1685_vm1  ;;  %vm1471_vm4 = vcmp.eq.s32.totalorder %v7365_v15, %v4979_v8  ;;  %v3509_v5 = vpop.permute.xlu0 %3508  ;;  %v3519_v44 = vpop.permute.xlu1 %3518 }
 0x3aa   : > { %vm2001_vm10 = vmor %vm1785_vm8, %vm1901_vm3  ;;  %vm1687_vm8 = vcmp.eq.s32.totalorder %v7365_v15, %v4986_v11 }
 0x3ab   : > { %vm2217_vm14 = vmor %vm2001_vm10, %vm2117_vm6  ;;  %vm1903_vm10 = vcmp.eq.s32.totalorder %v7365_v15, %v4994_v16 }
 0x3ac   : > { %vm2433_vm0 = vmor %vm2217_vm14, %vm2333_vm7 }
 0x3ad   : > { %v7468_v25 = vsel %vm2433_vm0, 1.0, %v8056_v27  ;;  %vm707_vm1 = vmor %vm491_vm9, %vm607_vm11  ;;  %vm2119_vm11 = vcmp.eq.s32.totalorder %v7365_v15, %v5001_v17 }
 0x3ae   : > { %v2685_v28 = vpack.c.bf16 %v7468_v25, %v7468_v25  ;;  %vm923_vm3 = vmor %vm707_vm1, %vm823_vm12  ;;  %vm2335_vm12 = vcmp.eq.s32.totalorder %v7365_v15, %v5008_v21 }
 0x3af   : > { %vm1139_vm6 = vmor %vm923_vm3, %vm1039_vm15 }
 0x3b0   : > { %v2818_v29 = vsel %vm2816_vm5, %v2685_v28, 0  ;;  %vm1355_vm7 = vmor %vm1139_vm6, %vm1255_vm2 }
 0x3b1   : > { %2854 = vmatpush1.bf16.msra.mxu0 %v2818_v29  ;;  %vm1571_vm9 = vmor %vm1355_vm7, %vm1471_vm4 }
 0x3b2   : > { %vm1787_vm14 = vmor %vm1571_vm9, %vm1687_vm8 }
 0x3b3   : > { %vm2003_vm0 = vmor %vm1787_vm14, %vm1903_vm10 }
 0x3b4   : > { %vm2219_vm15 = vmor %vm2003_vm0, %vm2119_vm11  ;;  %2862 = vmatmul.mubr.bf16.vlgmr.msra.gmra.mrb[0].mxu0 %v4469_v30 }
 0x3b5   : > { %vm2435_vm1 = vmor %vm2219_vm15, %vm2335_vm12  ;;  %4396 = vmatprep.mubr.msk.bf16.mxu0 %vm2788_vm13, %v4472_v32 }
 0x3b6   : > { %v7493_v33 = vsel %vm2435_vm1, 1.0, %v8056_v27 }
 0x3b7   : > { %v2687_v34 = vpack.c.bf16 %v7493_v33, %v7493_v33 }
 0x3b9   : > { %v2824_v36 = vsel %vm2816_vm5, %v2687_v34, 0 }
 0x3ba   : > { %2977 = vmatpush1.bf16.msra.mxu1 %v2824_v36 }
 0x3bc   : > { %2872 = vmatmul.mubr.bf16.gmra.mrb[4].mxu0 %v4474_v35 }
 0x3bd   : > { %2985 = vmatmul.mubr.bf16.vlgmr.msra.gmra.mrb[0].mxu1 %v4469_v30  ;;  %4397 = vmatprep.mubr.msk.bf16.mxu0 %vm2788_vm13, %v4475_v39 }
 0x3be   : > { %4406 = vmatprep.mubr.msk.bf16.mxu1 %vm2788_vm13, %v4472_v32 }
 0x3c4   : > { %2882 = vmatmul.mubr.bf16.gmra.mrb[8].mxu0 %v4477_v42 }
 0x3c5   : > { %2995 = vmatmul.mubr.bf16.gmra.mrb[4].mxu1 %v4474_v35  ;;  %4398 = vmatprep.mubr.msk.bf16.mxu0 %vm2788_vm13, %v4478_v43 }
 0x3c6   : > { %4407 = vmatprep.mubr.msk.bf16.mxu1 %vm2788_vm13, %v4475_v39 }
 0x3cc   : > { %2892 = vmatmul.mubr.bf16.gmra.mrb[12].mxu0 %v4480_v45 }
 0x3cd   : > { %3005 = vmatmul.mubr.bf16.gmra.mrb[8].mxu1 %v4477_v42  ;;  %4399 = vmatprep.mubr.msk.bf16.mxu0 %vm2788_vm13, %v4481_v46 }
 0x3ce   : > { %4408 = vmatprep.mubr.msk.bf16.mxu1 %vm2788_vm13, %v4478_v43 }
 0x3d4   : > { %2902 = vmatmul.mubr.bf16.gmra.mrb[16].mxu0 %v4483_v48 }
 0x3d5   : > { %3015 = vmatmul.mubr.bf16.gmra.mrb[12].mxu1 %v4480_v45  ;;  %4400 = vmatprep.mubr.msk.bf16.mxu0 %vm2788_vm13, %v4484_v49 }
 0x3d6   : > { %4409 = vmatprep.mubr.msk.bf16.mxu1 %vm2788_vm13, %v4481_v46 }
 0x3dc   : > { %2912 = vmatmul.mubr.bf16.gmra.mrb[20].mxu0 %v4486_v50 }
 0x3dd   : > { %3025 = vmatmul.mubr.bf16.gmra.mrb[16].mxu1 %v4483_v48  ;;  %4401 = vmatprep.mubr.msk.bf16.mxu0 %vm2788_vm13, %v4487_v51 }
 0x3de   : > { %4410 = vmatprep.mubr.msk.bf16.mxu1 %vm2788_vm13, %v4484_v49 }
 0x3e4   : > { %2922 = vmatmul.mubr.bf16.gmra.mrb[24].mxu0 %v4489_v52 }
 0x3e5   : > { %3035 = vmatmul.mubr.bf16.gmra.mrb[20].mxu1 %v4486_v50  ;;  %4402 = vmatprep.mubr.msk.bf16.mxu0 %vm2788_vm13, %v4490_v54 }
 0x3e6   : > { %4411 = vmatprep.mubr.msk.bf16.mxu1 %vm2788_vm13, %v4487_v51 }
 0x3ec   : > { %2932 = vmatmul.mubr.bf16.gmra.mrb[28].mxu0 %v4492_v57 }
 0x3ed   : > { %3045 = vmatmul.mubr.bf16.gmra.mrb[24].mxu1 %v4489_v52  ;;  %4403 = vmatprep.mubr.msk.bf16.mxu0 %vm2788_vm13, %v4493_v58 }
 0x3ee   : > { %4412 = vmatprep.mubr.msk.bf16.mxu1 %vm2788_vm13, %v4490_v54 }
 0x3f4   : > { %2942 = vmatmul.mubr.bf16.gmra.mrb[32].mxu0 %v4495_v60 }
 0x3f5   : > { %3055 = vmatmul.mubr.bf16.gmra.mrb[28].mxu1 %v4492_v57  ;;  %3853 = vmatprep.mubr.bf16.mxu0 %v8128_v61 }
 0x3f6   : > { %4413 = vmatprep.mubr.msk.bf16.mxu1 %vm2788_vm13, %v4493_v58 }
 0x3fd   : > { %3065 = vmatmul.mubr.bf16.gmra.mrb[32].mxu1 %v4495_v60  ;;  %v3524_v60 = vpop.permute.xlu0 %3523 }
 0x3fe   : > { %3926 = vmatprep.mubr.bf16.mxu1 %v8128_v61 }
 0x487   : > { %v2863_v0 = vpop.f32.mrb[0].mxu0 }
 0x488   : > { %v3581_v2 = vadd.f32 %v3504_v63, %v2863_v0  ;;  %v2865_v3 = vpop.f32.mrb[1].mxu0 }
 0x489   : > { %v3582_v8 = vadd.f32 %v3504_v63, %v2865_v3  ;;  %v2867_v11 = vpop.f32.mrb[2].mxu0 }
 0x48a   : > { %v3585_v16 = vadd.f32 %v3509_v5, %v2867_v11  ;;  %v2869_v17 = vpop.f32.mrb[3].mxu0  ;;  %v3645_v27 = vmax.f32 %v3581_v2, 0.0 }
 0x48b   : > { %v3586_v21 = vadd.f32 %v3509_v5, %v2869_v17  ;;  %v3646_v15 = vmax.f32 %v3582_v8, 0.0  ;;  %v3529_v8 = vpop.permute.xlu1 %3528 }
 0x48c   : > { %v3649_v26 = vmax.f32 %v3585_v16, 0.0 }
 0x48d   : > { %v3650_v56 = vmax.f32 %v3586_v21, 0.0 }
 0x48e   : > { %v3717_v59 = vpack.c.bf16 %v3649_v26, %v3645_v27 }
 0x48f   : > { %v3718_v18 = vpack.c.bf16 %v3650_v56, %v3646_v15  ;;  %v2873_v20 = vpop.f32.mrb[4].mxu0 }
 0x490   : > { %v2986_v23 = vpop.f32.mrb[0].mxu1  ;;  %v3589_v28 = vadd.f32 %v3514_v1, %v2873_v20  ;;  %v2875_v29 = vpop.f32.mrb[5].mxu0 }
 0x491   : > { %v3583_v30 = vadd.f32 %v3504_v63, %v2986_v23  ;;  %v2988_v32 = vpop.f32.mrb[1].mxu1  ;;  %v3590_v34 = vadd.f32 %v3514_v1, %v2875_v29  ;;  %v2877_v35 = vpop.f32.mrb[6].mxu0  ;;  %3821 = vmatprep.subr.bf16.mxu0 %v3718_v18 }
 0x492   : > { %v3584_v36 = vadd.f32 %v3504_v63, %v2988_v32  ;;  %v2990_v39 = vpop.f32.mrb[2].mxu1  ;;  %v3593_v42 = vadd.f32 %v3519_v44, %v2877_v35  ;;  %v2879_v43 = vpop.f32.mrb[7].mxu0  ;;  %3822 = vmatpush1.bf16.msra.mxu0 %v3717_v59  ;;  %v3653_v50 = vmax.f32 %v3589_v28, 0.0 }
 0x493   : > { %v3587_v45 = vadd.f32 %v3509_v5, %v2990_v39  ;;  %v2992_v46 = vpop.f32.mrb[3].mxu1  ;;  %v3594_v48 = vadd.f32 %v3519_v44, %v2879_v43  ;;  %v3647_v52 = vmax.f32 %v3583_v30, 0.0  ;;  %v3654_v57 = vmax.f32 %v3590_v34, 0.0 }
 0x494   : > { %v3588_v49 = vadd.f32 %v3509_v5, %v2992_v46  ;;  %v3657_v51 = vmax.f32 %v3593_v42, 0.0  ;;  %v3648_v0 = vmax.f32 %v3584_v36, 0.0  ;;  %v3534_v46 = vpop.permute.xlu0 %3533 }
 0x495   : > { %v3651_v54 = vmax.f32 %v3587_v45, 0.0  ;;  %v3658_v58 = vmax.f32 %v3594_v48, 0.0 }
 0x496   : > { %v3652_v2 = vmax.f32 %v3588_v49, 0.0  ;;  %v3721_v3 = vpack.c.bf16 %v3657_v51, %v3653_v50  ;;  %v3539_v50 = vpop.permute.xlu1 %3538 }
 0x497   : > { %v3719_v63 = vpack.c.bf16 %v3651_v54, %v3647_v52  ;;  %v3722_v11 = vpack.c.bf16 %v3658_v58, %v3654_v57  ;;  %v2883_v16 = vpop.f32.mrb[8].mxu0 }
 0x498   : > { %v3720_v17 = vpack.c.bf16 %v3652_v2, %v3648_v0  ;;  %v2996_v21 = vpop.f32.mrb[4].mxu1  ;;  %v3597_v27 = vadd.f32 %v3524_v60, %v2883_v16  ;;  %v2885_v26 = vpop.f32.mrb[9].mxu0 }
 0x499   : > { %v3591_v15 = vadd.f32 %v3514_v1, %v2996_v21  ;;  %v2998_v5 = vpop.f32.mrb[5].mxu1  ;;  %v3598_v56 = vadd.f32 %v3524_v60, %v2885_v26  ;;  %v2887_v59 = vpop.f32.mrb[10].mxu0  ;;  %3823 = vmatprep.subr.bf16.mxu0 %v3722_v11 }
 0x49a   : > { %v3592_v18 = vadd.f32 %v3514_v1, %v2998_v5  ;;  %v3000_v20 = vpop.f32.mrb[6].mxu1  ;;  %3894 = vmatprep.subr.bf16.mxu1 %v3720_v17  ;;  %v3601_v23 = vadd.f32 %v3529_v8, %v2887_v59  ;;  %v2889_v28 = vpop.f32.mrb[11].mxu0  ;;  %3824 = vmatpush1.bf16.msra.mxu0 %v3721_v3  ;;  %v3661_v35 = vmax.f32 %v3597_v27, 0.0 }
 0x49b   : > { %v3595_v29 = vadd.f32 %v3519_v44, %v3000_v20  ;;  %v3002_v30 = vpop.f32.mrb[7].mxu1  ;;  %3895 = vmatpush1.bf16.msra.mxu1 %v3719_v63  ;;  %v3602_v32 = vadd.f32 %v3529_v8, %v2889_v28  ;;  %v3655_v39 = vmax.f32 %v3591_v15, 0.0  ;;  %v3662_v43 = vmax.f32 %v3598_v56, 0.0 }
 0x49c   : > { %v3596_v34 = vadd.f32 %v3519_v44, %v3002_v30  ;;  %v3665_v36 = vmax.f32 %v3601_v23, 0.0  ;;  %v3656_v48 = vmax.f32 %v3592_v18, 0.0  ;;  %v3544_v30 = vpop.permute.xlu0 %3543 }
 0x49d   : > { %v3659_v42 = vmax.f32 %v3595_v29, 0.0  ;;  %v3666_v45 = vmax.f32 %v3602_v32, 0.0 }
 0x49e   : > { %v3660_v49 = vmax.f32 %v3596_v34, 0.0  ;;  %v3725_v1 = vpack.c.bf16 %v3665_v36, %v3661_v35  ;;  %v3549_v35 = vpop.permute.xlu1 %3548 }
 0x49f   : > { %v3723_v51 = vpack.c.bf16 %v3659_v42, %v3655_v39  ;;  %v3726_v52 = vpack.c.bf16 %v3666_v45, %v3662_v43  ;;  %v2893_v54 = vpop.f32.mrb[12].mxu0 }
 0x4a0   : > { %v3724_v57 = vpack.c.bf16 %v3660_v49, %v3656_v48  ;;  %v3006_v58 = vpop.f32.mrb[8].mxu1  ;;  %v3605_v0 = vadd.f32 %v3534_v46, %v2893_v54  ;;  %v2895_v2 = vpop.f32.mrb[13].mxu0 }
 0x4a1   : > { %v3599_v3 = vadd.f32 %v3524_v60, %v3006_v58  ;;  %v3008_v44 = vpop.f32.mrb[9].mxu1  ;;  %v3606_v63 = vadd.f32 %v3534_v46, %v2895_v2  ;;  %v2897_v11 = vpop.f32.mrb[14].mxu0  ;;  %3825 = vmatprep.subr.bf16.mxu0 %v3726_v52 }
 0x4a2   : > { %v3600_v16 = vadd.f32 %v3524_v60, %v3008_v44  ;;  %v3010_v17 = vpop.f32.mrb[10].mxu1  ;;  %3896 = vmatprep.subr.bf16.mxu1 %v3724_v57  ;;  %v3609_v21 = vadd.f32 %v3539_v50, %v2897_v11  ;;  %v2899_v27 = vpop.f32.mrb[15].mxu0  ;;  %3826 = vmatpush1.bf16.msra.mxu0 %v3725_v1  ;;  %v3669_v59 = vmax.f32 %v3605_v0, 0.0 }
 0x4a3   : > { %v3603_v26 = vadd.f32 %v3529_v8, %v3010_v17  ;;  %v3012_v15 = vpop.f32.mrb[11].mxu1  ;;  %3897 = vmatpush1.bf16.msra.mxu1 %v3723_v51  ;;  %v3610_v5 = vadd.f32 %v3539_v50, %v2899_v27  ;;  %v3663_v20 = vmax.f32 %v3599_v3, 0.0  ;;  %v3670_v28 = vmax.f32 %v3606_v63, 0.0 }
 0x4a4   : > { %v3604_v56 = vadd.f32 %v3529_v8, %v3012_v15  ;;  %v3673_v18 = vmax.f32 %v3609_v21, 0.0  ;;  %v3664_v32 = vmax.f32 %v3600_v16, 0.0  ;;  %v3554_v15 = vpop.permute.xlu0 %3553 }
 0x4a5   : > { %v3667_v23 = vmax.f32 %v3603_v26, 0.0  ;;  %v3674_v29 = vmax.f32 %v3610_v5, 0.0 }
 0x4a6   : > { %v3668_v34 = vmax.f32 %v3604_v56, 0.0  ;;  %v3729_v60 = vpack.c.bf16 %v3673_v18, %v3669_v59  ;;  %v3559_v59 = vpop.permute.xlu1 %3558 }
 0x4a7   : > { %v3727_v36 = vpack.c.bf16 %v3667_v23, %v3663_v20  ;;  %v3730_v39 = vpack.c.bf16 %v3674_v29, %v3670_v28  ;;  %v2903_v42 = vpop.f32.mrb[16].mxu0 }
 0x4a8   : > { %v3728_v43 = vpack.c.bf16 %v3668_v34, %v3664_v32  ;;  %v3016_v45 = vpop.f32.mrb[12].mxu1  ;;  %v3613_v48 = vadd.f32 %v3544_v30, %v2903_v42  ;;  %v2905_v49 = vpop.f32.mrb[17].mxu0 }
 0x4a9   : > { %v3607_v1 = vadd.f32 %v3534_v46, %v3016_v45  ;;  %v3018_v8 = vpop.f32.mrb[13].mxu1  ;;  %v3614_v51 = vadd.f32 %v3544_v30, %v2905_v49  ;;  %v2907_v52 = vpop.f32.mrb[18].mxu0  ;;  %3827 = vmatprep.subr.bf16.mxu0 %v3730_v39 }
 0x4aa   : > { %v3608_v54 = vadd.f32 %v3534_v46, %v3018_v8  ;;  %v3020_v57 = vpop.f32.mrb[14].mxu1  ;;  %3898 = vmatprep.subr.bf16.mxu1 %v3728_v43  ;;  %v3617_v58 = vadd.f32 %v3549_v35, %v2907_v52  ;;  %v2909_v0 = vpop.f32.mrb[19].mxu0  ;;  %3828 = vmatpush1.bf16.msra.mxu0 %v3729_v60  ;;  %v3677_v11 = vmax.f32 %v3613_v48, 0.0 }
 0x4ab   : > { %v3611_v2 = vadd.f32 %v3539_v50, %v3020_v57  ;;  %v3022_v3 = vpop.f32.mrb[15].mxu1  ;;  %3899 = vmatpush1.bf16.msra.mxu1 %v3727_v36  ;;  %v3618_v44 = vadd.f32 %v3549_v35, %v2909_v0  ;;  %v3671_v17 = vmax.f32 %v3607_v1, 0.0  ;;  %v3678_v27 = vmax.f32 %v3614_v51, 0.0 }
 0x4ac   : > { %v3612_v63 = vadd.f32 %v3539_v50, %v3022_v3  ;;  %v3681_v16 = vmax.f32 %v3617_v58, 0.0  ;;  %v3672_v5 = vmax.f32 %v3608_v54, 0.0  ;;  %v3564_v3 = vpop.permute.xlu0 %3563 }
 0x4ad   : > { %v3675_v21 = vmax.f32 %v3611_v2, 0.0  ;;  %v3682_v26 = vmax.f32 %v3618_v44, 0.0 }
 0x4ae   : > { %v3676_v56 = vmax.f32 %v3612_v63, 0.0  ;;  %v3733_v46 = vpack.c.bf16 %v3681_v16, %v3677_v11  ;;  %v3569_v11 = vpop.permute.xlu1 %3568 }
 0x4af   : > { %v3731_v18 = vpack.c.bf16 %v3675_v21, %v3671_v17  ;;  %v3734_v20 = vpack.c.bf16 %v3682_v26, %v3678_v27  ;;  %v2913_v23 = vpop.f32.mrb[20].mxu0 }
 0x4b0   : > { %v3732_v28 = vpack.c.bf16 %v3676_v56, %v3672_v5  ;;  %v3026_v29 = vpop.f32.mrb[16].mxu1  ;;  %v3621_v32 = vadd.f32 %v3554_v15, %v2913_v23  ;;  %v2915_v34 = vpop.f32.mrb[21].mxu0 }
 0x4b1   : > { %v3615_v60 = vadd.f32 %v3544_v30, %v3026_v29  ;;  %v3028_v50 = vpop.f32.mrb[17].mxu1  ;;  %v3622_v36 = vadd.f32 %v3554_v15, %v2915_v34  ;;  %v2917_v39 = vpop.f32.mrb[22].mxu0  ;;  %3829 = vmatprep.subr.bf16.mxu0 %v3734_v20 }
 0x4b2   : > { %v3616_v42 = vadd.f32 %v3544_v30, %v3028_v50  ;;  %v3030_v43 = vpop.f32.mrb[18].mxu1  ;;  %3900 = vmatprep.subr.bf16.mxu1 %v3732_v28  ;;  %v3625_v45 = vadd.f32 %v3559_v59, %v2917_v39  ;;  %v2919_v48 = vpop.f32.mrb[23].mxu0  ;;  %3830 = vmatpush1.bf16.msra.mxu0 %v3733_v46  ;;  %v3685_v52 = vmax.f32 %v3621_v32, 0.0 }
 0x4b3   : > { %v3619_v49 = vadd.f32 %v3549_v35, %v3030_v43  ;;  %v3032_v1 = vpop.f32.mrb[19].mxu1  ;;  %3901 = vmatpush1.bf16.msra.mxu1 %v3731_v18  ;;  %v3626_v8 = vadd.f32 %v3559_v59, %v2919_v48  ;;  %v3679_v57 = vmax.f32 %v3615_v60, 0.0  ;;  %v3686_v0 = vmax.f32 %v3622_v36, 0.0 }
 0x4b4   : > { %v3620_v51 = vadd.f32 %v3549_v35, %v3032_v1  ;;  %v3689_v54 = vmax.f32 %v3625_v45, 0.0  ;;  %v3680_v44 = vmax.f32 %v3616_v42, 0.0  ;;  %v3574_v1 = vpop.permute.xlu0 %3573 }
 0x4b5   : > { %v3683_v58 = vmax.f32 %v3619_v49, 0.0  ;;  %v3690_v2 = vmax.f32 %v3626_v8, 0.0 }
 0x4b6   : > { %v3684_v63 = vmax.f32 %v3620_v51, 0.0  ;;  %v3737_v30 = vpack.c.bf16 %v3689_v54, %v3685_v52  ;;  %v3579_v52 = vpop.permute.xlu1 %3578 }
 0x4b7   : > { %v3735_v16 = vpack.c.bf16 %v3683_v58, %v3679_v57  ;;  %v3738_v17 = vpack.c.bf16 %v3690_v2, %v3686_v0  ;;  %v2923_v21 = vpop.f32.mrb[24].mxu0 }
 0x4b8   : > { %v3736_v27 = vpack.c.bf16 %v3684_v63, %v3680_v44  ;;  %v3036_v26 = vpop.f32.mrb[20].mxu1  ;;  %v3629_v5 = vadd.f32 %v3564_v3, %v2923_v21  ;;  %v2925_v56 = vpop.f32.mrb[25].mxu0 }
 0x4b9   : > { %v3623_v46 = vadd.f32 %v3554_v15, %v3036_v26  ;;  %v3038_v35 = vpop.f32.mrb[21].mxu1  ;;  %v3630_v18 = vadd.f32 %v3564_v3, %v2925_v56  ;;  %v2927_v20 = vpop.f32.mrb[26].mxu0  ;;  %3831 = vmatprep.subr.bf16.mxu0 %v3738_v17 }
 0x4ba   : > { %v3624_v23 = vadd.f32 %v3554_v15, %v3038_v35  ;;  %v3040_v28 = vpop.f32.mrb[22].mxu1  ;;  %3902 = vmatprep.subr.bf16.mxu1 %v3736_v27  ;;  %v3633_v29 = vadd.f32 %v3569_v11, %v2927_v20  ;;  %v2929_v32 = vpop.f32.mrb[27].mxu0  ;;  %3832 = vmatpush1.bf16.msra.mxu0 %v3737_v30  ;;  %v3693_v39 = vmax.f32 %v3629_v5, 0.0 }
 0x4bb   : > { %v3627_v34 = vadd.f32 %v3559_v59, %v3040_v28  ;;  %v3042_v60 = vpop.f32.mrb[23].mxu1  ;;  %3903 = vmatpush1.bf16.msra.mxu1 %v3735_v16  ;;  %v3634_v50 = vadd.f32 %v3569_v11, %v2929_v32  ;;  %v3687_v43 = vmax.f32 %v3623_v46, 0.0  ;;  %v3694_v48 = vmax.f32 %v3630_v18, 0.0 }
 0x4bc   : > { %v3628_v36 = vadd.f32 %v3559_v59, %v3042_v60  ;;  %v3697_v42 = vmax.f32 %v3633_v29, 0.0  ;;  %v3688_v8 = vmax.f32 %v3624_v23, 0.0 }
 0x4bd   : > { %v3691_v45 = vmax.f32 %v3627_v34, 0.0  ;;  %v3698_v49 = vmax.f32 %v3634_v50, 0.0 }
 0x4be   : > { %v3692_v51 = vmax.f32 %v3628_v36, 0.0  ;;  %v3741_v15 = vpack.c.bf16 %v3697_v42, %v3693_v39 }
 0x4bf   : > { %v3739_v54 = vpack.c.bf16 %v3691_v45, %v3687_v43  ;;  %v3742_v57 = vpack.c.bf16 %v3698_v49, %v3694_v48  ;;  %v2933_v58 = vpop.f32.mrb[28].mxu0 }
 0x4c0   : > { %v3740_v0 = vpack.c.bf16 %v3692_v51, %v3688_v8  ;;  %v3046_v2 = vpop.f32.mrb[24].mxu1  ;;  %v3637_v44 = vadd.f32 %v3574_v1, %v2933_v58  ;;  %v2935_v63 = vpop.f32.mrb[29].mxu0 }
 0x4c1   : > { %v3631_v30 = vadd.f32 %v3564_v3, %v3046_v2  ;;  %v3048_v59 = vpop.f32.mrb[25].mxu1  ;;  %v3638_v16 = vadd.f32 %v3574_v1, %v2935_v63  ;;  %v2937_v17 = vpop.f32.mrb[30].mxu0  ;;  %3833 = vmatprep.subr.bf16.mxu0 %v3742_v57 }
 0x4c2   : > { %v3632_v21 = vadd.f32 %v3564_v3, %v3048_v59  ;;  %v3050_v27 = vpop.f32.mrb[26].mxu1  ;;  %3904 = vmatprep.subr.bf16.mxu1 %v3740_v0  ;;  %v3641_v26 = vadd.f32 %v3579_v52, %v2937_v17  ;;  %v2939_v5 = vpop.f32.mrb[31].mxu0  ;;  %3834 = vmatpush1.bf16.msra.mxu0 %v3741_v15  ;;  %v3701_v20 = vmax.f32 %v3637_v44, 0.0 }
 0x4c3   : > { %v3635_v56 = vadd.f32 %v3569_v11, %v3050_v27  ;;  %v3052_v46 = vpop.f32.mrb[27].mxu1  ;;  %3905 = vmatpush1.bf16.msra.mxu1 %v3739_v54  ;;  %v3642_v35 = vadd.f32 %v3579_v52, %v2939_v5  ;;  %v3695_v28 = vmax.f32 %v3631_v30, 0.0  ;;  %v3702_v32 = vmax.f32 %v3638_v16, 0.0  ;;  %v4496_v54 = vld [vmem:[%s7955_s4] sm:$0xff]  }
 0x4c4   : > { %v3636_v18 = vadd.f32 %v3569_v11, %v3052_v46  ;;  %v3705_v23 = vmax.f32 %v3641_v26, 0.0  ;;  %v3696_v60 = vmax.f32 %v3632_v21, 0.0 }
 0x4c5   : > { %v3699_v29 = vmax.f32 %v3635_v56, 0.0  ;;  %v3706_v34 = vmax.f32 %v3642_v35, 0.0 }
 0x4c6   : > { %v3700_v50 = vmax.f32 %v3636_v18, 0.0  ;;  %v3745_v36 = vpack.c.bf16 %v3705_v23, %v3701_v20 }
 0x4c7   : > { %v3743_v3 = vpack.c.bf16 %v3699_v29, %v3695_v28  ;;  %v3746_v39 = vpack.c.bf16 %v3706_v34, %v3702_v32  ;;  %v2943_v42 = vpop.f32.mrb[32].mxu0 }
 0x4c8   : > { %v3744_v43 = vpack.c.bf16 %v3700_v50, %v3696_v60  ;;  %v3056_v45 = vpop.f32.mrb[28].mxu1  ;;  %v3445_v48 = vmul.f32 %v2943_v42, %v2943_v42  ;;  %v2945_v49 = vpop.f32.mrb[33].mxu0  ;;  %v4498_v50 = vld [vmem:[%s7955_s4 + $0x10] sm:$0xff]  }
 0x4c9   : > { %v3639_v8 = vadd.f32 %v3574_v1, %v3056_v45  ;;  %v3058_v51 = vpop.f32.mrb[29].mxu1  ;;  %v3446_v15 = vmul.f32 %v2945_v49, %v2945_v49  ;;  %v2947_v11 = vpop.f32.mrb[34].mxu0  ;;  %3835 = vmatprep.subr.bf16.mxu0 %v3746_v39 }
 0x4ca   : > { %v3640_v57 = vadd.f32 %v3574_v1, %v3058_v51  ;;  %v3060_v58 = vpop.f32.mrb[30].mxu1  ;;  %3906 = vmatprep.subr.bf16.mxu1 %v3744_v43  ;;  %v3449_v0 = vmul.f32 %v2947_v11, %v2947_v11  ;;  %v2949_v2 = vpop.f32.mrb[35].mxu0  ;;  %3836 = vmatpush1.bf16.msra.mxu0 %v3745_v36  ;;  %v4499_v36 = vld [vmem:[%s7955_s4 + $0x18] sm:$0xff]  }
 0x4cb   : > { %v3643_v44 = vadd.f32 %v3579_v52, %v3060_v58  ;;  %v3062_v63 = vpop.f32.mrb[31].mxu1  ;;  %3907 = vmatpush1.bf16.msra.mxu1 %v3743_v3  ;;  %v3450_v30 = vmul.f32 %v2949_v2, %v2949_v2  ;;  %v3703_v17 = vmax.f32 %v3639_v8, 0.0  ;;  %v3103_v3 = vpop.permute.xlu0 %3102 }
 0x4cc   : > { %v3644_v59 = vadd.f32 %v3579_v52, %v3062_v63  ;;  %v7563_v16 = vadd.f32 %v3449_v0, %v3445_v48  ;;  %v3704_v26 = vmax.f32 %v3640_v57, 0.0  ;;  %v4497_v52 = vld [vmem:[%s7955_s4 + $0x8] sm:$0xff]   ;;  %v3108_v42 = vpop.permute.xlu1 %3107  ;;  %v3225_v51 = vmul.f32 %v4962_v4, %v3103_v3 }
 0x4cd   : > { %v3707_v21 = vmax.f32 %v3643_v44, 0.0  ;;  %v7565_v27 = vadd.f32 %v3450_v30, %v3446_v15  ;;  %3854 = vmatmul.mubr.bf16.vlgmr.msra.gmra.mrb[36].mxu0 %v4496_v54  ;;  %v3226_v15 = vmul.f32 %v4802_v38, %v3103_v3  ;;  %v3229_v11 = vmul.f32 %v4970_v6, %v3108_v42 }
 0x4ce   : > { %v3708_v5 = vmax.f32 %v3644_v59, 0.0  ;;  %3863 = vmatprep.mubr.bf16.mxu0 %v8128_v61  ;;  %v3227_v63 = vmul.f32 %v5035_v14, %v3103_v3  ;;  %v3228_v4 = vmul.f32 %v4882_v53, %v3103_v3  ;;  %v3231_v38 = vmul.f32 %v5040_v12, %v3108_v42  ;;  %v8129_v53 = vld [vmem:[#allocation14_spill] sm:$0xff]  ;;  %v8135_v3 = vld [vmem:[#allocation16_spill] sm:$0xff] }
 0x4cf   : > { %v3747_v1 = vpack.c.bf16 %v3707_v21, %v3703_v17  ;;  %v3113_v39 = vpop.permute.xlu0 %3112  ;;  %v3325_v0 = vadd.f32 %v3229_v11, %v3225_v51  ;;  %v3232_v6 = vmul.f32 %v4890_v55, %v3108_v42 }
 0x4d0   : > { %v3748_v56 = vpack.c.bf16 %v3708_v5, %v3704_v26  ;;  %v3066_v46 = vpop.f32.mrb[32].mxu1  ;;  %v3118_v45 = vpop.permute.xlu1 %3117  ;;  %v3234_v58 = vmul.f32 %v5083_v31, %v3113_v39  ;;  %v3235_v17 = vmul.f32 %v5233_v24, %v3113_v39  ;;  %v3236_v21 = vmul.f32 %v5131_v47, %v3113_v39 }
 0x4d1   : > { %v3447_v35 = vmul.f32 %v3066_v46, %v3066_v46  ;;  %v3068_v18 = vpop.f32.mrb[33].mxu1  ;;  %v3385_v26 = vadd.f32 %v3231_v38, %v3227_v63  ;;  %v3415_v14 = vadd.f32 %v3232_v6, %v3228_v4  ;;  %v8139_v4 = vld [vmem:[#allocation17_spill] sm:$0xff] }
 0x4d2   : > { %v3448_v20 = vmul.f32 %v3068_v18, %v3068_v18  ;;  %v3070_v23 = vpop.f32.mrb[34].mxu1  ;;  %3908 = vmatprep.subr.bf16.mxu1 %v3748_v56  ;;  %v8132_v18 = vld [vmem:[#allocation8_spill] sm:$0xff]  ;;  %v8140_v6 = vld [vmem:[#allocation13_spill] sm:$0xff] }
 0x4d3   : > { %v3451_v28 = vmul.f32 %v3070_v23, %v3070_v23  ;;  %v3072_v29 = vpop.f32.mrb[35].mxu1  ;;  %3909 = vmatpush1.bf16.msra.mxu1 %v3747_v1  ;;  %v3123_v43 = vpop.permute.xlu0 %3122  ;;  %v8130_v1 = vld [vmem:[#allocation10_spill] sm:$0xff]  ;;  %v3416_v24 = vadd.f32 %v3415_v14, %v3236_v21  ;;  %v8133_v23 = vld [vmem:[#allocation15_spill] sm:$0xff] }
 0x4d4   : > { %v3452_v32 = vmul.f32 %v3072_v29, %v3072_v29  ;;  %v3128_v49 = vpop.permute.xlu1 %3127  ;;  %v3241_v12 = vmul.f32 %v8129_v53, %v3123_v43  ;;  %v3242_v55 = vmul.f32 %v8130_v1, %v3123_v43  ;;  %v8142_v21 = vld [vmem:[#allocation19_spill] sm:$0xff]  ;;  %v8143_v1 = vld [vmem:[#allocation24_spill] sm:$0xff] }
 0x4d5   : > { %v7571_v34 = vadd.f32 %v3451_v28, %v3447_v35  ;;  %3864 = vmatmul.mubr.bf16.gmra.mrb[40].mxu0 %v4497_v52  ;;  %v3245_v47 = vmul.f32 %v8133_v23, %v3128_v49  ;;  %v8134_v28 = vld [vmem:[#allocation11_spill] sm:$0xff]  ;;  %v3247_v38 = vmul.f32 %v8139_v4, %v3128_v49 }
 0x4d6   : > { %v7573_v60 = vadd.f32 %v3452_v32, %v3448_v20  ;;  %3927 = vmatmul.mubr.bf16.vlgmr.msra.gmra.mrb[36].mxu1 %v4496_v54  ;;  %3873 = vmatprep.mubr.bf16.mxu0 %v8128_v61  ;;  %v3230_v54 = vmul.f32 %v4810_v40, %v3108_v42  ;;  %v3237_v40 = vmul.f32 %v5184_v7, %v3118_v45  ;;  %v8131_v7 = vld [vmem:[#allocation9_spill] sm:$0xff]  ;;  %v8136_v42 = vld [vmem:[#allocation12_spill] sm:$0xff] }
 0x4d7   : > { %3936 = vmatprep.mubr.bf16.mxu1 %v8128_v61  ;;  %v3133_v48 = vpop.permute.xlu0 %3132  ;;  %v3386_v20 = vadd.f32 %v3385_v26, %v3235_v17  ;;  %v3246_v29 = vmul.f32 %v8134_v28, %v3128_v49  ;;  %v3244_v51 = vmul.f32 %v8136_v42, %v3123_v43  ;;  %v8147_v28 = vld [vmem:[#allocation25_spill] sm:$0xff]  ;;  %v8149_v42 = vld [vmem:[#allocation31_spill] sm:$0xff] }
 0x4d8   : > { %v7592_v57 = vpop.permute.xlu1 %3137  ;;  %v3355_v2 = vadd.f32 %v3230_v54, %v3226_v15 }
 0x4d9   : > { %v3254_v26 = vmul.f32 %v8142_v21, %v7592_v57 }
 0x4da   : > { %v3356_v31 = vadd.f32 %v3355_v2, %v3234_v58  ;;  %v8138_v58 = vld [vmem:[#allocation18_spill] sm:$0xff] }
 0x4db   : > { %v7586_v8 = vpop.permute.xlu0 %3142 }
 0x4dc   : > { %v7602_v30 = vpop.permute.xlu1 %3147 }
 0x4dd   : > { %3874 = vmatmul.mubr.bf16.gmra.mrb[44].mxu0 %v4498_v50 }
 0x4de   : > { %3937 = vmatmul.mubr.bf16.gmra.mrb[40].mxu1 %v4497_v52  ;;  %3883 = vmatprep.mubr.bf16.mxu0 %v8128_v61  ;;  %v3240_v52 = vmul.f32 %v8132_v18, %v3118_v45 }
 0x4df   : > { %3946 = vmatprep.mubr.bf16.mxu1 %v8128_v61  ;;  %v7596_v44 = vpop.permute.xlu0 %3152 }
 0x4e0   : > { %v7612_v35 = vpop.permute.xlu1 %3157  ;;  %v3417_v11 = vadd.f32 %v3416_v24, %v3240_v52  ;;  %v8146_v52 = vld [vmem:[#allocation26_spill] sm:$0xff] }
 0x4e3   : > { %v7608_v5 = vpop.permute.xlu0 %3162 }
 0x4e4   : > { %v7622_v54 = vpop.permute.xlu1 %3167 }
 0x4e5   : > { %3884 = vmatmul.mubr.bf16.gmra.mrb[48].mxu0 %v4499_v36 }
 0x4e6   : > { %3947 = vmatmul.mubr.bf16.gmra.mrb[44].mxu1 %v4498_v50 }
 0x4e7   : > { %3956 = vmatprep.mubr.bf16.mxu1 %v8128_v61  ;;  %v3233_v61 = vmul.f32 %v5179_v62, %v3113_v39  ;;  %v3238_v62 = vmul.f32 %v5088_v41, %v3118_v45  ;;  %v3239_v41 = vmul.f32 %v8131_v7, %v3118_v45  ;;  %v3243_v39 = vmul.f32 %v8135_v3, %v3123_v43  ;;  %v8141_v43 = vld [vmem:[#allocation23_spill] sm:$0xff] }
 0x4e8   : > { %v3253_v17 = vmul.f32 %v8141_v43, %v7592_v57 }
 0x4e9   : > { %v3326_v59 = vadd.f32 %v3325_v0, %v3233_v61  ;;  %v3357_v46 = vadd.f32 %v3356_v31, %v3238_v62  ;;  %v3387_v15 = vadd.f32 %v3386_v20, %v3239_v41  ;;  %v8137_v61 = vld [vmem:[#allocation22_spill] sm:$0xff]  ;;  %v3250_v0 = vmul.f32 %v8138_v58, %v3133_v48  ;;  %v8151_v58 = vld [vmem:[#allocation32_spill] sm:$0xff] }
 0x4ea   : > { %v3249_v45 = vmul.f32 %v8137_v61, %v3133_v48  ;;  %v8145_v41 = vld [vmem:[#allocation30_spill] sm:$0xff]  ;;  %v3258_v20 = vmul.f32 %v8146_v52, %v7586_v8 }
 0x4eb   : > { %v3327_v56 = vadd.f32 %v3326_v59, %v3237_v40  ;;  %v3358_v50 = vadd.f32 %v3357_v46, %v3242_v55  ;;  %v3248_v40 = vmul.f32 %v8140_v6, %v3128_v49  ;;  %v3388_v62 = vadd.f32 %v3387_v15, %v3243_v39  ;;  %v8150_v15 = vld [vmem:[#allocation27_spill] sm:$0xff]  ;;  %v8153_v6 = vld [vmem:[#allocation38_spill] sm:$0xff] }
 0x4ec   : > { %v3418_v59 = vadd.f32 %v3417_v11, %v3244_v51  ;;  %v3251_v55 = vmul.f32 %v8143_v1, %v3133_v48  ;;  %v3257_v18 = vmul.f32 %v8145_v41, %v7586_v8  ;;  %v3261_v51 = vmul.f32 %v8149_v42, %v7602_v30 }
 0x4ed   : > { %v3328_v32 = vadd.f32 %v3327_v56, %v3241_v12  ;;  %v3359_v63 = vadd.f32 %v3358_v50, %v3246_v29  ;;  %v7634_v12 = vpop.permute.xlu1 %3177  ;;  %v8144_v56 = vld [vmem:[#allocation20_spill] sm:$0xff]  ;;  %v3389_v7 = vadd.f32 %v3388_v62, %v3247_v38  ;;  %v3255_v29 = vmul.f32 %v8147_v28, %v7592_v57  ;;  %v8154_v62 = vld [vmem:[#allocation34_spill] sm:$0xff] }
 0x4ee   : > { %3957 = vmatmul.mubr.bf16.gmra.mrb[48].mxu1 %v4499_v36  ;;  %v7618_v36 = vpop.permute.xlu0 %3172  ;;  %v3252_v46 = vmul.f32 %v8144_v56, %v3133_v48  ;;  %v3419_v49 = vadd.f32 %v3418_v59, %v3248_v40  ;;  %v3262_v11 = vmul.f32 %v8150_v15, %v7602_v30  ;;  %v3265_v40 = vmul.f32 %v8153_v6, %v7596_v44  ;;  %v8157_v56 = vld [vmem:[#allocation39_spill] sm:$0xff] }
 0x4ef   : > { %v3329_v2 = vadd.f32 %v3328_v32, %v3245_v47  ;;  %v3360_v53 = vadd.f32 %v3359_v63, %v3250_v0  ;;  %v8148_v32 = vld [vmem:[#allocation21_spill] sm:$0xff]  ;;  %v3390_v3 = vadd.f32 %v3389_v7, %v3251_v55  ;;  %v3259_v0 = vmul.f32 %v8151_v58, %v7586_v8  ;;  %v8158_v7 = vld [vmem:[#allocation35_spill] sm:$0xff] }
 0x4f0   : > { %v3256_v50 = vmul.f32 %v8148_v32, %v7592_v57  ;;  %v3420_v48 = vadd.f32 %v3419_v49, %v3252_v46  ;;  %v3266_v59 = vmul.f32 %v8154_v62, %v7596_v44  ;;  %v3269_v46 = vmul.f32 %v8157_v56, %v7612_v35 }
 0x4f1   : > { %v3330_v14 = vadd.f32 %v3329_v2, %v3249_v45  ;;  %v3361_v23 = vadd.f32 %v3360_v53, %v3254_v26  ;;  %v7648_v39 = vpop.permute.xlu1 %3187  ;;  %v8152_v2 = vld [vmem:[#allocation28_spill] sm:$0xff]  ;;  %v3391_v4 = vadd.f32 %v3390_v3, %v3255_v29  ;;  %v8155_v26 = vld [vmem:[#allocation33_spill] sm:$0xff]  ;;  %v3270_v49 = vmul.f32 %v8158_v7, %v7612_v35 }
 0x4f2   : > { %v7628_v31 = vpop.permute.xlu0 %3182  ;;  %v3260_v63 = vmul.f32 %v8152_v2, %v7586_v8  ;;  %v3421_v57 = vadd.f32 %v3420_v48, %v3256_v50  ;;  %v8156_v53 = vld [vmem:[#allocation29_spill] sm:$0xff]  ;;  %v8161_v50 = vld [vmem:[#allocation46_spill] sm:$0xff] }
 0x4f3   : > { %v3331_v24 = vadd.f32 %v3330_v14, %v3253_v17  ;;  %v3362_v45 = vadd.f32 %v3361_v23, %v3258_v20  ;;  %v3263_v14 = vmul.f32 %v8155_v26, %v7602_v30  ;;  %v3264_v8 = vmul.f32 %v8156_v53, %v7602_v30  ;;  %v8159_v20 = vld [vmem:[#allocation40_spill] sm:$0xff]  ;;  %v8162_v48 = vld [vmem:[#allocation42_spill] sm:$0xff] }
 0x4f4   : > { %v3392_v1 = vadd.f32 %v3391_v4, %v3259_v0  ;;  %v3422_v55 = vadd.f32 %v3421_v57, %v3260_v63  ;;  %v8160_v23 = vld [vmem:[#allocation36_spill] sm:$0xff]  ;;  %v3273_v3 = vmul.f32 %v8161_v50, %v7608_v5  ;;  %v3274_v42 = vmul.f32 %v8162_v48, %v7608_v5  ;;  %v8165_v63 = vld [vmem:[#allocation47_spill] sm:$0xff] }
 0x4f5   : > { %v3332_v61 = vadd.f32 %v3331_v24, %v3257_v18  ;;  %v3363_v17 = vadd.f32 %v3362_v45, %v3262_v11  ;;  %v7664_v21 = vpop.permute.xlu1 %3764  ;;  %v3267_v24 = vmul.f32 %v8159_v20, %v7596_v44  ;;  %v3268_v28 = vmul.f32 %v8160_v23, %v7596_v44  ;;  %v8163_v11 = vld [vmem:[#allocation41_spill] sm:$0xff]  ;;  %v8166_v57 = vld [vmem:[#allocation43_spill] sm:$0xff]  ;;  %v8168_v26 = vld [vmem:[#allocation44_spill] sm:$0xff] }
 0x4f6   : > { %v7642_v47 = vpop.permute.xlu0 %3759  ;;  %v3393_v29 = vadd.f32 %v3392_v1, %v3263_v14  ;;  %v3423_v30 = vadd.f32 %v3422_v55, %v3264_v8  ;;  %v8164_v45 = vld [vmem:[#allocation37_spill] sm:$0xff]  ;;  %v3277_v4 = vmul.f32 %v8165_v63, %v7622_v54  ;;  %v3278_v6 = vmul.f32 %v8166_v57, %v7622_v54  ;;  %v8169_v8 = vld [vmem:[#allocation54_spill] sm:$0xff]  ;;  %v8174_v50 = vld [vmem:[#allocation51_spill] sm:$0xff] }
 0x4f7   : > { %v3333_v43 = vadd.f32 %v3332_v61, %v3261_v51  ;;  %v3364_v18 = vadd.f32 %v3363_v17, %v3266_v59  ;;  %v3271_v61 = vmul.f32 %v8163_v11, %v7612_v35  ;;  %v3272_v58 = vmul.f32 %v8164_v45, %v7612_v35  ;;  %v8170_v55 = vld [vmem:[#allocation50_spill] sm:$0xff]  ;;  %v8172_v20 = vld [vmem:[#allocation45_spill] sm:$0xff]  ;;  %v8176_v11 = vld [vmem:[#allocation52_spill] sm:$0xff] }
 0x4f8   : > { %v3394_v0 = vadd.f32 %v3393_v29, %v3267_v24  ;;  %v3424_v44 = vadd.f32 %v3423_v30, %v3268_v28  ;;  %v3276_v35 = vmul.f32 %v8168_v26, %v7608_v5  ;;  %v3281_v1 = vmul.f32 %v8169_v8, %v7618_v36  ;;  %v8173_v29 = vld [vmem:[#allocation55_spill] sm:$0xff]  ;;  %v8178_v63 = vld [vmem:[#allocation58_spill] sm:$0xff] }
 0x4f9   : > { %v3334_v41 = vadd.f32 %v3333_v43, %v3265_v40  ;;  %v7680_v32 = vpop.permute.xlu1 %3769  ;;  %v3365_v15 = vadd.f32 %v3364_v18, %v3270_v49  ;;  %v8167_v43 = vld [vmem:[#allocation48_spill] sm:$0xff]  ;;  %v3282_v56 = vmul.f32 %v8170_v55, %v7618_v36  ;;  %v3280_v24 = vmul.f32 %v8172_v20, %v7622_v54  ;;  %v8182_v8 = vld [vmem:[#allocation59_spill] sm:$0xff] }
 0x4fa   : > { %v7658_v38 = vpop.permute.xlu0 %3192  ;;  %v3275_v17 = vmul.f32 %v8167_v43, %v7608_v5  ;;  %v3395_v14 = vadd.f32 %v3394_v0, %v3271_v61  ;;  %v3425_v53 = vadd.f32 %v3424_v44, %v3272_v58  ;;  %v3285_v30 = vmul.f32 %v8173_v29, %v7634_v12  ;;  %v8177_v0 = vld [vmem:[#allocation62_spill] sm:$0xff] }
 0x4fb   : > { %v3335_v51 = vadd.f32 %v3334_v41, %v3269_v46  ;;  %v3366_v62 = vadd.f32 %v3365_v15, %v3274_v42  ;;  %v8171_v41 = vld [vmem:[#allocation49_spill] sm:$0xff]  ;;  %v3284_v61 = vmul.f32 %v8176_v11, %v7618_v36  ;;  %v3289_v44 = vmul.f32 %v8177_v0, %v7628_v31 }
 0x4fc   : > { %v3279_v18 = vmul.f32 %v8171_v41, %v7622_v54  ;;  %v3396_v23 = vadd.f32 %v3395_v14, %v3275_v17  ;;  %v3426_v5 = vadd.f32 %v3425_v53, %v3276_v35  ;;  %v8180_v17 = vld [vmem:[#allocation53_spill] sm:$0xff]  ;;  %v8181_v14 = vld [vmem:[#allocation63_spill] sm:$0xff] }
 0x4fd   : > { %v3336_v40 = vadd.f32 %v3335_v51, %v3273_v3  ;;  %v7696_v59 = vpop.permute.xlu1 %3774  ;;  %v3367_v7 = vadd.f32 %v3366_v62, %v3278_v6  ;;  %v3286_v3 = vmul.f32 %v8174_v50, %v7634_v12  ;;  %v8175_v51 = vld [vmem:[#allocation56_spill] sm:$0xff]  ;;  %v8179_v62 = vld [vmem:[#allocation57_spill] sm:$0xff]  ;;  %v3293_v53 = vmul.f32 %v8181_v14, %v7648_v39 }
 0x4fe   : > { %v7674_v52 = vpop.permute.xlu0 %3197  ;;  %v3283_v15 = vmul.f32 %v8175_v51, %v7618_v36  ;;  %v3397_v45 = vadd.f32 %v3396_v23, %v3279_v18  ;;  %v3427_v54 = vadd.f32 %v3426_v5, %v3280_v24  ;;  %v3287_v43 = vmul.f32 %v8179_v62, %v7634_v12  ;;  %v8184_v18 = vld [vmem:[#allocation60_spill] sm:$0xff] }
 0x4ff   : > { %v3337_v46 = vadd.f32 %v3336_v40, %v3277_v4  ;;  %v3368_v42 = vadd.f32 %v3367_v7, %v3282_v56  ;;  %v3290_v4 = vmul.f32 %v8178_v63, %v7628_v31  ;;  %v3288_v36 = vmul.f32 %v8180_v17, %v7634_v12  ;;  %v8183_v7 = vld [vmem:[#allocation64_spill] sm:$0xff] }
 0x500   : > { %v3398_v26 = vadd.f32 %v3397_v45, %v3283_v15  ;;  %v3428_v35 = vadd.f32 %v3427_v54, %v3284_v61  ;;  %v3291_v41 = vmul.f32 %v8183_v7, %v7628_v31  ;;  %v3292_v20 = vmul.f32 %v8184_v18, %v7628_v31  ;;  %v8188_v15 = vld [vmem:[#allocation61_spill] sm:$0xff]  ;;  %v8191_v17 = vld [vmem:[#allocation72_spill] sm:$0xff] }
 0x501   : > { %v7712_v28 = vpop.permute.xlu1 %4014  ;;  %v3338_v48 = vadd.f32 %v3337_v46, %v3281_v1  ;;  %v3369_v6 = vadd.f32 %v3368_v42, %v3286_v3  ;;  %v3294_v1 = vmul.f32 %v8182_v8, %v7648_v39  ;;  %v8186_v3 = vld [vmem:[#allocation66_spill] sm:$0xff]  ;;  %v8187_v42 = vld [vmem:[#allocation65_spill] sm:$0xff]  ;;  %v3296_v11 = vmul.f32 %v8188_v15, %v7648_v39  ;;  %v8199_v15 = vld [vmem:[#allocation80_spill] sm:$0xff] }
 0x502   : > { %v7690_v2 = vpop.permute.xlu0 %4009  ;;  %v3399_v24 = vadd.f32 %v3398_v26, %v3287_v43  ;;  %v3429_v12 = vadd.f32 %v3428_v35, %v3288_v36  ;;  %v3295_v51 = vmul.f32 %v8187_v42, %v7648_v39  ;;  %v3299_v36 = vmul.f32 %v8191_v17, %v7658_v38  ;;  %v8192_v39 = vld [vmem:[#allocation68_spill] sm:$0xff]  ;;  %v8195_v18 = vld [vmem:[#allocation73_spill] sm:$0xff] }
 0x503   : > { %v3339_v57 = vadd.f32 %v3338_v48, %v3285_v30  ;;  %v3370_v56 = vadd.f32 %v3369_v6, %v3290_v4  ;;  %v8185_v30 = vld [vmem:[#allocation70_spill] sm:$0xff]  ;;  %v3298_v48 = vmul.f32 %v8186_v3, %v7658_v38  ;;  %v8190_v4 = vld [vmem:[#allocation67_spill] sm:$0xff]  ;;  %v3300_v26 = vmul.f32 %v8192_v39, %v7658_v38  ;;  %v8202_v17 = vld [vmem:[#allocation81_spill] sm:$0xff] }
 0x504   : > { %v3297_v50 = vmul.f32 %v8185_v30, %v7658_v38  ;;  %v3400_v61 = vadd.f32 %v3399_v24, %v3291_v41  ;;  %v3430_v45 = vadd.f32 %v3429_v12, %v3292_v20  ;;  %v3303_v20 = vmul.f32 %v8195_v18, %v7674_v52  ;;  %v8196_v24 = vld [vmem:[#allocation69_spill] sm:$0xff]  ;;  %v8197_v30 = vld [vmem:[#allocation79_spill] sm:$0xff]  ;;  %v8206_v18 = vld [vmem:[#allocation84_spill] sm:$0xff] }
 0x505   : > { %v7728_v40 = vpop.permute.xlu1 %3779  ;;  %v3340_v55 = vadd.f32 %v3339_v57, %v3289_v44  ;;  %v3371_v29 = vadd.f32 %v3370_v56, %v3294_v1  ;;  %v8189_v44 = vld [vmem:[#allocation71_spill] sm:$0xff]  ;;  %v3302_v57 = vmul.f32 %v8190_v4, %v7674_v52  ;;  %v8194_v1 = vld [vmem:[#allocation74_spill] sm:$0xff]  ;;  %v3304_v12 = vmul.f32 %v8196_v24, %v7674_v52  ;;  %v8203_v39 = vld [vmem:[#allocation77_spill] sm:$0xff] }
 0x506   : > { %v7706_v49 = vpop.permute.xlu0 %3202  ;;  %v3301_v63 = vmul.f32 %v8189_v44, %v7674_v52  ;;  %v3401_v62 = vadd.f32 %v3400_v61, %v3295_v51  ;;  %v3431_v43 = vadd.f32 %v3430_v45, %v3296_v11  ;;  %v8198_v3 = vld [vmem:[#allocation75_spill] sm:$0xff]  ;;  %v8200_v61 = vld [vmem:[#allocation76_spill] sm:$0xff] }
 0x507   : > { %v3341_v5 = vadd.f32 %v3340_v55, %v3293_v53  ;;  %v3372_v0 = vadd.f32 %v3371_v29, %v3298_v48  ;;  %v8193_v53 = vld [vmem:[#allocation78_spill] sm:$0xff]  ;;  %v3306_v55 = vmul.f32 %v8194_v1, %v7706_v49  ;;  %v3307_v11 = vmul.f32 %v8199_v15, %v7706_v49 }
 0x508   : > { %v3305_v8 = vmul.f32 %v8193_v53, %v7706_v49  ;;  %v3402_v7 = vadd.f32 %v3401_v62, %v3299_v36  ;;  %v3432_v41 = vadd.f32 %v3431_v43, %v3300_v26  ;;  %v3308_v45 = vmul.f32 %v8200_v61, %v7706_v49  ;;  %v8204_v53 = vld [vmem:[#allocation86_spill] sm:$0xff]  ;;  %v8205_v49 = vld [vmem:[#allocation83_spill] sm:$0xff] }
 0x509   : > { %v3208_v23 = vpop.permute.xlu1 %3207  ;;  %v3342_v54 = vadd.f32 %v3341_v5, %v3297_v50  ;;  %v3373_v14 = vadd.f32 %v3372_v0, %v3302_v57 }
 0x50a   : > { %v7722_v58 = vpop.permute.xlu0 %4019  ;;  %v3309_v50 = vmul.f32 %v8197_v30, %v3208_v23  ;;  %v3310_v48 = vmul.f32 %v8198_v3, %v3208_v23  ;;  %v3403_v42 = vadd.f32 %v3402_v7, %v3303_v20  ;;  %v3433_v51 = vadd.f32 %v3432_v41, %v3304_v12  ;;  %v8207_v3 = vld [vmem:[#allocation85_spill] sm:$0xff] }
 0x50b   : > { %v3343_v35 = vadd.f32 %v3342_v54, %v3301_v63  ;;  %v3374_v29 = vadd.f32 %v3373_v14, %v3306_v55  ;;  %v8201_v63 = vld [vmem:[#allocation82_spill] sm:$0xff]  ;;  %v3311_v36 = vmul.f32 %v8202_v17, %v3208_v23  ;;  %v3312_v26 = vmul.f32 %v8203_v39, %v3208_v23 }
 0x50c   : > { %v3404_v62 = vadd.f32 %v3403_v42, %v3307_v11  ;;  %v3434_v43 = vadd.f32 %v3433_v51, %v3308_v45 }
 0x50d   : > { %v7756_v6 = vpop.permute.xlu1 %4024  ;;  %v3344_v38 = vadd.f32 %v3343_v35, %v3305_v8  ;;  %v3375_v52 = vadd.f32 %v3374_v29, %v3310_v48 }
 0x50e   : > { %v7738_v46 = vpop.permute.xlu0 %3784  ;;  %v3405_v7 = vadd.f32 %v3404_v62, %v3311_v36  ;;  %v3435_v41 = vadd.f32 %v3434_v43, %v3312_v26 }
 0x50f   : > { %v3345_v0 = vadd.f32 %v3344_v38, %v3309_v50 }
 0x511   : > { %v7772_v5 = vpop.permute.xlu1 %3789 }
 0x512   : > { %v3213_v31 = vpop.permute.xlu0 %3212 }
 0x513   : > { %v3313_v44 = vmul.f32 %v7313_v13, %v3213_v31  ;;  %v3314_v4 = vmul.f32 %v8201_v63, %v3213_v31  ;;  %v3315_v13 = vmul.f32 %v7386_v9, %v3213_v31  ;;  %v3316_v20 = vmul.f32 %v8206_v18, %v3213_v31 }
 0x514   : > { %v3461_v63 = vrot.slane %v7565_v27, 4 }
 0x515   : > { %v3218_v57 = vpop.permute.xlu1 %3217  ;;  %v3346_v35 = vadd.f32 %v3345_v0, %v3313_v44  ;;  %v3376_v14 = vadd.f32 %v3375_v52, %v3314_v4  ;;  %v3406_v23 = vadd.f32 %v3405_v7, %v3315_v13  ;;  %v3436_v30 = vadd.f32 %v3435_v41, %v3316_v20 }
 0x516   : > { %v7766_v56 = vpop.permute.xlu0 %4029  ;;  %v3317_v8 = vmul.f32 %v8204_v53, %v3218_v57  ;;  %v3318_v1 = vmul.f32 %v8205_v49, %v3218_v57  ;;  %v3319_v50 = vmul.f32 %v7391_v37, %v3218_v57  ;;  %v3320_v48 = vmul.f32 %v8207_v3, %v3218_v57 }
 0x518   : > { %v3347_v24 = vadd.f32 %v3346_v35, %v3317_v8  ;;  %v3377_v12 = vadd.f32 %v3376_v14, %v3318_v1  ;;  %v3407_v15 = vadd.f32 %v3406_v23, %v3319_v50  ;;  %v3437_v11 = vadd.f32 %v3436_v30, %v3320_v48 }
 0x51a   : > { %v7780_v54 = vpop.permute.xlu0 %3794 }
 0x51e   : > { %v3223_v55 = vpop.permute.xlu0 %3222 }
 0x51f   : > { %v3321_v38 = vmul.f32 %v7468_v25, %v3223_v55  ;;  %v3322_v29 = vmul.f32 %v7416_v19, %v3223_v55  ;;  %v3323_v9 = vmul.f32 %v7493_v33, %v3223_v55  ;;  %v3324_v31 = vmul.f32 %v7442_v22, %v3223_v55 }
 0x520   : > { %v3454_v25 = vrot.slane %v7563_v16, 4  ;;  %v3462_v22 = vadd.f32 %v3461_v63, %v7565_v27 }
 0x521   : > { %v3348_v42 = vadd.f32 %v3347_v24, %v3321_v38  ;;  %v3378_v51 = vadd.f32 %v3377_v12, %v3322_v29  ;;  %v3408_v0 = vadd.f32 %v3407_v15, %v3323_v9  ;;  %v3438_v19 = vadd.f32 %v3437_v11, %v3324_v31 }
 0x522   : > { %v3455_v37 = vadd.f32 %v3454_v25, %v7563_v16  ;;  %v3463_v13 = vrot.slane %v3462_v22, 2 }
 0x523   : > { %v3349_v61 = vrot.slane %v3348_v42, 4  ;;  %v3379_v45 = vrot.slane %v3378_v51, 4  ;;  %v3409_v4 = vrot.slane %v3408_v0, 4  ;;  %v3439_v57 = vrot.slane %v3438_v19, 4 }
 0x524   : > { %v3456_v33 = vrot.slane %v3455_v37, 2 }
 0x525   : > { %v3350_v52 = vadd.f32 %v3349_v61, %v3348_v42  ;;  %v3380_v44 = vadd.f32 %v3379_v45, %v3378_v51  ;;  %v7802_v14 = vadd.f32 %v3409_v4, %v3408_v0  ;;  %v7804_v53 = vadd.f32 %v3439_v57, %v3438_v19 }
 0x526   : > { %v7812_v41 = vadd.f32 %v3456_v33, %v3455_v37  ;;  %v7823_v51 = vadd.f32 %v3463_v13, %v3462_v22  ;;  %v3468_v61 = vrot.slane %v7571_v34, 4 }
 0x527   : > { %v3351_v62 = vrot.slane %v3350_v52, 2  ;;  %v3381_v43 = vrot.slane %v3380_v44, 2  ;;  %v3411_v24 = vrot.slane %v7802_v14, 2  ;;  %v3441_v12 = vrot.slane %v7804_v53, 2 }
 0x528   : > { %v3458_v42 = vrot.slane %v7812_v41, 1 }
 0x529   : > { %v7807_v1 = vadd.f32 %v3351_v62, %v3350_v52  ;;  %v7809_v55 = vadd.f32 %v3381_v43, %v3380_v44  ;;  %v3475_v44 = vrot.slane %v7573_v60, 4 }
 0x52b   : > { %v3353_v23 = vrot.slane %v7807_v1, 1  ;;  %v3383_v30 = vrot.slane %v7809_v55, 1 }
 0x5a0   : > { %v3855_v17 = vpop.f32.mrb[36].mxu0 }
 0x5a1   : > { %v3856_v36 = vadd.f32 %v3855_v17, %v7642_v47  ;;  %v3857_v39 = vpop.f32.mrb[37].mxu0 }
 0x5a2   : > { %v3858_v26 = vadd.f32 %v3857_v39, %v7642_v47  ;;  %v3859_v35 = vpop.f32.mrb[38].mxu0 }
 0x5a3   : > { %v3967_v16 = vmax.f32 %v3856_v36, 0.0  ;;  %v3860_v8 = vadd.f32 %v3859_v35, %v7664_v21  ;;  %v3861_v49 = vpop.f32.mrb[39].mxu0 }
 0x5a4   : > { %v3968_v7 = vmax.f32 %v3858_v26, 0.0  ;;  %v3862_v27 = vadd.f32 %v3861_v49, %v7664_v21 }
 0x5a5   : > { %v3971_v18 = vmax.f32 %v3860_v8, 0.0  ;;  %v4047_v38 = vmul.f32 %v7690_v2, %v3967_v16 }
 0x5a6   : > { %v3972_v20 = vmax.f32 %v3862_v27, 0.0  ;;  %v4048_v50 = vmul.f32 %v7690_v2, %v3968_v7  ;;  %v7841_v27 = vadd.f32 %v3475_v44, %v7573_v60 }
 0x5a7   : > { %v4051_v29 = vmul.f32 %v7712_v28, %v3971_v18 }
 0x5a8   : > { %v4052_v3 = vmul.f32 %v7712_v28, %v3972_v20  ;;  %v3865_v48 = vpop.f32.mrb[40].mxu0 }
 0x5a9   : > { %v3928_v15 = vpop.f32.mrb[36].mxu1  ;;  %v4079_v11 = vadd.f32 %v4051_v29, %v4047_v38  ;;  %v3866_v9 = vadd.f32 %v3865_v48, %v7680_v32  ;;  %v3867_v31 = vpop.f32.mrb[41].mxu0 }
 0x5aa   : > { %v3929_v45 = vadd.f32 %v3928_v15, %v7642_v47  ;;  %v3930_v25 = vpop.f32.mrb[37].mxu1  ;;  %v4092_v0 = vadd.f32 %v4052_v3, %v4048_v50  ;;  %v3868_v19 = vadd.f32 %v3867_v31, %v7680_v32  ;;  %v3869_v52 = vpop.f32.mrb[42].mxu0 }
 0x5ab   : > { %v3931_v37 = vadd.f32 %v3930_v25, %v7642_v47  ;;  %v3932_v63 = vpop.f32.mrb[38].mxu1  ;;  %v3975_v4 = vmax.f32 %v3866_v9, 0.0  ;;  %v3870_v57 = vadd.f32 %v3869_v52, %v7696_v59  ;;  %v3871_v62 = vpop.f32.mrb[43].mxu0  ;;  %v7837_v47 = vadd.f32 %v3468_v61, %v7571_v34 }
 0x5ac   : > { %v3969_v43 = vmax.f32 %v3929_v45, 0.0  ;;  %v3933_v17 = vadd.f32 %v3932_v63, %v7664_v21  ;;  %v3934_v33 = vpop.f32.mrb[39].mxu1  ;;  %v3976_v22 = vmax.f32 %v3868_v19, 0.0  ;;  %v3872_v36 = vadd.f32 %v3871_v62, %v7696_v59 }
 0x5ad   : > { %v3970_v39 = vmax.f32 %v3931_v37, 0.0  ;;  %v3935_v26 = vadd.f32 %v3934_v33, %v7664_v21  ;;  %v4055_v35 = vmul.f32 %v7722_v58, %v3975_v4  ;;  %v3979_v16 = vmax.f32 %v3870_v57, 0.0 }
 0x5ae   : > { %v3973_v8 = vmax.f32 %v3933_v17, 0.0  ;;  %v4056_v49 = vmul.f32 %v7722_v58, %v3976_v22  ;;  %v3980_v7 = vmax.f32 %v3872_v36, 0.0  ;;  %v4049_v38 = vmul.f32 %v7690_v2, %v3969_v43 }
 0x5af   : > { %v3974_v13 = vmax.f32 %v3935_v26, 0.0  ;;  %v4080_v18 = vadd.f32 %v4079_v11, %v4055_v35  ;;  %v4059_v20 = vmul.f32 %v7756_v6, %v3979_v16  ;;  %v4050_v3 = vmul.f32 %v7690_v2, %v3970_v39  ;;  %v4035_v26 = vpop.permute.xlu1 %4034 }
 0x5b0   : > { %v4053_v21 = vmul.f32 %v7712_v28, %v3973_v8  ;;  %v4093_v29 = vadd.f32 %v4092_v0, %v4056_v49  ;;  %v4060_v50 = vmul.f32 %v7756_v6, %v3980_v7  ;;  %v3875_v34 = vpop.f32.mrb[44].mxu0 }
 0x5b1   : > { %v4054_v48 = vmul.f32 %v7712_v28, %v3974_v13  ;;  %v3938_v15 = vpop.f32.mrb[40].mxu1  ;;  %v4081_v9 = vadd.f32 %v4080_v18, %v4059_v20  ;;  %v3876_v60 = vadd.f32 %v3875_v34, %v7728_v40  ;;  %v3877_v31 = vpop.f32.mrb[45].mxu0 }
 0x5b2   : > { %v4105_v11 = vadd.f32 %v4053_v21, %v4049_v38  ;;  %v3939_v61 = vadd.f32 %v3938_v15, %v7680_v32  ;;  %v3940_v45 = vpop.f32.mrb[41].mxu1  ;;  %v4094_v25 = vadd.f32 %v4093_v29, %v4060_v50  ;;  %v3878_v19 = vadd.f32 %v3877_v31, %v7728_v40  ;;  %v3879_v0 = vpop.f32.mrb[46].mxu0 }
 0x5b3   : > { %v4118_v52 = vadd.f32 %v4054_v48, %v4050_v3  ;;  %v3941_v44 = vadd.f32 %v3940_v45, %v7680_v32  ;;  %v3942_v37 = vpop.f32.mrb[42].mxu1  ;;  %v3983_v2 = vmax.f32 %v3876_v60, 0.0  ;;  %v3880_v28 = vadd.f32 %v3879_v0, %v7738_v46  ;;  %v3881_v63 = vpop.f32.mrb[47].mxu0 }
 0x5b4   : > { %v3977_v4 = vmax.f32 %v3939_v61, 0.0  ;;  %v3943_v57 = vadd.f32 %v3942_v37, %v7696_v59  ;;  %v3944_v62 = vpop.f32.mrb[43].mxu1  ;;  %v3984_v43 = vmax.f32 %v3878_v19, 0.0  ;;  %v3882_v17 = vadd.f32 %v3881_v63, %v7738_v46  ;;  %v4040_v37 = vpop.permute.xlu1 %4039 }
 0x5b5   : > { %v3978_v33 = vmax.f32 %v3941_v44, 0.0  ;;  %v3945_v22 = vadd.f32 %v3944_v62, %v7696_v59  ;;  %v4063_v36 = vmul.f32 %v7766_v56, %v3983_v2  ;;  %v3987_v39 = vmax.f32 %v3880_v28, 0.0 }
 0x5b6   : > { %v4057_v32 = vmul.f32 %v7722_v58, %v3977_v4  ;;  %v3981_v35 = vmax.f32 %v3943_v57, 0.0  ;;  %v4064_v16 = vmul.f32 %v7766_v56, %v3984_v43  ;;  %v3988_v8 = vmax.f32 %v3882_v17, 0.0 }
 0x5b7   : > { %v4058_v49 = vmul.f32 %v7722_v58, %v3978_v33  ;;  %v3982_v7 = vmax.f32 %v3945_v22, 0.0  ;;  %v4082_v13 = vadd.f32 %v4081_v9, %v4063_v36  ;;  %v4067_v18 = vmul.f32 %v4035_v26, %v3987_v39  ;;  %v4045_v22 = vpop.permute.xlu0 %4044 }
 0x5b8   : > { %v4106_v20 = vadd.f32 %v4105_v11, %v4057_v32  ;;  %v4061_v38 = vmul.f32 %v7756_v6, %v3981_v35  ;;  %v4095_v21 = vadd.f32 %v4094_v25, %v4064_v16  ;;  %v4068_v59 = vmul.f32 %v4035_v26, %v3988_v8  ;;  %v3885_v29 = vpop.f32.mrb[48].mxu0 }
 0x5b9   : > { %v4119_v50 = vadd.f32 %v4118_v52, %v4058_v49  ;;  %v4062_v34 = vmul.f32 %v7756_v6, %v3982_v7  ;;  %v3948_v3 = vpop.f32.mrb[44].mxu1  ;;  %v4083_v48 = vadd.f32 %v4082_v13, %v4067_v18  ;;  %v3886_v15 = vadd.f32 %v3885_v29, %v7772_v5  ;;  %v3887_v60 = vpop.f32.mrb[49].mxu0 }
 0x5ba   : > { %v4107_v31 = vadd.f32 %v4106_v20, %v4061_v38  ;;  %v3949_v58 = vadd.f32 %v3948_v3, %v7728_v40  ;;  %v3950_v61 = vpop.f32.mrb[45].mxu1  ;;  %v4096_v9 = vadd.f32 %v4095_v21, %v4068_v59  ;;  %v3888_v11 = vadd.f32 %v3887_v60, %v7772_v5  ;;  %v3889_v45 = vpop.f32.mrb[50].mxu0 }
 0x5bb   : > { %v4120_v19 = vadd.f32 %v4119_v50, %v4062_v34  ;;  %v3951_v25 = vadd.f32 %v3950_v61, %v7728_v40  ;;  %v3952_v0 = vpop.f32.mrb[46].mxu1  ;;  %v3991_v52 = vmax.f32 %v3886_v15, 0.0  ;;  %v3890_v6 = vadd.f32 %v3889_v45, %v7780_v54  ;;  %v3891_v44 = vpop.f32.mrb[51].mxu0 }
 0x5bc   : > { %v3985_v2 = vmax.f32 %v3949_v58, 0.0  ;;  %v3953_v28 = vadd.f32 %v3952_v0, %v7738_v46  ;;  %v3954_v63 = vpop.f32.mrb[47].mxu1  ;;  %v3992_v4 = vmax.f32 %v3888_v11, 0.0  ;;  %v3892_v57 = vadd.f32 %v3891_v44, %v7780_v54 }
 0x5bd   : > { %v3986_v62 = vmax.f32 %v3951_v25, 0.0  ;;  %v3955_v43 = vadd.f32 %v3954_v63, %v7738_v46  ;;  %v4071_v17 = vmul.f32 %v4040_v37, %v3991_v52  ;;  %v3995_v33 = vmax.f32 %v3890_v6, 0.0 }
 0x5be   : > { %v4065_v40 = vmul.f32 %v7766_v56, %v3985_v2  ;;  %v3989_v36 = vmax.f32 %v3953_v28, 0.0  ;;  %v4072_v39 = vmul.f32 %v4040_v37, %v3992_v4  ;;  %v3996_v32 = vmax.f32 %v3892_v57, 0.0 }
 0x5bf   : > { %v4066_v35 = vmul.f32 %v7766_v56, %v3986_v62  ;;  %v3990_v16 = vmax.f32 %v3955_v43, 0.0  ;;  %v4084_v8 = vadd.f32 %v4083_v48, %v4071_v17  ;;  %v4075_v49 = vmul.f32 %v4045_v22, %v3995_v33 }
 0x5c0   : > { %v4108_v7 = vadd.f32 %v4107_v31, %v4065_v40  ;;  %v4069_v13 = vmul.f32 %v4035_v26, %v3989_v36  ;;  %v4097_v18 = vadd.f32 %v4096_v9, %v4072_v39  ;;  %v4076_v20 = vmul.f32 %v4045_v22, %v3996_v32 }
 0x5c1   : > { %v3465_v38 = vrot.slane %v7823_v51, 1  ;;  %v4121_v46 = vadd.f32 %v4120_v19, %v4066_v35  ;;  %v4070_v21 = vmul.f32 %v4035_v26, %v3990_v16  ;;  %v3958_v59 = vpop.f32.mrb[48].mxu1  ;;  %v4085_v29 = vadd.f32 %v4084_v8, %v4075_v49  ;;  %v4143_v49 = vpop.permute.xlu1 %4142 }
 0x5c2   : > { %v3470_v50 = vrot.slane %v7837_v47, 2  ;;  %v4109_v34 = vadd.f32 %v4108_v7, %v4069_v13  ;;  %v3959_v3 = vadd.f32 %v3958_v59, %v7772_v5  ;;  %v3960_v15 = vpop.f32.mrb[49].mxu1  ;;  %v4098_v56 = vadd.f32 %v4097_v18, %v4076_v20 }
 0x5c3   : > { %v3477_v48 = vrot.slane %v7841_v27, 2  ;;  %v4122_v60 = vadd.f32 %v4121_v46, %v4070_v21  ;;  %v3961_v31 = vadd.f32 %v3960_v15, %v7772_v5  ;;  %v4086_v58 = vrot.slane %v4085_v29, 4  ;;  %v3962_v61 = vpop.f32.mrb[50].mxu1  ;;  %v8208_v46 = vld [vmem:[#allocation7_spill] sm:$0xff] }
 0x5c4   : > { %v3459_v26 = vadd.f32 %v3458_v42, %v7812_v41  ;;  %v3993_v9 = vmax.f32 %v3959_v3, 0.0  ;;  %v3963_v11 = vadd.f32 %v3962_v61, %v7780_v54  ;;  %v4099_v45 = vrot.slane %v4098_v56, 4  ;;  %v3964_v19 = vpop.f32.mrb[51].mxu1 }
 0x5c5   : > { %v3466_v25 = vadd.f32 %v3465_v38, %v7823_v51  ;;  %v3994_v0 = vmax.f32 %v3961_v31, 0.0  ;;  %v4087_v52 = vadd.f32 %v4086_v58, %v4085_v29  ;;  %v3965_v6 = vadd.f32 %v3964_v19, %v7780_v54 }
 0x5c6   : > { %v3471_v44 = vadd.f32 %v3470_v50, %v7837_v47  ;;  %v4073_v5 = vmul.f32 %v4040_v37, %v3993_v9  ;;  %v3997_v2 = vmax.f32 %v3963_v11, 0.0  ;;  %v4100_v28 = vadd.f32 %v4099_v45, %v4098_v56 }
 0x5c7   : > { %v3478_v63 = vadd.f32 %v3477_v48, %v7841_v27  ;;  %v4074_v4 = vmul.f32 %v4040_v37, %v3994_v0  ;;  %v4088_v41 = vrot.slane %v4087_v52, 2  ;;  %v3998_v42 = vmax.f32 %v3965_v6, 0.0 }
 0x5c8   : > { %v3481_v57 = vmul.f32 0.5, %v3459_v26  ;;  %v4110_v62 = vadd.f32 %v4109_v34, %v4073_v5  ;;  %v4077_v43 = vmul.f32 %v4045_v22, %v3997_v2  ;;  %v4101_v17 = vrot.slane %v4100_v28, 2 }
 0x5c9   : > { %v3482_v33 = vmul.f32 0.5, %v3466_v25  ;;  %v4123_v51 = vadd.f32 %v4122_v60, %v4074_v4  ;;  %v4089_v40 = vadd.f32 %v4088_v41, %v4087_v52  ;;  %v4078_v36 = vmul.f32 %v4045_v22, %v3998_v42 }
 0x5ca   : > { %v3354_v54 = vadd.f32 %v3353_v23, %v7807_v1  ;;  %v3472_v47 = vrot.slane %v3471_v44, 1  ;;  %v4111_v39 = vadd.f32 %v4110_v62, %v4077_v43  ;;  %v4102_v32 = vadd.f32 %v4101_v17, %v4100_v28 }
 0x5cb   : > { %v3384_v27 = vadd.f32 %v3383_v30, %v7809_v55  ;;  %v3479_v37 = vrot.slane %v3478_v63, 1  ;;  %v4090_v35 = vrot.slane %v4089_v40, 1  ;;  %v4124_v16 = vadd.f32 %v4123_v51, %v4078_v36 }
 0x5cc   : > { %v3412_v8 = vadd.f32 %v3411_v24, %v7802_v14  ;;  %v3442_v22 = vadd.f32 %v3441_v12, %v7804_v53  ;;  %v4112_v1 = vrot.slane %v4111_v39, 4  ;;  %v4103_v23 = vrot.slane %v4102_v32, 1 }
 0x5cd   : > { %v4131_v7 = vadd.f32 %v3481_v57, %v3354_v54  ;;  %v4132_v13 = vadd.f32 %v3482_v33, %v3384_v27  ;;  %v4091_v18 = vadd.f32 %v4090_v35, %v4089_v40  ;;  %v4125_v20 = vrot.slane %v4124_v16, 4 }
 0x5ce   : > { %v3473_v38 = vadd.f32 %v3472_v47, %v3471_v44  ;;  %v4113_v55 = vadd.f32 %v4112_v1, %v4111_v39  ;;  %v4104_v30 = vadd.f32 %v4103_v23, %v4102_v32  ;;  %v4148_v21 = vrot.slane %v4143_v49, %v8208_v46 }
 0x5cf   : > { %v3480_v59 = vadd.f32 %v3479_v37, %v3478_v63  ;;  %v4135_v29 = vadd.f32 %v4131_v7, %v4091_v18  ;;  %v4126_v50 = vadd.f32 %v4125_v20, %v4124_v16  ;;  %v3413_v14 = vrot.slane %v3412_v8, 1 }
 0x5d0   : > { %v4114_v24 = vrot.slane %v4113_v55, 2  ;;  %v4136_v34 = vadd.f32 %v4132_v13, %v4104_v30  ;;  %v3443_v3 = vrot.slane %v3442_v22, 1  ;;  %v4566_v15 = vmov 1966171168  }
 0x5d1   : > { %v4149_v53 = vadd.f32 %v4148_v21, %v4135_v29  ;;  %v4127_v12 = vrot.slane %v4126_v50, 2  ;;  %v4160_v56 = vunpack.c.l.s4 %v4566_v15  ;;  %v3483_v48 = vmul.f32 0.5, %v3473_v38 }
 0x5d2   : > { %v4115_v60 = vadd.f32 %v4114_v24, %v4113_v55  ;;  %v4150_v31 = vadd.f32 %v4148_v21, %v4136_v34  ;;  %v3484_v58 = vmul.f32 0.5, %v3480_v59  ;;  %v3414_v26 = vadd.f32 %v3413_v14, %v3412_v8 }
 0x5d3   : > { %v4128_v61 = vadd.f32 %v4127_v12, %v4126_v50  ;;  %v3444_v45 = vadd.f32 %v3443_v3, %v3442_v22  ;;  %v4161_v25 = vunpack.c.0.s8 %v4160_v56  ;;  %v8209_v43 = vlaneseq }
 0x5d4   : > { %v4116_v9 = vrot.slane %v4115_v60, 1  ;;  %v4157_v11 = vcombine.low %v4149_v53, %v4150_v31  ;;  %v4133_v0 = vadd.f32 %v3483_v48, %v3414_v26 }
 0x5d5   : > { %v4129_v19 = vrot.slane %v4128_v61, 1  ;;  %v4134_v6 = vadd.f32 %v3484_v58, %v3444_v45  ;;  %v4164_v28 = vsub.s32 %v4161_v25, %v4677_v10  ;;  %vm4184_vm13 = vcmp.lt.s32.totalorder %v8209_v43, 512 }
 0x5d6   : > { %v4117_v52 = vadd.f32 %v4116_v9, %v4115_v60 }
 0x5d7   : > { %v4130_v44 = vadd.f32 %v4129_v19, %v4128_v61  ;;  %v4165_v42 = vrot.slane %v4157_v11, %v4164_v28 }
 0x5d8   : > { %v4137_v5 = vadd.f32 %v4133_v0, %v4117_v52 }
 0x5d9   : > { %v4138_v2 = vadd.f32 %v4134_v6, %v4130_v44 }
 0x5da   : > { %v4151_v63 = vadd.f32 %v4148_v21, %v4137_v5 }
 0x5db   : > { %v4152_v4 = vadd.f32 %v4148_v21, %v4138_v2 }
 0x5dd   : > { %v4158_v41 = vcombine.low %v4151_v63, %v4152_v4 }
 0x5df   : > { %v4172_v57 = vrot.slane %v4158_v41, %v4164_v28 }
 0x5e1   : > { %v4173_v62 = vcombine.low %v4165_v42, %v4172_v57 }
 0x5e3   : > { %v4180_v17 = vrot.slane %v4173_v62, %v4164_v28 }
 0x5e5   : > { %4186 = vst.msk [vmem:[%s339_s18] sm:$0xf] %vm4184_vm13, %v4180_v17 }
 0x5e6   : > { %4513 = shalt.err (!%p4510_p5)
}
 0x5e7   : > { %s4514_s25 = scalar_lea.hbm %s7907_s22, 64  ;;  %s4518_s13 = scalar_lea.hbm %s7959_s8, 128 }
 0x5e8   : > { %p4515_p7 = scmp.ne.s32.totalorder %s7907_s22, %s4514_s25  ;;  %p4519_p12 = scmp.lt.u32.totalorder %s7907_s22, %s7959_s8 }
 0x5e9   : > { %p4520_p13 = scmp.lt.u32.totalorder %s4518_s13, %s4514_s25  ;;  %p4522_p1 = scmp.lt.u32.totalorder %s4514_s25, %s7907_s22 }
 0x5ea   : > { %p4516_p10 = pnand %p4515_p7, %p4654_p6 }
 0x5eb   : > { %p4521_p0 = por %p4520_p13, %p4519_p12 }
 0x5ec   : > { %p4517_p11 = pneg %p4516_p10 }
 0x5ed   : > { %p4523_p2 = por %p4522_p1, %p4521_p0 }
 0x5ef   : > { %p4524_p3 = pnand %p4523_p2, %p4517_p11 }
 0x5f1   : > { %4527 = shalt.err (!%p4524_p3)
}
 0x5f2   : > { %4425 = dma.vmem_to_hbm [thread:$0]  (%p4654_p6), %s7909_s19, 64, %s7907_s22, %s4188_s23  }
 0x5f3 PF: > { %s4214_s20 = sand.u32 1, %s4550_s29   ;;  %p4428_p4 = pnand %p4269_p9, %p4658_p8 }
 0x5f4   : > { %s4215_s21 = scalar_lea.sflag [#allocation5], %s4214_s20 }
 0x5f5   : > { %4545 = dma.done.wait (!%p4428_p4), %s4215_s21, 64  }
 0x5f6   : > { %4547 = vsyncadd (!%p4428_p4), %s4215_s21, 4294967232  ;;  %p20_p5 = scmp.ge.s32.totalorder %s4639_s12, 4   ;;  %s8210_s29 = smov %s4554_s30 }
 0x5f7   : > { %s8211_s30 = smov %s4558_s9  ;;  %s8212_s9 = smov %s4652_s15 }
 0x5f8   : > { %s8213_s10 = smov %s4639_s12  ;;  %22 = sbr.rel (!%p20_p5) target bundleno = 6 (0x6), region = 115 }
 0x5ff   :  { %4220 = vsyncpa [#allocation5], 1 }
 0x600   :  { %4222 = vsyncpa [#allocation5 + $0x1], 1 }

</bundles_post_ra>
